<compile_context>
chip_gen: v7x
topology: tpu7x:2x2x1
jax: 0.10.0
libtpu: 0.0.40
codegen_flags: <defaults>
</compile_context>

<pallas_src>
import functools

import jax
import jax.numpy as jnp
from jax.experimental import pallas as pl
from jax.experimental.pallas import tpu as pltpu

BN_EPSILON = 0.001
LANE = 128


# ----------------------------------------------------------------------------
# small helpers
# ----------------------------------------------------------------------------
def _round_up(x, m):
    return (x + m - 1) // m * m


def _pad_axis(a, target, axis):
    pad = [(0, 0)] * a.ndim
    pad[axis] = (0, target - a.shape[axis])
    return jnp.pad(a, pad)


def _pick_row_tile(H, W, C, budget_bytes=4 * 1024 * 1024):
    """Largest divisor of H whose (th, W, C) f32 block fits the VMEM budget."""
    best = 1
    for th in range(1, H + 1):
        if H % th == 0 and th * W * C * 4 <= budget_bytes:
            best = th
    return best


def _cost(flops, bytes_accessed):
    return pl.CostEstimate(flops=int(flops), transcendentals=0,
                           bytes_accessed=int(bytes_accessed))


def _bn_scale_bias(psum, psumsq, count, gamma, beta):
    """Fold training-mode BN (batch stats, biased variance) into scale/bias."""
    mean = psum / count
    var = jnp.maximum(psumsq / count - mean * mean, 0.0)
    scale = gamma * jax.lax.rsqrt(var + BN_EPSILON)
    bias = beta - mean * scale
    return scale, bias


# ----------------------------------------------------------------------------
# Pallas kernels
# ----------------------------------------------------------------------------
def _expand_conv_kernel(x_ref, w_ref, y_ref, sum_ref, sq_ref):
    """1x1 expansion conv (bf16 x bf16 -> f32 MXU) + per-channel partial stats."""
    _, th, w_, cin = x_ref.shape
    cexp = w_ref.shape[1]
    x2 = x_ref[0].reshape(th * w_, cin).astype(jnp.bfloat16)
    y = jnp.dot(x2, w_ref[...], preferred_element_type=jnp.float32)

    @pl.when((pl.program_id(0) == 0) & (pl.program_id(1) == 0))
    def _init():
        sum_ref[...] = jnp.zeros_like(sum_ref)
        sq_ref[...] = jnp.zeros_like(sq_ref)

    sum_ref[...] += jnp.sum(y, axis=0, keepdims=True)
    sq_ref[...] += jnp.sum(y * y, axis=0, keepdims=True)
    y_ref[0] = y.reshape(th, w_, cexp)


def _project_conv_kernel(x_ref, w_ref, a_ref, b_ref, y_ref, sum_ref, sq_ref):
    """Fused dw-BN/ReLU6 -> 1x1 projection conv -> per-channel partial stats."""
    _, th, w_, cexp = x_ref.shape
    cout = w_ref.shape[1]
    x2 = x_ref[0].reshape(th * w_, cexp)
    x2 = jnp.clip(x2 * a_ref[...] + b_ref[...], 0.0, 6.0)
    y = jnp.dot(x2.astype(jnp.bfloat16), w_ref[...],
                preferred_element_type=jnp.float32)

    @pl.when((pl.program_id(0) == 0) & (pl.program_id(1) == 0))
    def _init():
        sum_ref[...] = jnp.zeros_like(sum_ref)
        sq_ref[...] = jnp.zeros_like(sq_ref)

    sum_ref[...] += jnp.sum(y, axis=0, keepdims=True)
    sq_ref[...] += jnp.sum(y * y, axis=0, keepdims=True)
    y_ref[0] = y.reshape(th, w_, cout)


def _dw_conv_kernel(x_ref, w_ref, a_ref, b_ref, y_ref, sum_ref, sq_ref, xp_ref,
                    *, k, stride, pad, fuse_in_act):
    """Fused expand-BN/ReLU6 -> kxk depthwise conv -> per-channel partial stats.

    One (batch element, 128-channel slice) per grid step; the zero halo is
    built in a VMEM scratch so no padded copy ever round-trips through HBM.
    """
    _, H, W, ct = x_ref.shape
    _, Ho, Wo, _ = y_ref.shape
    x = x_ref[0]
    if fuse_in_act:
        x = jnp.clip(x * a_ref[...].reshape(1, 1, ct)
                     + b_ref[...].reshape(1, 1, ct), 0.0, 6.0)
    xp_ref[...] = jnp.zeros_like(xp_ref)
    xp_ref[pad:pad + H, pad:pad + W, :] = x

    w = w_ref[...]
    acc = jnp.zeros((Ho, Wo, ct), jnp.float32)
    for di in range(k):
        for dj in range(k):
            if stride == 1:
                tap = xp_ref[di:di + Ho, dj:dj + Wo, :]
            else:
                tap = xp_ref[pl.ds(di, Ho, stride=stride),
                             pl.ds(dj, Wo, stride=stride), :]
            acc = acc + tap * w[di * k + dj].reshape(1, 1, ct)

    @pl.when(pl.program_id(1) == 0)
    def _init():
        sum_ref[...] = jnp.zeros_like(sum_ref)
        sq_ref[...] = jnp.zeros_like(sq_ref)

    sum_ref[...] += jnp.sum(acc, axis=(0, 1)).reshape(1, ct)
    sq_ref[...] += jnp.sum(acc * acc, axis=(0, 1)).reshape(1, ct)
    y_ref[0] = acc


def _bn_kernel(y_ref, a_ref, b_ref, o_ref):
    c = o_ref.shape[3]
    o_ref[0] = y_ref[0] * a_ref[...].reshape(1, 1, c) + b_ref[...].reshape(1, 1, c)


def _bn_skip_kernel(y_ref, a_ref, b_ref, s_ref, o_ref):
    c = o_ref.shape[3]
    o_ref[0] = (y_ref[0] * a_ref[...].reshape(1, 1, c)
                + b_ref[...].reshape(1, 1, c) + s_ref[0])


# ----------------------------------------------------------------------------
# pallas_call wrappers (tiled + pipelined)
# ----------------------------------------------------------------------------
def _expansion_conv(x_p, w_bf16, *, row_tile):
    N, H, W, cin = x_p.shape
    cexp = w_bf16.shape[1]
    rb = H // row_tile
    flops = 2 * N * H * W * cin * cexp
    bytes_acc = N * H * W * (cin + cexp) * 4 + cin * cexp * 2
    return pl.pallas_call(
        _expand_conv_kernel,
        grid=(N, rb),
        in_specs=[
            pl.BlockSpec((1, row_tile, W, cin), lambda n, r: (n, r, 0, 0)),
            pl.BlockSpec((cin, cexp), lambda n, r: (0, 0)),
        ],
        out_specs=(
            pl.BlockSpec((1, row_tile, W, cexp), lambda n, r: (n, r, 0, 0)),
            pl.BlockSpec((1, cexp), lambda n, r: (0, 0)),
            pl.BlockSpec((1, cexp), lambda n, r: (0, 0)),
        ),
        out_shape=(
            jax.ShapeDtypeStruct((N, H, W, cexp), jnp.float32),
            jax.ShapeDtypeStruct((1, cexp), jnp.float32),
            jax.ShapeDtypeStruct((1, cexp), jnp.float32),
        ),
        compiler_params=pltpu.CompilerParams(
            dimension_semantics=("arbitrary", "arbitrary")),
        cost_estimate=_cost(flops, bytes_acc),
    )(x_p, w_bf16)


def _depthwise_conv(x, w_dw, scale_in, bias_in, *, k, stride, fuse_in_act):
    N, H, W, cp = x.shape
    pad = k // 2
    Ho = (H + 2 * pad - k) // stride + 1
    Wo = (W + 2 * pad - k) // stride + 1
    ct = LANE
    cb = cp // ct
    flops = N * Ho * Wo * cp * (2 * k * k + 4)
    bytes_acc = (N * H * W * cp + N * Ho * Wo * cp) * 4
    kern = functools.partial(_dw_conv_kernel, k=k, stride=stride, pad=pad,
                             fuse_in_act=fuse_in_act)
    # TODO(synk): row-tile the depthwise (with a k//2 halo) for very large H*W
    # so a single (H, W, 128) image block never approaches v7x's 64 MiB VMEM.
    return pl.pallas_call(
        kern,
        grid=(cb, N),
        in_specs=[
            pl.BlockSpec((1, H, W, ct), lambda c, n: (n, 0, 0, c)),
            pl.BlockSpec((k * k, ct), lambda c, n: (0, c)),
            pl.BlockSpec((1, ct), lambda c, n: (0, c)),
            pl.BlockSpec((1, ct), lambda c, n: (0, c)),
        ],
        out_specs=(
            pl.BlockSpec((1, Ho, Wo, ct), lambda c, n: (n, 0, 0, c)),
            pl.BlockSpec((1, ct), lambda c, n: (0, c)),
            pl.BlockSpec((1, ct), lambda c, n: (0, c)),
        ),
        out_shape=(
            jax.ShapeDtypeStruct((N, Ho, Wo, cp), jnp.float32),
            jax.ShapeDtypeStruct((1, cp), jnp.float32),
            jax.ShapeDtypeStruct((1, cp), jnp.float32),
        ),
        scratch_shapes=[pltpu.VMEM((H + 2 * pad, W + 2 * pad, ct), jnp.float32)],
        compiler_params=pltpu.CompilerParams(
            dimension_semantics=("parallel", "arbitrary")),
        cost_estimate=_cost(flops, bytes_acc),
    )(x, w_dw, scale_in, bias_in)


def _projection_conv(x, w_bf16, scale_in, bias_in, *, row_tile):
    N, H, W, cexp = x.shape
    cout = w_bf16.shape[1]
    rb = H // row_tile
    flops = 2 * N * H * W * cexp * cout
    bytes_acc = N * H * W * (cexp + cout) * 4 + cexp * cout * 2
    return pl.pallas_call(
        _project_conv_kernel,
        grid=(N, rb),
        in_specs=[
            pl.BlockSpec((1, row_tile, W, cexp), lambda n, r: (n, r, 0, 0)),
            pl.BlockSpec((cexp, cout), lambda n, r: (0, 0)),
            pl.BlockSpec((1, cexp), lambda n, r: (0, 0)),
            pl.BlockSpec((1, cexp), lambda n, r: (0, 0)),
        ],
        out_specs=(
            pl.BlockSpec((1, row_tile, W, cout), lambda n, r: (n, r, 0, 0)),
            pl.BlockSpec((1, cout), lambda n, r: (0, 0)),
            pl.BlockSpec((1, cout), lambda n, r: (0, 0)),
        ),
        out_shape=(
            jax.ShapeDtypeStruct((N, H, W, cout), jnp.float32),
            jax.ShapeDtypeStruct((1, cout), jnp.float32),
            jax.ShapeDtypeStruct((1, cout), jnp.float32),
        ),
        compiler_params=pltpu.CompilerParams(
            dimension_semantics=("arbitrary", "arbitrary")),
        cost_estimate=_cost(flops, bytes_acc),
    )(x, w_bf16, scale_in, bias_in)


def _bn_finalize(y, scale, bias, skip, *, row_tile):
    N, H, W, cp = y.shape
    rb = H // row_tile
    blk = pl.BlockSpec((1, row_tile, W, cp), lambda n, r: (n, r, 0, 0))
    vec = pl.BlockSpec((1, cp), lambda n, r: (0, 0))
    cparams = pltpu.CompilerParams(dimension_semantics=("parallel", "parallel"))
    out_shape = jax.ShapeDtypeStruct((N, H, W, cp), jnp.float32)
    n_big = 2 + (1 if skip is not None else 0)
    ce = _cost(3 * N * H * W * cp, n_big * N * H * W * cp * 4)
    if skip is None:
        return pl.pallas_call(
            _bn_kernel, grid=(N, rb),
            in_specs=[blk, vec, vec], out_specs=blk, out_shape=out_shape,
            compiler_params=cparams, cost_estimate=ce,
        )(y, scale, bias)
    return pl.pallas_call(
        _bn_skip_kernel, grid=(N, rb),
        in_specs=[blk, vec, vec, blk], out_specs=blk, out_shape=out_shape,
        compiler_params=cparams, cost_estimate=ce,
    )(y, scale, bias, skip)


# ----------------------------------------------------------------------------
# Parameter init (deterministic) and MBConv2 forward
# ----------------------------------------------------------------------------
def init_mbconv2_params(key, C_in, C_out, kernel_size, expansion_ratio):
    C_exp = int(C_in * expansion_ratio)
    k0, k1, k2 = jax.random.split(key, 3)
    params = {}
    if expansion_ratio > 1:
        params["w_exp"] = 0.1 * jax.random.normal(k0, (C_in, C_exp), jnp.float32)
        params["g_exp"] = jnp.ones((C_exp,), jnp.float32)   # BN affine defaults
        params["b_exp"] = jnp.zeros((C_exp,), jnp.float32)
    params["w_dw"] = 0.1 * jax.random.normal(
        k1, (kernel_size * kernel_size, C_exp), jnp.float32)
    params["g_dw"] = jnp.ones((C_exp,), jnp.float32)
    params["b_dw"] = jnp.zeros((C_exp,), jnp.float32)
    params["w_pw"] = 0.1 * jax.random.normal(k2, (C_exp, C_out), jnp.float32)
    params["g_pw"] = jnp.ones((C_out,), jnp.float32)
    params["b_pw"] = jnp.zeros((C_out,), jnp.float32)
    return params


def mbconv2_forward(x_nchw, params, *, kernel_size, stride,
                    expansion_ratio=6, enable_skip=True):
    N, C_in, H, W = x_nchw.shape
    C_out = params["w_pw"].shape[1]
    C_exp = params["w_dw"].shape[1]
    do_skip = enable_skip and stride == 1 and C_in == C_out

    cin_p = _round_up(C_in, LANE)
    cexp_p = _round_up(C_exp, LANE)
    cout_p = _round_up(C_out, LANE)

    # NCHW -> NHWC, channels zero-padded to a lane-dense multiple of 128.
    x = jnp.transpose(x_nchw, (0, 2, 3, 1)).astype(jnp.float32)
    x_p = _pad_axis(x, cin_p, axis=3)

    count_in = float(N * H * W)

    # ---- stage 1: 1x1 expansion conv + partial BN stats ---------------------
    if expansion_ratio > 1:
        w_exp = _pad_axis(_pad_axis(params["w_exp"], cin_p, 0), cexp_p, 1)
        g_exp = _pad_axis(params["g_exp"], cexp_p, 0).reshape(1, cexp_p)
        b_exp = _pad_axis(params["b_exp"], cexp_p, 0).reshape(1, cexp_p)
        row_tile = _pick_row_tile(H, W, cexp_p)
        y_exp, s1, q1 = _expansion_conv(x_p, w_exp.astype(jnp.bfloat16),
                                        row_tile=row_tile)
        scale1, bias1 = _bn_scale_bias(s1, q1, count_in, g_exp, b_exp)
        fuse_in_act = True
    else:
        y_exp = x_p                       # C_exp == C_in in this case
        scale1 = jnp.ones((1, cexp_p), jnp.float32)
        bias1 = jnp.zeros((1, cexp_p), jnp.float32)
        fuse_in_act = False

    # ---- stage 2: fused expand-BN/ReLU6 + kxk depthwise conv + stats --------
    w_dw = _pad_axis(params["w_dw"], cexp_p, 1)
    g_dw = _pad_axis(params["g_dw"], cexp_p, 0).reshape(1, cexp_p)
    b_dw = _pad_axis(params["b_dw"], cexp_p, 0).reshape(1, cexp_p)
    y_dw, s2, q2 = _depthwise_conv(y_exp, w_dw, scale1, bias1,
                                   k=kernel_size, stride=stride,
                                   fuse_in_act=fuse_in_act)
    _, Ho, Wo, _ = y_dw.shape
    count_out = float(N * Ho * Wo)
    scale2, bias2 = _bn_scale_bias(s2, q2, count_out, g_dw, b_dw)

    # ---- stage 3: fused dw-BN/ReLU6 + 1x1 projection conv + stats -----------
    w_pw = _pad_axis(_pad_axis(params["w_pw"], cexp_p, 0), cout_p, 1)
    g_pw = _pad_axis(params["g_pw"], cout_p, 0).reshape(1, cout_p)
    b_pw = _pad_axis(params["b_pw"], cout_p, 0).reshape(1, cout_p)
    row_tile2 = _pick_row_tile(Ho, Wo, max(cexp_p, cout_p))
    y_pw, s3, q3 = _projection_conv(y_dw, w_pw.astype(jnp.bfloat16),
                                    scale2, bias2, row_tile=row_tile2)
    scale3, bias3 = _bn_scale_bias(s3, q3, count_out, g_pw, b_pw)

    # ---- stage 4: projection BN (+ residual skip) ----------------------------
    skip = x_p if do_skip else None
    out_p = _bn_finalize(y_pw, scale3, bias3, skip, row_tile=row_tile2)

    out = out_p[..., :C_out]
    return jnp.transpose(out, (0, 3, 1, 2))   # back to NCHW


# ----------------------------------------------------------------------------
# Pure-JAX reference (f32, HIGHEST precision) — for correctness check only
# ----------------------------------------------------------------------------
def _bn_train_nhwc(y, g, b):
    mean = jnp.mean(y, axis=(0, 1, 2), keepdims=True)
    var = jnp.mean((y - mean) ** 2, axis=(0, 1, 2), keepdims=True)
    return ((y - mean) * jax.lax.rsqrt(var + BN_EPSILON)
            * g.reshape(1, 1, 1, -1) + b.reshape(1, 1, 1, -1))


def mbconv2_reference(x_nchw, params, *, kernel_size, stride,
                      expansion_ratio=6, enable_skip=True):
    dn = ("NHWC", "HWIO", "NHWC")
    hi = jax.lax.Precision.HIGHEST
    x = jnp.transpose(x_nchw, (0, 2, 3, 1)).astype(jnp.float32)
    C_in = x.shape[-1]
    C_out = params["w_pw"].shape[1]
    do_skip = enable_skip and stride == 1 and C_in == C_out
    y = x
    if expansion_ratio > 1:
        C_exp = params["w_exp"].shape[1]
        w = params["w_exp"].reshape(1, 1, C_in, C_exp)
        y = jax.lax.conv_general_dilated(y, w, (1, 1), "VALID",
                                         dimension_numbers=dn, precision=hi)
        y = jnp.clip(_bn_train_nhwc(y, params["g_exp"], params["b_exp"]), 0.0, 6.0)
    C_exp = y.shape[-1]
    k = kernel_size
    pad = k // 2
    w_dw = params["w_dw"].reshape(k, k, 1, C_exp)
    y = jax.lax.conv_general_dilated(y, w_dw, (stride, stride),
                                     [(pad, pad), (pad, pad)],
                                     dimension_numbers=dn,
                                     feature_group_count=C_exp, precision=hi)
    y = jnp.clip(_bn_train_nhwc(y, params["g_dw"], params["b_dw"]), 0.0, 6.0)
    w_pw = params["w_pw"].reshape(1, 1, C_exp, C_out)
    y = jax.lax.conv_general_dilated(y, w_pw, (1, 1), "VALID",
                                     dimension_numbers=dn, precision=hi)
    y = _bn_train_nhwc(y, params["g_pw"], params["b_pw"])
    if do_skip:
        y = y + x
    return jnp.transpose(y, (0, 3, 1, 2))


if __name__ == "__main__":
    key = jax.random.PRNGKey(0)
    kx, kp = jax.random.split(key)

    N, C_in, H, W = 2, 4, 16, 16
    C_out, kernel_size, stride, expansion_ratio = 4, 3, 1, 6

    x = jax.random.normal(kx, (N, C_in, H, W), jnp.float32)
    params = init_mbconv2_params(kp, C_in, C_out, kernel_size, expansion_ratio)

    fwd = functools.partial(mbconv2_forward, kernel_size=kernel_size,
                            stride=stride, expansion_ratio=expansion_ratio,
                            enable_skip=True)
    out = jax.block_until_ready(jax.jit(fwd)(x, params))

    ref = jax.block_until_ready(
        mbconv2_reference(x, params, kernel_size=kernel_size, stride=stride,
                          expansion_ratio=expansion_ratio, enable_skip=True))

    assert out.shape == (N, C_out, H, W)
    max_err = float(jnp.max(jnp.abs(out - ref)))
    # Kernel uses bf16-operand / f32-accumulate MXU matmuls (per perf review);
    # reference is full-f32 HIGHEST, so allow bf16-level tolerance.
    assert jnp.allclose(out, ref, atol=5e-2, rtol=5e-2), max_err
    print("KERNEL_OK")
</pallas_src>

<mosaic_0001>
module attributes {stable_mosaic.version = 11 : i64} {
  func.func @_expand_conv_kernel(%arg0: i32, %arg1: i32, %arg2: memref<1x16x16x128xf32, #tpu.memory_space<vmem>>, %arg3: memref<128x128xbf16, #tpu.memory_space<vmem>>, %arg4: memref<1x16x16x128xf32, #tpu.memory_space<vmem>>, %arg5: memref<1x128xf32, #tpu.memory_space<vmem>>, %arg6: memref<1x128xf32, #tpu.memory_space<vmem>>) attributes {dimension_semantics = [#tpu.dimension_semantics<arbitrary>, #tpu.dimension_semantics<arbitrary>], iteration_bounds = array<i64: 2, 1>, scalar_prefetch = 0 : i64, scratch_operands = 0 : i64, tpu.core_type = #tpu.core_type<tc>, window_params = [{transform_indices = @transform_0, window_bounds = array<i64: 1, 16, 16, 128>}, {pipeline_mode = #tpu.pipeline_mode<synchronous>, transform_indices = @transform_1, window_bounds = array<i64: 128, 128>}, {transform_indices = @transform_2, window_bounds = array<i64: 1, 16, 16, 128>}, {pipeline_mode = #tpu.pipeline_mode<synchronous>, transform_indices = @transform_3, window_bounds = array<i64: 1, 128>}, {pipeline_mode = #tpu.pipeline_mode<synchronous>, transform_indices = @transform_4, window_bounds = array<i64: 1, 128>}]} {
    %c0 = arith.constant 0 : index
    %c0_0 = arith.constant 0 : index
    %c0_1 = arith.constant 0 : index
    %c0_2 = arith.constant 0 : index
    %0 = vector.load %arg2[%c0, %c0_0, %c0_1, %c0_2] : memref<1x16x16x128xf32, #tpu.memory_space<vmem>>, vector<1x16x16x128xf32>
    %1 = vector.shape_cast %0 : vector<1x16x16x128xf32> to vector<16x16x128xf32>
    %2 = vector.shape_cast %1 : vector<16x16x128xf32> to vector<256x128xf32>
    %3 = arith.truncf %2 : vector<256x128xf32> to vector<256x128xbf16>
    %c0_3 = arith.constant 0 : index
    %c0_4 = arith.constant 0 : index
    %4 = vector.load %arg3[%c0_3, %c0_4] : memref<128x128xbf16, #tpu.memory_space<vmem>>, vector<128x128xbf16>
    %cst = arith.constant dense<0.000000e+00> : vector<256x128xf32>
    %5 = tpu.matmul %3, %4, %cst {dimension_numbers = #tpu.dot_dimension_numbers<[1], [0], [0], [1], [0, 0, 1, 1], [], []>} : vector<256x128xbf16>, vector<128x128xbf16>, vector<256x128xf32> -> vector<256x128xf32>
    %c0_i32 = arith.constant 0 : i32
    %6 = arith.cmpi eq, %arg0, %c0_i32 : i32
    %c0_i32_5 = arith.constant 0 : i32
    %7 = arith.cmpi eq, %arg1, %c0_i32_5 : i32
    %8 = arith.andi %6, %7 : i1
    %9 = arith.extui %8 : i1 to i32
    %c0_i32_6 = arith.constant 0 : i32
    %10 = arith.cmpi ne, %9, %c0_i32_6 : i32
    scf.if %10 {
      %cst_21 = arith.constant 0.000000e+00 : f32
      %26 = vector.broadcast %cst_21 : f32 to vector<1x128xf32>
      %c0_22 = arith.constant 0 : index
      %c0_23 = arith.constant 0 : index
      %27 = vector.load %arg5[%c0_22, %c0_23] : memref<1x128xf32, #tpu.memory_space<vmem>>, vector<1x128xf32>
      tpu.vector_store %arg5[%c0_22, %c0_23], %26 {strides = array<i32>} : memref<1x128xf32, #tpu.memory_space<vmem>>, vector<1x128xf32>,
      %cst_24 = arith.constant 0.000000e+00 : f32
      %28 = vector.broadcast %cst_24 : f32 to vector<1x128xf32>
      %c0_25 = arith.constant 0 : index
      %c0_26 = arith.constant 0 : index
      %29 = vector.load %arg6[%c0_25, %c0_26] : memref<1x128xf32, #tpu.memory_space<vmem>>, vector<1x128xf32>
      tpu.vector_store %arg6[%c0_25, %c0_26], %28 {strides = array<i32>} : memref<1x128xf32, #tpu.memory_space<vmem>>, vector<1x128xf32>,
    } else {
    }
    %c0_7 = arith.constant 0 : index
    %c0_8 = arith.constant 0 : index
    %11 = vector.load %arg5[%c0_7, %c0_8] : memref<1x128xf32, #tpu.memory_space<vmem>>, vector<1x128xf32>
    %cst_9 = arith.constant dense<0.000000e+00> : vector<128xf32>
    %12 = vector.multi_reduction <add>, %5, %cst_9 [0] : vector<256x128xf32> to vector<128xf32>
    %13 = vector.shape_cast %12 : vector<128xf32> to vector<1x128xf32>
    %14 = arith.addf %11, %13 : vector<1x128xf32>
    %c0_10 = arith.constant 0 : index
    %c0_11 = arith.constant 0 : index
    %15 = vector.load %arg5[%c0_10, %c0_11] : memref<1x128xf32, #tpu.memory_space<vmem>>, vector<1x128xf32>
    tpu.vector_store %arg5[%c0_10, %c0_11], %14 {strides = array<i32>} : memref<1x128xf32, #tpu.memory_space<vmem>>, vector<1x128xf32>,
    %c0_12 = arith.constant 0 : index
    %c0_13 = arith.constant 0 : index
    %16 = vector.load %arg6[%c0_12, %c0_13] : memref<1x128xf32, #tpu.memory_space<vmem>>, vector<1x128xf32>
    %17 = arith.mulf %5, %5 : vector<256x128xf32>
    %cst_14 = arith.constant dense<0.000000e+00> : vector<128xf32>
    %18 = vector.multi_reduction <add>, %17, %cst_14 [0] : vector<256x128xf32> to vector<128xf32>
    %19 = vector.shape_cast %18 : vector<128xf32> to vector<1x128xf32>
    %20 = arith.addf %16, %19 : vector<1x128xf32>
    %c0_15 = arith.constant 0 : index
    %c0_16 = arith.constant 0 : index
    %21 = vector.load %arg6[%c0_15, %c0_16] : memref<1x128xf32, #tpu.memory_space<vmem>>, vector<1x128xf32>
    tpu.vector_store %arg6[%c0_15, %c0_16], %20 {strides = array<i32>} : memref<1x128xf32, #tpu.memory_space<vmem>>, vector<1x128xf32>,
    %22 = vector.shape_cast %5 : vector<256x128xf32> to vector<16x16x128xf32>
    %c0_17 = arith.constant 0 : index
    %c0_18 = arith.constant 0 : index
    %c0_19 = arith.constant 0 : index
    %c0_20 = arith.constant 0 : index
    %23 = vector.load %arg4[%c0_17, %c0_18, %c0_19, %c0_20] : memref<1x16x16x128xf32, #tpu.memory_space<vmem>>, vector<1x16x16x128xf32>
    %24 = vector.shape_cast %23 : vector<1x16x16x128xf32> to vector<16x16x128xf32>
    %25 = vector.shape_cast %22 : vector<16x16x128xf32> to vector<1x16x16x128xf32>
    tpu.vector_store %arg4[%c0_17, %c0_18, %c0_19, %c0_20], %25 {strides = array<i32>} : memref<1x16x16x128xf32, #tpu.memory_space<vmem>>, vector<1x16x16x128xf32>,
    return
  }
  func.func @transform_0(%arg0: i32, %arg1: i32) -> (i32, i32, i32, i32) {
    %c0_i32 = arith.constant 0 : i32
    %c0_i32_0 = arith.constant 0 : i32
    %c0_i32_1 = arith.constant 0 : i32
    return %arg0, %arg1, %c0_i32, %c0_i32_0 : i32, i32, i32, i32
  }
  func.func @transform_1(%arg0: i32, %arg1: i32) -> (i32, i32) {
    %c0_i32 = arith.constant 0 : i32
    %c0_i32_0 = arith.constant 0 : i32
    %c0_i32_1 = arith.constant 0 : i32
    return %c0_i32, %c0_i32_0 : i32, i32
  }
  func.func @transform_2(%arg0: i32, %arg1: i32) -> (i32, i32, i32, i32) {
    %c0_i32 = arith.constant 0 : i32
    %c0_i32_0 = arith.constant 0 : i32
    %c0_i32_1 = arith.constant 0 : i32
    return %arg0, %arg1, %c0_i32, %c0_i32_0 : i32, i32, i32, i32
  }
  func.func @transform_3(%arg0: i32, %arg1: i32) -> (i32, i32) {
    %c0_i32 = arith.constant 0 : i32
    %c0_i32_0 = arith.constant 0 : i32
    %c0_i32_1 = arith.constant 0 : i32
    return %c0_i32, %c0_i32_0 : i32, i32
  }
  func.func @transform_4(%arg0: i32, %arg1: i32) -> (i32, i32) {
    %c0_i32 = arith.constant 0 : i32
    %c0_i32_0 = arith.constant 0 : i32
    %c0_i32_1 = arith.constant 0 : i32
    return %c0_i32, %c0_i32_0 : i32, i32
  }
}

module attributes {stable_mosaic.version = 11 : i64} {
  func.func @_dw_conv_kernel(%arg0: i32, %arg1: i32, %arg2: memref<1x16x16x128xf32, #tpu.memory_space<vmem>>, %arg3: memref<9x128xf32, #tpu.memory_space<vmem>>, %arg4: memref<1x128xf32, #tpu.memory_space<vmem>>, %arg5: memref<1x128xf32, #tpu.memory_space<vmem>>, %arg6: memref<1x16x16x128xf32, #tpu.memory_space<vmem>>, %arg7: memref<1x128xf32, #tpu.memory_space<vmem>>, %arg8: memref<1x128xf32, #tpu.memory_space<vmem>>, %arg9: memref<18x18x128xf32, #tpu.memory_space<vmem>>) attributes {dimension_semantics = [#tpu.dimension_semantics<parallel>, #tpu.dimension_semantics<arbitrary>], iteration_bounds = array<i64: 1, 2>, scalar_prefetch = 0 : i64, scratch_operands = 1 : i64, tpu.core_type = #tpu.core_type<tc>, window_params = [{transform_indices = @transform_0, window_bounds = array<i64: 1, 16, 16, 128>}, {transform_indices = @transform_1, window_bounds = array<i64: 9, 128>}, {transform_indices = @transform_2, window_bounds = array<i64: 1, 128>}, {transform_indices = @transform_3, window_bounds = array<i64: 1, 128>}, {transform_indices = @transform_4, window_bounds = array<i64: 1, 16, 16, 128>}, {transform_indices = @transform_5, window_bounds = array<i64: 1, 128>}, {transform_indices = @transform_6, window_bounds = array<i64: 1, 128>}]} {
    %c0 = arith.constant 0 : index
    %c0_0 = arith.constant 0 : index
    %c0_1 = arith.constant 0 : index
    %c0_2 = arith.constant 0 : index
    %0 = vector.load %arg2[%c0, %c0_0, %c0_1, %c0_2] : memref<1x16x16x128xf32, #tpu.memory_space<vmem>>, vector<1x16x16x128xf32>
    %1 = vector.shape_cast %0 : vector<1x16x16x128xf32> to vector<16x16x128xf32>
    %c0_3 = arith.constant 0 : index
    %c0_4 = arith.constant 0 : index
    %2 = vector.load %arg4[%c0_3, %c0_4] : memref<1x128xf32, #tpu.memory_space<vmem>>, vector<1x128xf32>
    %3 = vector.shape_cast %2 : vector<1x128xf32> to vector<1x1x128xf32>
    %4 = vector.broadcast %3 : vector<1x1x128xf32> to vector<16x16x128xf32>
    %5 = arith.mulf %1, %4 : vector<16x16x128xf32>
    %c0_5 = arith.constant 0 : index
    %c0_6 = arith.constant 0 : index
    %6 = vector.load %arg5[%c0_5, %c0_6] : memref<1x128xf32, #tpu.memory_space<vmem>>, vector<1x128xf32>
    %7 = vector.shape_cast %6 : vector<1x128xf32> to vector<1x1x128xf32>
    %8 = vector.broadcast %7 : vector<1x1x128xf32> to vector<16x16x128xf32>
    %9 = arith.addf %5, %8 : vector<16x16x128xf32>
    %cst = arith.constant 0.000000e+00 : f32
    %cst_7 = arith.constant 6.000000e+00 : f32
    %10 = vector.broadcast %cst : f32 to vector<16x16x128xf32>
    %11 = arith.maximumf %10, %9 : vector<16x16x128xf32>
    %12 = vector.broadcast %cst_7 : f32 to vector<16x16x128xf32>
    %13 = arith.minimumf %12, %11 : vector<16x16x128xf32>
    %cst_8 = arith.constant 0.000000e+00 : f32
    %14 = vector.broadcast %cst_8 : f32 to vector<18x18x128xf32>
    %c0_9 = arith.constant 0 : index
    %c0_10 = arith.constant 0 : index
    %c0_11 = arith.constant 0 : index
    %15 = vector.load %arg9[%c0_9, %c0_10, %c0_11] : memref<18x18x128xf32, #tpu.memory_space<vmem>>, vector<18x18x128xf32>
    tpu.vector_store %arg9[%c0_9, %c0_10, %c0_11], %14 {strides = array<i32>} : memref<18x18x128xf32, #tpu.memory_space<vmem>>, vector<18x18x128xf32>,
    %c1 = arith.constant 1 : index
    %c1_12 = arith.constant 1 : index
    %c0_13 = arith.constant 0 : index
    %16 = vector.load %arg9[%c1, %c1_12, %c0_13] : memref<18x18x128xf32, #tpu.memory_space<vmem>>, vector<16x16x128xf32>
    tpu.vector_store %arg9[%c1, %c1_12, %c0_13], %13 {strides = array<i32>} : memref<18x18x128xf32, #tpu.memory_space<vmem>>, vector<16x16x128xf32>,
    %c0_14 = arith.constant 0 : index
    %c0_15 = arith.constant 0 : index
    %17 = vector.load %arg3[%c0_14, %c0_15] : memref<9x128xf32, #tpu.memory_space<vmem>>, vector<9x128xf32>
    %cst_16 = arith.constant 0.000000e+00 : f32
    %18 = vector.broadcast %cst_16 : f32 to vector<16x16x128xf32>
    %c0_17 = arith.constant 0 : index
    %c0_18 = arith.constant 0 : index
    %c0_19 = arith.constant 0 : index
    %19 = vector.load %arg9[%c0_17, %c0_18, %c0_19] : memref<18x18x128xf32, #tpu.memory_space<vmem>>, vector<16x16x128xf32>
    %20 = vector.extract_strided_slice %17 {offsets = [0, 0], sizes = [1, 128], strides = [1, 1]} : vector<9x128xf32> to vector<1x128xf32>
    %21 = vector.shape_cast %20 : vector<1x128xf32> to vector<128xf32>
    %22 = vector.shape_cast %21 : vector<128xf32> to vector<1x1x128xf32>
    %23 = vector.broadcast %22 : vector<1x1x128xf32> to vector<16x16x128xf32>
    %24 = arith.mulf %19, %23 : vector<16x16x128xf32>
    %25 = arith.addf %18, %24 : vector<16x16x128xf32>
    %c0_20 = arith.constant 0 : index
    %c1_21 = arith.constant 1 : index
    %c0_22 = arith.constant 0 : index
    %26 = vector.load %arg9[%c0_20, %c1_21, %c0_22] : memref<18x18x128xf32, #tpu.memory_space<vmem>>, vector<16x16x128xf32>
    %27 = vector.extract_strided_slice %17 {offsets = [1, 0], sizes = [1, 128], strides = [1, 1]} : vector<9x128xf32> to vector<1x128xf32>
    %28 = vector.shape_cast %27 : vector<1x128xf32> to vector<128xf32>
    %29 = vector.shape_cast %28 : vector<128xf32> to vector<1x1x128xf32>
    %30 = vector.broadcast %29 : vector<1x1x128xf32> to vector<16x16x128xf32>
    %31 = arith.mulf %26, %30 : vector<16x16x128xf32>
    %32 = arith.addf %25, %31 : vector<16x16x128xf32>
    %c0_23 = arith.constant 0 : index
    %c2 = arith.constant 2 : index
    %c0_24 = arith.constant 0 : index
    %33 = vector.load %arg9[%c0_23, %c2, %c0_24] : memref<18x18x128xf32, #tpu.memory_space<vmem>>, vector<16x16x128xf32>
    %34 = vector.extract_strided_slice %17 {offsets = [2, 0], sizes = [1, 128], strides = [1, 1]} : vector<9x128xf32> to vector<1x128xf32>
    %35 = vector.shape_cast %34 : vector<1x128xf32> to vector<128xf32>
    %36 = vector.shape_cast %35 : vector<128xf32> to vector<1x1x128xf32>
    %37 = vector.broadcast %36 : vector<1x1x128xf32> to vector<16x16x128xf32>
    %38 = arith.mulf %33, %37 : vector<16x16x128xf32>
    %39 = arith.addf %32, %38 : vector<16x16x128xf32>
    %c1_25 = arith.constant 1 : index
    %c0_26 = arith.constant 0 : index
    %c0_27 = arith.constant 0 : index
    %40 = vector.load %arg9[%c1_25, %c0_26, %c0_27] : memref<18x18x128xf32, #tpu.memory_space<vmem>>, vector<16x16x128xf32>
    %41 = vector.extract_strided_slice %17 {offsets = [3, 0], sizes = [1, 128], strides = [1, 1]} : vector<9x128xf32> to vector<1x128xf32>
    %42 = vector.shape_cast %41 : vector<1x128xf32> to vector<128xf32>
    %43 = vector.shape_cast %42 : vector<128xf32> to vector<1x1x128xf32>
    %44 = vector.broadcast %43 : vector<1x1x128xf32> to vector<16x16x128xf32>
    %45 = arith.mulf %40, %44 : vector<16x16x128xf32>
    %46 = arith.addf %39, %45 : vector<16x16x128xf32>
    %c1_28 = arith.constant 1 : index
    %c1_29 = arith.constant 1 : index
    %c0_30 = arith.constant 0 : index
    %47 = vector.load %arg9[%c1_28, %c1_29, %c0_30] : memref<18x18x128xf32, #tpu.memory_space<vmem>>, vector<16x16x128xf32>
    %48 = vector.extract_strided_slice %17 {offsets = [4, 0], sizes = [1, 128], strides = [1, 1]} : vector<9x128xf32> to vector<1x128xf32>
    %49 = vector.shape_cast %48 : vector<1x128xf32> to vector<128xf32>
    %50 = vector.shape_cast %49 : vector<128xf32> to vector<1x1x128xf32>
    %51 = vector.broadcast %50 : vector<1x1x128xf32> to vector<16x16x128xf32>
    %52 = arith.mulf %47, %51 : vector<16x16x128xf32>
    %53 = arith.addf %46, %52 : vector<16x16x128xf32>
    %c1_31 = arith.constant 1 : index
    %c2_32 = arith.constant 2 : index
    %c0_33 = arith.constant 0 : index
    %54 = vector.load %arg9[%c1_31, %c2_32, %c0_33] : memref<18x18x128xf32, #tpu.memory_space<vmem>>, vector<16x16x128xf32>
    %55 = vector.extract_strided_slice %17 {offsets = [5, 0], sizes = [1, 128], strides = [1, 1]} : vector<9x128xf32> to vector<1x128xf32>
    %56 = vector.shape_cast %55 : vector<1x128xf32> to vector<128xf32>
    %57 = vector.shape_cast %56 : vector<128xf32> to vector<1x1x128xf32>
    %58 = vector.broadcast %57 : vector<1x1x128xf32> to vector<16x16x128xf32>
    %59 = arith.mulf %54, %58 : vector<16x16x128xf32>
    %60 = arith.addf %53, %59 : vector<16x16x128xf32>
    %c2_34 = arith.constant 2 : index
    %c0_35 = arith.constant 0 : index
    %c0_36 = arith.constant 0 : index
    %61 = vector.load %arg9[%c2_34, %c0_35, %c0_36] : memref<18x18x128xf32, #tpu.memory_space<vmem>>, vector<16x16x128xf32>
    %62 = vector.extract_strided_slice %17 {offsets = [6, 0], sizes = [1, 128], strides = [1, 1]} : vector<9x128xf32> to vector<1x128xf32>
    %63 = vector.shape_cast %62 : vector<1x128xf32> to vector<128xf32>
    %64 = vector.shape_cast %63 : vector<128xf32> to vector<1x1x128xf32>
    %65 = vector.broadcast %64 : vector<1x1x128xf32> to vector<16x16x128xf32>
    %66 = arith.mulf %61, %65 : vector<16x16x128xf32>
    %67 = arith.addf %60, %66 : vector<16x16x128xf32>
    %c2_37 = arith.constant 2 : index
    %c1_38 = arith.constant 1 : index
    %c0_39 = arith.constant 0 : index
    %68 = vector.load %arg9[%c2_37, %c1_38, %c0_39] : memref<18x18x128xf32, #tpu.memory_space<vmem>>, vector<16x16x128xf32>
    %69 = vector.extract_strided_slice %17 {offsets = [7, 0], sizes = [1, 128], strides = [1, 1]} : vector<9x128xf32> to vector<1x128xf32>
    %70 = vector.shape_cast %69 : vector<1x128xf32> to vector<128xf32>
    %71 = vector.shape_cast %70 : vector<128xf32> to vector<1x1x128xf32>
    %72 = vector.broadcast %71 : vector<1x1x128xf32> to vector<16x16x128xf32>
    %73 = arith.mulf %68, %72 : vector<16x16x128xf32>
    %74 = arith.addf %67, %73 : vector<16x16x128xf32>
    %c2_40 = arith.constant 2 : index
    %c2_41 = arith.constant 2 : index
    %c0_42 = arith.constant 0 : index
    %75 = vector.load %arg9[%c2_40, %c2_41, %c0_42] : memref<18x18x128xf32, #tpu.memory_space<vmem>>, vector<16x16x128xf32>
    %76 = vector.extract_strided_slice %17 {offsets = [8, 0], sizes = [1, 128], strides = [1, 1]} : vector<9x128xf32> to vector<1x128xf32>
    %77 = vector.shape_cast %76 : vector<1x128xf32> to vector<128xf32>
    %78 = vector.shape_cast %77 : vector<128xf32> to vector<1x1x128xf32>
    %79 = vector.broadcast %78 : vector<1x1x128xf32> to vector<16x16x128xf32>
    %80 = arith.mulf %75, %79 : vector<16x16x128xf32>
    %81 = arith.addf %74, %80 : vector<16x16x128xf32>
    %c0_i32 = arith.constant 0 : i32
    %82 = arith.cmpi eq, %arg1, %c0_i32 : i32
    %83 = arith.extui %82 : i1 to i32
    %c0_i32_43 = arith.constant 0 : i32
    %84 = arith.cmpi ne, %83, %c0_i32_43 : i32
    scf.if %84 {
      %cst_58 = arith.constant 0.000000e+00 : f32
      %99 = vector.broadcast %cst_58 : f32 to vector<1x128xf32>
      %c0_59 = arith.constant 0 : index
      %c0_60 = arith.constant 0 : index
      %100 = vector.load %arg7[%c0_59, %c0_60] : memref<1x128xf32, #tpu.memory_space<vmem>>, vector<1x128xf32>
      tpu.vector_store %arg7[%c0_59, %c0_60], %99 {strides = array<i32>} : memref<1x128xf32, #tpu.memory_space<vmem>>, vector<1x128xf32>,
      %cst_61 = arith.constant 0.000000e+00 : f32
      %101 = vector.broadcast %cst_61 : f32 to vector<1x128xf32>
      %c0_62 = arith.constant 0 : index
      %c0_63 = arith.constant 0 : index
      %102 = vector.load %arg8[%c0_62, %c0_63] : memref<1x128xf32, #tpu.memory_space<vmem>>, vector<1x128xf32>
      tpu.vector_store %arg8[%c0_62, %c0_63], %101 {strides = array<i32>} : memref<1x128xf32, #tpu.memory_space<vmem>>, vector<1x128xf32>,
    } else {
    }
    %c0_44 = arith.constant 0 : index
    %c0_45 = arith.constant 0 : index
    %85 = vector.load %arg7[%c0_44, %c0_45] : memref<1x128xf32, #tpu.memory_space<vmem>>, vector<1x128xf32>
    %cst_46 = arith.constant dense<0.000000e+00> : vector<128xf32>
    %86 = vector.multi_reduction <add>, %81, %cst_46 [0, 1] : vector<16x16x128xf32> to vector<128xf32>
    %87 = vector.shape_cast %86 : vector<128xf32> to vector<1x128xf32>
    %88 = arith.addf %85, %87 : vector<1x128xf32>
    %c0_47 = arith.constant 0 : index
    %c0_48 = arith.constant 0 : index
    %89 = vector.load %arg7[%c0_47, %c0_48] : memref<1x128xf32, #tpu.memory_space<vmem>>, vector<1x128xf32>
    tpu.vector_store %arg7[%c0_47, %c0_48], %88 {strides = array<i32>} : memref<1x128xf32, #tpu.memory_space<vmem>>, vector<1x128xf32>,
    %c0_49 = arith.constant 0 : index
    %c0_50 = arith.constant 0 : index
    %90 = vector.load %arg8[%c0_49, %c0_50] : memref<1x128xf32, #tpu.memory_space<vmem>>, vector<1x128xf32>
    %91 = arith.mulf %81, %81 : vector<16x16x128xf32>
    %cst_51 = arith.constant dense<0.000000e+00> : vector<128xf32>
    %92 = vector.multi_reduction <add>, %91, %cst_51 [0, 1] : vector<16x16x128xf32> to vector<128xf32>
    %93 = vector.shape_cast %92 : vector<128xf32> to vector<1x128xf32>
    %94 = arith.addf %90, %93 : vector<1x128xf32>
    %c0_52 = arith.constant 0 : index
    %c0_53 = arith.constant 0 : index
    %95 = vector.load %arg8[%c0_52, %c0_53] : memref<1x128xf32, #tpu.memory_space<vmem>>, vector<1x128xf32>
    tpu.vector_store %arg8[%c0_52, %c0_53], %94 {strides = array<i32>} : memref<1x128xf32, #tpu.memory_space<vmem>>, vector<1x128xf32>,
    %c0_54 = arith.constant 0 : index
    %c0_55 = arith.constant 0 : index
    %c0_56 = arith.constant 0 : index
    %c0_57 = arith.constant 0 : index
    %96 = vector.load %arg6[%c0_54, %c0_55, %c0_56, %c0_57] : memref<1x16x16x128xf32, #tpu.memory_space<vmem>>, vector<1x16x16x128xf32>
    %97 = vector.shape_cast %96 : vector<1x16x16x128xf32> to vector<16x16x128xf32>
    %98 = vector.shape_cast %81 : vector<16x16x128xf32> to vector<1x16x16x128xf32>
    tpu.vector_store %arg6[%c0_54, %c0_55, %c0_56, %c0_57], %98 {strides = array<i32>} : memref<1x16x16x128xf32, #tpu.memory_space<vmem>>, vector<1x16x16x128xf32>,
    return
  }
  func.func @transform_0(%arg0: i32, %arg1: i32) -> (i32, i32, i32, i32) {
    %c0_i32 = arith.constant 0 : i32
    %c0_i32_0 = arith.constant 0 : i32
    %c0_i32_1 = arith.constant 0 : i32
    return %arg1, %c0_i32, %c0_i32_0, %arg0 : i32, i32, i32, i32
  }
  func.func @transform_1(%arg0: i32, %arg1: i32) -> (i32, i32) {
    %c0_i32 = arith.constant 0 : i32
    %c0_i32_0 = arith.constant 0 : i32
    return %c0_i32, %arg0 : i32, i32
  }
  func.func @transform_2(%arg0: i32, %arg1: i32) -> (i32, i32) {
    %c0_i32 = arith.constant 0 : i32
    %c0_i32_0 = arith.constant 0 : i32
    return %c0_i32, %arg0 : i32, i32
  }
  func.func @transform_3(%arg0: i32, %arg1: i32) -> (i32, i32) {
    %c0_i32 = arith.constant 0 : i32
    %c0_i32_0 = arith.constant 0 : i32
    return %c0_i32, %arg0 : i32, i32
  }
  func.func @transform_4(%arg0: i32, %arg1: i32) -> (i32, i32, i32, i32) {
    %c0_i32 = arith.constant 0 : i32
    %c0_i32_0 = arith.constant 0 : i32
    %c0_i32_1 = arith.constant 0 : i32
    return %arg1, %c0_i32, %c0_i32_0, %arg0 : i32, i32, i32, i32
  }
  func.func @transform_5(%arg0: i32, %arg1: i32) -> (i32, i32) {
    %c0_i32 = arith.constant 0 : i32
    %c0_i32_0 = arith.constant 0 : i32
    return %c0_i32, %arg0 : i32, i32
  }
  func.func @transform_6(%arg0: i32, %arg1: i32) -> (i32, i32) {
    %c0_i32 = arith.constant 0 : i32
    %c0_i32_0 = arith.constant 0 : i32
    return %c0_i32, %arg0 : i32, i32
  }
}

module attributes {stable_mosaic.version = 11 : i64} {
  func.func @_project_conv_kernel(%arg0: i32, %arg1: i32, %arg2: memref<1x16x16x128xf32, #tpu.memory_space<vmem>>, %arg3: memref<128x128xbf16, #tpu.memory_space<vmem>>, %arg4: memref<1x128xf32, #tpu.memory_space<vmem>>, %arg5: memref<1x128xf32, #tpu.memory_space<vmem>>, %arg6: memref<1x16x16x128xf32, #tpu.memory_space<vmem>>, %arg7: memref<1x128xf32, #tpu.memory_space<vmem>>, %arg8: memref<1x128xf32, #tpu.memory_space<vmem>>) attributes {dimension_semantics = [#tpu.dimension_semantics<arbitrary>, #tpu.dimension_semantics<arbitrary>], iteration_bounds = array<i64: 2, 1>, scalar_prefetch = 0 : i64, scratch_operands = 0 : i64, tpu.core_type = #tpu.core_type<tc>, window_params = [{transform_indices = @transform_0, window_bounds = array<i64: 1, 16, 16, 128>}, {pipeline_mode = #tpu.pipeline_mode<synchronous>, transform_indices = @transform_1, window_bounds = array<i64: 128, 128>}, {pipeline_mode = #tpu.pipeline_mode<synchronous>, transform_indices = @transform_2, window_bounds = array<i64: 1, 128>}, {pipeline_mode = #tpu.pipeline_mode<synchronous>, transform_indices = @transform_3, window_bounds = array<i64: 1, 128>}, {transform_indices = @transform_4, window_bounds = array<i64: 1, 16, 16, 128>}, {pipeline_mode = #tpu.pipeline_mode<synchronous>, transform_indices = @transform_5, window_bounds = array<i64: 1, 128>}, {pipeline_mode = #tpu.pipeline_mode<synchronous>, transform_indices = @transform_6, window_bounds = array<i64: 1, 128>}]} {
    %c0 = arith.constant 0 : index
    %c0_0 = arith.constant 0 : index
    %c0_1 = arith.constant 0 : index
    %c0_2 = arith.constant 0 : index
    %0 = vector.load %arg2[%c0, %c0_0, %c0_1, %c0_2] : memref<1x16x16x128xf32, #tpu.memory_space<vmem>>, vector<1x16x16x128xf32>
    %1 = vector.shape_cast %0 : vector<1x16x16x128xf32> to vector<16x16x128xf32>
    %2 = vector.shape_cast %1 : vector<16x16x128xf32> to vector<256x128xf32>
    %c0_3 = arith.constant 0 : index
    %c0_4 = arith.constant 0 : index
    %3 = vector.load %arg4[%c0_3, %c0_4] : memref<1x128xf32, #tpu.memory_space<vmem>>, vector<1x128xf32>
    %4 = vector.broadcast %3 : vector<1x128xf32> to vector<256x128xf32>
    %5 = arith.mulf %2, %4 : vector<256x128xf32>
    %c0_5 = arith.constant 0 : index
    %c0_6 = arith.constant 0 : index
    %6 = vector.load %arg5[%c0_5, %c0_6] : memref<1x128xf32, #tpu.memory_space<vmem>>, vector<1x128xf32>
    %7 = vector.broadcast %6 : vector<1x128xf32> to vector<256x128xf32>
    %8 = arith.addf %5, %7 : vector<256x128xf32>
    %cst = arith.constant 0.000000e+00 : f32
    %cst_7 = arith.constant 6.000000e+00 : f32
    %9 = vector.broadcast %cst : f32 to vector<256x128xf32>
    %10 = arith.maximumf %9, %8 : vector<256x128xf32>
    %11 = vector.broadcast %cst_7 : f32 to vector<256x128xf32>
    %12 = arith.minimumf %11, %10 : vector<256x128xf32>
    %13 = arith.truncf %12 : vector<256x128xf32> to vector<256x128xbf16>
    %c0_8 = arith.constant 0 : index
    %c0_9 = arith.constant 0 : index
    %14 = vector.load %arg3[%c0_8, %c0_9] : memref<128x128xbf16, #tpu.memory_space<vmem>>, vector<128x128xbf16>
    %cst_10 = arith.constant dense<0.000000e+00> : vector<256x128xf32>
    %15 = tpu.matmul %13, %14, %cst_10 {dimension_numbers = #tpu.dot_dimension_numbers<[1], [0], [0], [1], [0, 0, 1, 1], [], []>} : vector<256x128xbf16>, vector<128x128xbf16>, vector<256x128xf32> -> vector<256x128xf32>
    %c0_i32 = arith.constant 0 : i32
    %16 = arith.cmpi eq, %arg0, %c0_i32 : i32
    %c0_i32_11 = arith.constant 0 : i32
    %17 = arith.cmpi eq, %arg1, %c0_i32_11 : i32
    %18 = arith.andi %16, %17 : i1
    %19 = arith.extui %18 : i1 to i32
    %c0_i32_12 = arith.constant 0 : i32
    %20 = arith.cmpi ne, %19, %c0_i32_12 : i32
    scf.if %20 {
      %cst_27 = arith.constant 0.000000e+00 : f32
      %36 = vector.broadcast %cst_27 : f32 to vector<1x128xf32>
      %c0_28 = arith.constant 0 : index
      %c0_29 = arith.constant 0 : index
      %37 = vector.load %arg7[%c0_28, %c0_29] : memref<1x128xf32, #tpu.memory_space<vmem>>, vector<1x128xf32>
      tpu.vector_store %arg7[%c0_28, %c0_29], %36 {strides = array<i32>} : memref<1x128xf32, #tpu.memory_space<vmem>>, vector<1x128xf32>,
      %cst_30 = arith.constant 0.000000e+00 : f32
      %38 = vector.broadcast %cst_30 : f32 to vector<1x128xf32>
      %c0_31 = arith.constant 0 : index
      %c0_32 = arith.constant 0 : index
      %39 = vector.load %arg8[%c0_31, %c0_32] : memref<1x128xf32, #tpu.memory_space<vmem>>, vector<1x128xf32>
      tpu.vector_store %arg8[%c0_31, %c0_32], %38 {strides = array<i32>} : memref<1x128xf32, #tpu.memory_space<vmem>>, vector<1x128xf32>,
    } else {
    }
    %c0_13 = arith.constant 0 : index
    %c0_14 = arith.constant 0 : index
    %21 = vector.load %arg7[%c0_13, %c0_14] : memref<1x128xf32, #tpu.memory_space<vmem>>, vector<1x128xf32>
    %cst_15 = arith.constant dense<0.000000e+00> : vector<128xf32>
    %22 = vector.multi_reduction <add>, %15, %cst_15 [0] : vector<256x128xf32> to vector<128xf32>
    %23 = vector.shape_cast %22 : vector<128xf32> to vector<1x128xf32>
    %24 = arith.addf %21, %23 : vector<1x128xf32>
    %c0_16 = arith.constant 0 : index
    %c0_17 = arith.constant 0 : index
    %25 = vector.load %arg7[%c0_16, %c0_17] : memref<1x128xf32, #tpu.memory_space<vmem>>, vector<1x128xf32>
    tpu.vector_store %arg7[%c0_16, %c0_17], %24 {strides = array<i32>} : memref<1x128xf32, #tpu.memory_space<vmem>>, vector<1x128xf32>,
    %c0_18 = arith.constant 0 : index
    %c0_19 = arith.constant 0 : index
    %26 = vector.load %arg8[%c0_18, %c0_19] : memref<1x128xf32, #tpu.memory_space<vmem>>, vector<1x128xf32>
    %27 = arith.mulf %15, %15 : vector<256x128xf32>
    %cst_20 = arith.constant dense<0.000000e+00> : vector<128xf32>
    %28 = vector.multi_reduction <add>, %27, %cst_20 [0] : vector<256x128xf32> to vector<128xf32>
    %29 = vector.shape_cast %28 : vector<128xf32> to vector<1x128xf32>
    %30 = arith.addf %26, %29 : vector<1x128xf32>
    %c0_21 = arith.constant 0 : index
    %c0_22 = arith.constant 0 : index
    %31 = vector.load %arg8[%c0_21, %c0_22] : memref<1x128xf32, #tpu.memory_space<vmem>>, vector<1x128xf32>
    tpu.vector_store %arg8[%c0_21, %c0_22], %30 {strides = array<i32>} : memref<1x128xf32, #tpu.memory_space<vmem>>, vector<1x128xf32>,
    %32 = vector.shape_cast %15 : vector<256x128xf32> to vector<16x16x128xf32>
    %c0_23 = arith.constant 0 : index
    %c0_24 = arith.constant 0 : index
    %c0_25 = arith.constant 0 : index
    %c0_26 = arith.constant 0 : index
    %33 = vector.load %arg6[%c0_23, %c0_24, %c0_25, %c0_26] : memref<1x16x16x128xf32, #tpu.memory_space<vmem>>, vector<1x16x16x128xf32>
    %34 = vector.shape_cast %33 : vector<1x16x16x128xf32> to vector<16x16x128xf32>
    %35 = vector.shape_cast %32 : vector<16x16x128xf32> to vector<1x16x16x128xf32>
    tpu.vector_store %arg6[%c0_23, %c0_24, %c0_25, %c0_26], %35 {strides = array<i32>} : memref<1x16x16x128xf32, #tpu.memory_space<vmem>>, vector<1x16x16x128xf32>,
    return
  }
  func.func @transform_0(%arg0: i32, %arg1: i32) -> (i32, i32, i32, i32) {
    %c0_i32 = arith.constant 0 : i32
    %c0_i32_0 = arith.constant 0 : i32
    %c0_i32_1 = arith.constant 0 : i32
    return %arg0, %arg1, %c0_i32, %c0_i32_0 : i32, i32, i32, i32
  }
  func.func @transform_1(%arg0: i32, %arg1: i32) -> (i32, i32) {
    %c0_i32 = arith.constant 0 : i32
    %c0_i32_0 = arith.constant 0 : i32
    %c0_i32_1 = arith.constant 0 : i32
    return %c0_i32, %c0_i32_0 : i32, i32
  }
  func.func @transform_2(%arg0: i32, %arg1: i32) -> (i32, i32) {
    %c0_i32 = arith.constant 0 : i32
    %c0_i32_0 = arith.constant 0 : i32
    %c0_i32_1 = arith.constant 0 : i32
    return %c0_i32, %c0_i32_0 : i32, i32
  }
  func.func @transform_3(%arg0: i32, %arg1: i32) -> (i32, i32) {
    %c0_i32 = arith.constant 0 : i32
    %c0_i32_0 = arith.constant 0 : i32
    %c0_i32_1 = arith.constant 0 : i32
    return %c0_i32, %c0_i32_0 : i32, i32
  }
  func.func @transform_4(%arg0: i32, %arg1: i32) -> (i32, i32, i32, i32) {
    %c0_i32 = arith.constant 0 : i32
    %c0_i32_0 = arith.constant 0 : i32
    %c0_i32_1 = arith.constant 0 : i32
    return %arg0, %arg1, %c0_i32, %c0_i32_0 : i32, i32, i32, i32
  }
  func.func @transform_5(%arg0: i32, %arg1: i32) -> (i32, i32) {
    %c0_i32 = arith.constant 0 : i32
    %c0_i32_0 = arith.constant 0 : i32
    %c0_i32_1 = arith.constant 0 : i32
    return %c0_i32, %c0_i32_0 : i32, i32
  }
  func.func @transform_6(%arg0: i32, %arg1: i32) -> (i32, i32) {
    %c0_i32 = arith.constant 0 : i32
    %c0_i32_0 = arith.constant 0 : i32
    %c0_i32_1 = arith.constant 0 : i32
    return %c0_i32, %c0_i32_0 : i32, i32
  }
}

module attributes {stable_mosaic.version = 11 : i64} {
  func.func @_bn_skip_kernel(%arg0: i32, %arg1: i32, %arg2: memref<1x16x16x128xf32, #tpu.memory_space<vmem>>, %arg3: memref<1x128xf32, #tpu.memory_space<vmem>>, %arg4: memref<1x128xf32, #tpu.memory_space<vmem>>, %arg5: memref<1x16x16x128xf32, #tpu.memory_space<vmem>>, %arg6: memref<1x16x16x128xf32, #tpu.memory_space<vmem>>) attributes {dimension_semantics = [#tpu.dimension_semantics<parallel>, #tpu.dimension_semantics<parallel>], iteration_bounds = array<i64: 2, 1>, scalar_prefetch = 0 : i64, scratch_operands = 0 : i64, tpu.core_type = #tpu.core_type<tc>, window_params = [{transform_indices = @transform_0, window_bounds = array<i64: 1, 16, 16, 128>}, {pipeline_mode = #tpu.pipeline_mode<synchronous>, transform_indices = @transform_1, window_bounds = array<i64: 1, 128>}, {pipeline_mode = #tpu.pipeline_mode<synchronous>, transform_indices = @transform_2, window_bounds = array<i64: 1, 128>}, {transform_indices = @transform_3, window_bounds = array<i64: 1, 16, 16, 128>}, {transform_indices = @transform_4, window_bounds = array<i64: 1, 16, 16, 128>}]} {
    %c0 = arith.constant 0 : index
    %c0_0 = arith.constant 0 : index
    %c0_1 = arith.constant 0 : index
    %c0_2 = arith.constant 0 : index
    %0 = vector.load %arg2[%c0, %c0_0, %c0_1, %c0_2] : memref<1x16x16x128xf32, #tpu.memory_space<vmem>>, vector<1x16x16x128xf32>
    %1 = vector.shape_cast %0 : vector<1x16x16x128xf32> to vector<16x16x128xf32>
    %c0_3 = arith.constant 0 : index
    %c0_4 = arith.constant 0 : index
    %2 = vector.load %arg3[%c0_3, %c0_4] : memref<1x128xf32, #tpu.memory_space<vmem>>, vector<1x128xf32>
    %3 = vector.shape_cast %2 : vector<1x128xf32> to vector<1x1x128xf32>
    %4 = vector.broadcast %3 : vector<1x1x128xf32> to vector<16x16x128xf32>
    %5 = arith.mulf %1, %4 : vector<16x16x128xf32>
    %c0_5 = arith.constant 0 : index
    %c0_6 = arith.constant 0 : index
    %6 = vector.load %arg4[%c0_5, %c0_6] : memref<1x128xf32, #tpu.memory_space<vmem>>, vector<1x128xf32>
    %7 = vector.shape_cast %6 : vector<1x128xf32> to vector<1x1x128xf32>
    %8 = vector.broadcast %7 : vector<1x1x128xf32> to vector<16x16x128xf32>
    %9 = arith.addf %5, %8 : vector<16x16x128xf32>
    %c0_7 = arith.constant 0 : index
    %c0_8 = arith.constant 0 : index
    %c0_9 = arith.constant 0 : index
    %c0_10 = arith.constant 0 : index
    %10 = vector.load %arg5[%c0_7, %c0_8, %c0_9, %c0_10] : memref<1x16x16x128xf32, #tpu.memory_space<vmem>>, vector<1x16x16x128xf32>
    %11 = vector.shape_cast %10 : vector<1x16x16x128xf32> to vector<16x16x128xf32>
    %12 = arith.addf %9, %11 : vector<16x16x128xf32>
    %c0_11 = arith.constant 0 : index
    %c0_12 = arith.constant 0 : index
    %c0_13 = arith.constant 0 : index
    %c0_14 = arith.constant 0 : index
    %13 = vector.load %arg6[%c0_11, %c0_12, %c0_13, %c0_14] : memref<1x16x16x128xf32, #tpu.memory_space<vmem>>, vector<1x16x16x128xf32>
    %14 = vector.shape_cast %13 : vector<1x16x16x128xf32> to vector<16x16x128xf32>
    %15 = vector.shape_cast %12 : vector<16x16x128xf32> to vector<1x16x16x128xf32>
    tpu.vector_store %arg6[%c0_11, %c0_12, %c0_13, %c0_14], %15 {strides = array<i32>} : memref<1x16x16x128xf32, #tpu.memory_space<vmem>>, vector<1x16x16x128xf32>,
    return
  }
  func.func @transform_0(%arg0: i32, %arg1: i32) -> (i32, i32, i32, i32) {
    %c0_i32 = arith.constant 0 : i32
    %c0_i32_0 = arith.constant 0 : i32
    %c0_i32_1 = arith.constant 0 : i32
    return %arg0, %arg1, %c0_i32, %c0_i32_0 : i32, i32, i32, i32
  }
  func.func @transform_1(%arg0: i32, %arg1: i32) -> (i32, i32) {
    %c0_i32 = arith.constant 0 : i32
    %c0_i32_0 = arith.constant 0 : i32
    %c0_i32_1 = arith.constant 0 : i32
    return %c0_i32, %c0_i32_0 : i32, i32
  }
  func.func @transform_2(%arg0: i32, %arg1: i32) -> (i32, i32) {
    %c0_i32 = arith.constant 0 : i32
    %c0_i32_0 = arith.constant 0 : i32
    %c0_i32_1 = arith.constant 0 : i32
    return %c0_i32, %c0_i32_0 : i32, i32
  }
  func.func @transform_3(%arg0: i32, %arg1: i32) -> (i32, i32, i32, i32) {
    %c0_i32 = arith.constant 0 : i32
    %c0_i32_0 = arith.constant 0 : i32
    %c0_i32_1 = arith.constant 0 : i32
    return %arg0, %arg1, %c0_i32, %c0_i32_0 : i32, i32, i32, i32
  }
  func.func @transform_4(%arg0: i32, %arg1: i32) -> (i32, i32, i32, i32) {
    %c0_i32 = arith.constant 0 : i32
    %c0_i32_0 = arith.constant 0 : i32
    %c0_i32_1 = arith.constant 0 : i32
    return %arg0, %arg1, %c0_i32, %c0_i32_0 : i32, i32, i32, i32
  }
}

</mosaic_0001>

<bundles_post_ra>
// kernel: mbconv2_forward.7
= control target key start
LH: loop header
LB: loop body
LE: loop exit
PB: predicated region body
PF: predicated region fallthrough
CT: control target
= control target key end

     0   :  { %s695_s15 = smov 0   ;;  %s697_s16 = smov 0   ;;  %s907_s0 = inlined_call_operand.vmem [shape: f32[2,16,16,128], index: 0, kind: input, shape index: {}]   ;;  %s908_s1 = inlined_call_operand.vmem [shape: f32[1,128], index: 1, kind: input, shape index: {}]   ;;  %s909_s2 = inlined_call_operand.vmem [shape: f32[1,128], index: 2, kind: input, shape index: {}]   ;;  %s910_s3 = inlined_call_operand.vmem [shape: f32[2,16,16,128], index: 3, kind: input, shape index: {}]   ;;  %s911_s4 = inlined_call_operand.vmem [shape: f32[2,16,16,128], index: 4, kind: output, shape index: {}]  }
   0x1   :  { %s699_s17 = smov 0  }
   0x2 LB: > { %s26_s18 = sadd.s32 1, %s664_s16  ;;  %p608_p0 = scmp.ge.s32.totalorder %s668_s17, 1  ;;  %s668_s17 = sphi %s699_s17, %s14_s17   ;;  %s664_s16 = sphi %s697_s16, %s913_s16   ;;  %s660_s15 = sphi %s695_s15, %s912_s15  }
   0x3   : > { %p28_p1 = scmp.ge.s32.totalorder %s26_s18, 2  ;;  %p202_p2 = scmp.lt.s32.totalorder %s668_s17, 3 }
   0x5   : > { %s915_s18 = smov (%p28_p1, %s26_s18), 0  ;;  %p203_p3 = pnand %p608_p0, %p202_p2 }
   0x6   : > { %p249_p4 = scmp.lt.s32.totalorder (!%p203_p3), %s660_s15, 1  ;;  %v716_v0 = vld [vmem:[%s908_s1] ss:$0 sm:$0xff] (!%p203_p3) }
   0x7   : > { %206 = sbr.rel (%p203_p3) target bundleno = 50 (0x32), region = 36  ;;  %v732_v2 = vld [vmem:[%s909_s2] ss:$0 sm:$0xff] (!%p203_p3) }
   0xe   : > { %s917_s15 = smov (!%p249_p4, %s660_s15), 1 }
   0xf   : > { %s619_s19 = sshll.u32 %s917_s15, 8 }
  0x10   : > { %s721_s24 = scalar_lea.vmem %s907_s0, %s619_s19  ;;  %s726_s27 = scalar_lea.vmem %s910_s3, %s619_s19 }
  0x11   : > { %v281_v1 = vld [vmem:[%s721_s24] sm:$0xff]  ;;  %v282_v3 = vld [vmem:[%s721_s24 + $0x8] sm:$0xff]  ;;  %v283_v7 = vld [vmem:[%s721_s24 + $0x10] sm:$0xff]  ;;  %s753_s6 = scalar_lea.vmem %s911_s4, %s619_s19 }
  0x12   : > { %v320_v4 = vmul.f32 %v716_v0, %v281_v1  ;;  %v391_v5 = vld [vmem:[%s726_s27] sm:$0xff]  ;;  %v321_v6 = vmul.f32 %v716_v0, %v282_v3  ;;  %v392_v8 = vld [vmem:[%s726_s27 + $0x8] sm:$0xff]  ;;  %v322_v9 = vmul.f32 %v716_v0, %v283_v7  ;;  %v284_v10 = vld [vmem:[%s721_s24 + $0x18] sm:$0xff] }
  0x13   : > { %v285_v11 = vld [vmem:[%s721_s24 + $0x20] sm:$0xff]  ;;  %v393_v14 = vld [vmem:[%s726_s27 + $0x10] sm:$0xff]  ;;  %v323_v15 = vmul.f32 %v716_v0, %v284_v10  ;;  %v394_v16 = vld [vmem:[%s726_s27 + $0x18] sm:$0xff] }
  0x14   : > { %v359_v12 = vadd.f32 %v732_v2, %v320_v4  ;;  %v360_v13 = vadd.f32 %v732_v2, %v321_v6  ;;  %v324_v17 = vmul.f32 %v716_v0, %v285_v11  ;;  %v286_v18 = vld [vmem:[%s721_s24 + $0x28] sm:$0xff]  ;;  %v361_v19 = vadd.f32 %v732_v2, %v322_v9  ;;  %v395_v20 = vld [vmem:[%s726_s27 + $0x20] sm:$0xff]  ;;  %v287_v22 = vld [vmem:[%s721_s24 + $0x30] sm:$0xff] }
  0x15   : > { %v325_v21 = vmul.f32 %v716_v0, %v286_v18  ;;  %v288_v23 = vld [vmem:[%s721_s24 + $0x38] sm:$0xff]  ;;  %v362_v26 = vadd.f32 %v732_v2, %v323_v15  ;;  %v396_v28 = vld [vmem:[%s726_s27 + $0x28] sm:$0xff]  ;;  %v289_v29 = vld [vmem:[%s721_s24 + $0x40] sm:$0xff]  ;;  %v326_v32 = vmul.f32 %v716_v0, %v287_v22 }
  0x16   : > { %v423_v24 = vadd.f32 %v391_v5, %v359_v12  ;;  %v424_v25 = vadd.f32 %v392_v8, %v360_v13  ;;  %v363_v27 = vadd.f32 %v732_v2, %v324_v17  ;;  %v425_v30 = vadd.f32 %v393_v14, %v361_v19  ;;  %v397_v33 = vld [vmem:[%s726_s27 + $0x30] sm:$0xff]  ;;  %v290_v35 = vld [vmem:[%s721_s24 + $0x48] sm:$0xff]  ;;  %v398_v39 = vld [vmem:[%s726_s27 + $0x38] sm:$0xff] }
  0x17   : > { %v364_v31 = vadd.f32 %v732_v2, %v325_v21  ;;  %v327_v34 = vmul.f32 %v716_v0, %v288_v23  ;;  %v291_v36 = vld [vmem:[%s721_s24 + $0x50] sm:$0xff]  ;;  %v426_v37 = vadd.f32 %v394_v16, %v362_v26  ;;  %v328_v40 = vmul.f32 %v716_v0, %v289_v29  ;;  %v399_v41 = vld [vmem:[%s726_s27 + $0x40] sm:$0xff]  ;;  %v292_v43 = vld [vmem:[%s721_s24 + $0x58] sm:$0xff] }
  0x18   : > { %455 = vst [vmem:[%s753_s6] sm:$0xff] %v423_v24  ;;  %456 = vst [vmem:[%s753_s6 + $0x8] sm:$0xff] %v424_v25  ;;  %v427_v38 = vadd.f32 %v395_v20, %v363_v27  ;;  %v329_v42 = vmul.f32 %v716_v0, %v290_v35  ;;  %v365_v45 = vadd.f32 %v732_v2, %v326_v32  ;;  %v400_v47 = vld [vmem:[%s726_s27 + $0x48] sm:$0xff]  ;;  %v293_v49 = vld [vmem:[%s721_s24 + $0x60] sm:$0xff] }
  0x19   : > { %457 = vst [vmem:[%s753_s6 + $0x10] sm:$0xff] %v425_v30  ;;  %v428_v44 = vadd.f32 %v396_v28, %v364_v31  ;;  %v366_v46 = vadd.f32 %v732_v2, %v327_v34  ;;  %v330_v48 = vmul.f32 %v716_v0, %v291_v36  ;;  %v294_v50 = vld [vmem:[%s721_s24 + $0x68] sm:$0xff]  ;;  %458 = vst [vmem:[%s753_s6 + $0x18] sm:$0xff] %v426_v37  ;;  %v401_v53 = vld [vmem:[%s726_s27 + $0x50] sm:$0xff] }
  0x1a   : > { %459 = vst [vmem:[%s753_s6 + $0x20] sm:$0xff] %v427_v38  ;;  %v367_v51 = vadd.f32 %v732_v2, %v328_v40  ;;  %v368_v52 = vadd.f32 %v732_v2, %v329_v42  ;;  %v331_v54 = vmul.f32 %v716_v0, %v292_v43  ;;  %v402_v55 = vld [vmem:[%s726_s27 + $0x58] sm:$0xff]  ;;  %v332_v56 = vmul.f32 %v716_v0, %v293_v49  ;;  %v295_v57 = vld [vmem:[%s721_s24 + $0x70] sm:$0xff]  ;;  %v403_v61 = vld [vmem:[%s726_s27 + $0x60] sm:$0xff] }
  0x1b   : > { %460 = vst [vmem:[%s753_s6 + $0x28] sm:$0xff] %v428_v44  ;;  %v429_v58 = vadd.f32 %v397_v33, %v365_v45  ;;  %v430_v59 = vadd.f32 %v398_v39, %v366_v46  ;;  %v369_v60 = vadd.f32 %v732_v2, %v330_v48  ;;  %v333_v62 = vmul.f32 %v716_v0, %v294_v50  ;;  %v296_v63 = vld [vmem:[%s721_s24 + $0x78] sm:$0xff]  ;;  %v297_v1 = vld [vmem:[%s721_s24 + $0x80] sm:$0xff]  ;;  %v404_v7 = vld [vmem:[%s726_s27 + $0x68] sm:$0xff] }
  0x1c   : > { %v431_v3 = vadd.f32 %v399_v41, %v367_v51  ;;  %v432_v4 = vadd.f32 %v400_v47, %v368_v52  ;;  %v370_v5 = vadd.f32 %v732_v2, %v331_v54  ;;  %v371_v6 = vadd.f32 %v732_v2, %v332_v56  ;;  %v298_v8 = vld [vmem:[%s721_s24 + $0x88] sm:$0xff]  ;;  %v405_v12 = vld [vmem:[%s726_s27 + $0x70] sm:$0xff]  ;;  %v300_v15 = vld [vmem:[%s721_s24 + $0x98] sm:$0xff] }
  0x1d   : > { %461 = vst [vmem:[%s753_s6 + $0x30] sm:$0xff] %v429_v58  ;;  %462 = vst [vmem:[%s753_s6 + $0x38] sm:$0xff] %v430_v59  ;;  %v433_v9 = vadd.f32 %v401_v53, %v369_v60  ;;  %v372_v10 = vadd.f32 %v732_v2, %v333_v62  ;;  %v334_v11 = vmul.f32 %v716_v0, %v295_v57  ;;  %v299_v14 = vld [vmem:[%s721_s24 + $0x90] sm:$0xff]  ;;  %v406_v18 = vld [vmem:[%s726_s27 + $0x78] sm:$0xff] }
  0x1e   : > { %v335_v13 = vmul.f32 %v716_v0, %v296_v63  ;;  %463 = vst [vmem:[%s753_s6 + $0x40] sm:$0xff] %v431_v3  ;;  %464 = vst [vmem:[%s753_s6 + $0x48] sm:$0xff] %v432_v4  ;;  %v434_v16 = vadd.f32 %v402_v55, %v370_v5  ;;  %v435_v17 = vadd.f32 %v403_v61, %v371_v6  ;;  %v407_v20 = vld [vmem:[%s726_s27 + $0x80] sm:$0xff]  ;;  %v408_v26 = vld [vmem:[%s726_s27 + $0x88] sm:$0xff] }
  0x1f   : > { %v336_v19 = vmul.f32 %v716_v0, %v297_v1  ;;  %v337_v21 = vmul.f32 %v716_v0, %v298_v8  ;;  %v301_v22 = vld [vmem:[%s721_s24 + $0xa0] sm:$0xff]  ;;  %465 = vst [vmem:[%s753_s6 + $0x50] sm:$0xff] %v433_v9  ;;  %v436_v23 = vadd.f32 %v404_v7, %v372_v10  ;;  %v373_v24 = vadd.f32 %v732_v2, %v334_v11  ;;  %v409_v28 = vld [vmem:[%s726_s27 + $0x90] sm:$0xff]  ;;  %v302_v29 = vld [vmem:[%s721_s24 + $0xa8] sm:$0xff] }
  0x20   : > { %v374_v25 = vadd.f32 %v732_v2, %v335_v13  ;;  %v338_v27 = vmul.f32 %v716_v0, %v299_v14  ;;  %466 = vst [vmem:[%s753_s6 + $0x58] sm:$0xff] %v434_v16  ;;  %467 = vst [vmem:[%s753_s6 + $0x60] sm:$0xff] %v435_v17  ;;  %v339_v32 = vmul.f32 %v716_v0, %v300_v15  ;;  %v410_v33 = vld [vmem:[%s726_s27 + $0x98] sm:$0xff]  ;;  %v303_v35 = vld [vmem:[%s721_s24 + $0xb0] sm:$0xff] }
  0x21   : > { %v375_v30 = vadd.f32 %v732_v2, %v336_v19  ;;  %v376_v31 = vadd.f32 %v732_v2, %v337_v21  ;;  %v340_v34 = vmul.f32 %v716_v0, %v301_v22  ;;  %v304_v36 = vld [vmem:[%s721_s24 + $0xb8] sm:$0xff]  ;;  %468 = vst [vmem:[%s753_s6 + $0x68] sm:$0xff] %v436_v23  ;;  %v437_v37 = vadd.f32 %v405_v12, %v373_v24  ;;  %v411_v40 = vld [vmem:[%s726_s27 + $0xa0] sm:$0xff]  ;;  %v306_v43 = vld [vmem:[%s721_s24 + $0xc8] sm:$0xff] }
  0x22   : > { %v438_v38 = vadd.f32 %v406_v18, %v374_v25  ;;  %v377_v39 = vadd.f32 %v732_v2, %v338_v27  ;;  %v341_v41 = vmul.f32 %v716_v0, %v302_v29  ;;  %v305_v42 = vld [vmem:[%s721_s24 + $0xc0] sm:$0xff]  ;;  %v378_v46 = vadd.f32 %v732_v2, %v339_v32  ;;  %v412_v48 = vld [vmem:[%s726_s27 + $0xa8] sm:$0xff]  ;;  %v307_v49 = vld [vmem:[%s721_s24 + $0xd0] sm:$0xff] }
  0x23   : > { %v439_v44 = vadd.f32 %v407_v20, %v375_v30  ;;  %v440_v45 = vadd.f32 %v408_v26, %v376_v31  ;;  %v379_v47 = vadd.f32 %v732_v2, %v340_v34  ;;  %469 = vst [vmem:[%s753_s6 + $0x70] sm:$0xff] %v437_v37  ;;  %v342_v52 = vmul.f32 %v716_v0, %v303_v35  ;;  %v308_v54 = vld [vmem:[%s721_s24 + $0xd8] sm:$0xff]  ;;  %v309_v55 = vld [vmem:[%s721_s24 + $0xe0] sm:$0xff]  ;;  %v413_v58 = vld [vmem:[%s726_s27 + $0xb0] sm:$0xff] }
  0x24   : > { %470 = vst [vmem:[%s753_s6 + $0x78] sm:$0xff] %v438_v38  ;;  %v441_v50 = vadd.f32 %v409_v28, %v377_v39  ;;  %v380_v51 = vadd.f32 %v732_v2, %v341_v41  ;;  %v343_v53 = vmul.f32 %v716_v0, %v304_v36  ;;  %v442_v56 = vadd.f32 %v410_v33, %v378_v46  ;;  %v414_v59 = vld [vmem:[%s726_s27 + $0xb8] sm:$0xff]  ;;  %v310_v62 = vld [vmem:[%s721_s24 + $0xe8] sm:$0xff]  ;;  %v415_v4 = vld [vmem:[%s726_s27 + $0xc0] sm:$0xff] }
  0x25   : > { %471 = vst [vmem:[%s753_s6 + $0x80] sm:$0xff] %v439_v44  ;;  %472 = vst [vmem:[%s753_s6 + $0x88] sm:$0xff] %v440_v45  ;;  %v443_v57 = vadd.f32 %v411_v40, %v379_v47  ;;  %v344_v60 = vmul.f32 %v716_v0, %v305_v42  ;;  %v345_v61 = vmul.f32 %v716_v0, %v306_v43  ;;  %v416_v5 = vld [vmem:[%s726_s27 + $0xc8] sm:$0xff]  ;;  %v417_v9 = vld [vmem:[%s726_s27 + $0xd0] sm:$0xff] }
  0x26   : > { %473 = vst [vmem:[%s753_s6 + $0x90] sm:$0xff] %v441_v50  ;;  %v444_v63 = vadd.f32 %v412_v48, %v380_v51  ;;  %v381_v1 = vadd.f32 %v732_v2, %v342_v52  ;;  %v382_v3 = vadd.f32 %v732_v2, %v343_v53  ;;  %v346_v6 = vmul.f32 %v716_v0, %v307_v49  ;;  %v311_v12 = vld [vmem:[%s721_s24 + $0xf0] sm:$0xff]  ;;  %v312_v13 = vld [vmem:[%s721_s24 + $0xf8] sm:$0xff]  ;;  %v419_v18 = vld [vmem:[%s726_s27 + $0xe0] sm:$0xff] }
  0x27   : > { %474 = vst [vmem:[%s753_s6 + $0x98] sm:$0xff] %v442_v56  ;;  %475 = vst [vmem:[%s753_s6 + $0xa0] sm:$0xff] %v443_v57  ;;  %v383_v7 = vadd.f32 %v732_v2, %v344_v60  ;;  %v384_v8 = vadd.f32 %v732_v2, %v345_v61  ;;  %v347_v10 = vmul.f32 %v716_v0, %v308_v54  ;;  %v418_v17 = vld [vmem:[%s726_s27 + $0xd8] sm:$0xff]  ;;  %v420_v24 = vld [vmem:[%s726_s27 + $0xe8] sm:$0xff] }
  0x28   : > { %v348_v11 = vmul.f32 %v716_v0, %v309_v55  ;;  %476 = vst [vmem:[%s753_s6 + $0xa8] sm:$0xff] %v444_v63  ;;  %v445_v14 = vadd.f32 %v413_v58, %v381_v1  ;;  %v446_v15 = vadd.f32 %v414_v59, %v382_v3  ;;  %v385_v16 = vadd.f32 %v732_v2, %v346_v6  ;;  %v421_v31 = vld [vmem:[%s726_s27 + $0xf0] sm:$0xff]  ;;  %v422_v32 = vld [vmem:[%s726_s27 + $0xf8] sm:$0xff] }
  0x29   : > { %v349_v19 = vmul.f32 %v716_v0, %v310_v62  ;;  %v447_v20 = vadd.f32 %v415_v4, %v383_v7  ;;  %v448_v21 = vadd.f32 %v416_v5, %v384_v8  ;;  %v386_v22 = vadd.f32 %v732_v2, %v347_v10 }
  0x2a   : > { %v387_v23 = vadd.f32 %v732_v2, %v348_v11  ;;  %477 = vst [vmem:[%s753_s6 + $0xb0] sm:$0xff] %v445_v14  ;;  %478 = vst [vmem:[%s753_s6 + $0xb8] sm:$0xff] %v446_v15  ;;  %v449_v25 = vadd.f32 %v417_v9, %v385_v16  ;;  %v350_v27 = vmul.f32 %v716_v0, %v311_v12 }
  0x2b   : > { %v388_v26 = vadd.f32 %v732_v2, %v349_v19  ;;  %v351_v28 = vmul.f32 %v716_v0, %v312_v13  ;;  %479 = vst [vmem:[%s753_s6 + $0xc0] sm:$0xff] %v447_v20  ;;  %480 = vst [vmem:[%s753_s6 + $0xc8] sm:$0xff] %v448_v21  ;;  %v450_v29 = vadd.f32 %v418_v17, %v386_v22 }
  0x2c   : > { %v451_v30 = vadd.f32 %v419_v18, %v387_v23  ;;  %481 = vst [vmem:[%s753_s6 + $0xd0] sm:$0xff] %v449_v25  ;;  %v389_v34 = vadd.f32 %v732_v2, %v350_v27 }
  0x2d   : > { %v452_v33 = vadd.f32 %v420_v24, %v388_v26  ;;  %v390_v35 = vadd.f32 %v732_v2, %v351_v28  ;;  %482 = vst [vmem:[%s753_s6 + $0xd8] sm:$0xff] %v450_v29 }
  0x2e   : > { %483 = vst [vmem:[%s753_s6 + $0xe0] sm:$0xff] %v451_v30  ;;  %v453_v36 = vadd.f32 %v421_v31, %v389_v34 }
  0x2f   : > { %484 = vst [vmem:[%s753_s6 + $0xe8] sm:$0xff] %v452_v33  ;;  %v454_v37 = vadd.f32 %v422_v32, %v390_v35 }
  0x30   : > { %485 = vst [vmem:[%s753_s6 + $0xf0] sm:$0xff] %v453_v36 }
  0x31   : > { %486 = vst [vmem:[%s753_s6 + $0xf8] sm:$0xff] %v454_v37 }
  0x32 PF: > { %s14_s17 = sadd.s32 1, %s668_s17   ;;  %s912_s15 = smov %s664_s16 }
  0x33   : > { %p11_p5 = scmp.ge.s32.totalorder %s14_s17, 4   ;;  %s913_s16 = smov %s915_s18 }
  0x35   :  { %13 = sbr.rel (!%p11_p5) target bundleno = 2 (0x2), region = 69 }

// kernel: mbconv2_forward.6
= control target key start
LH: loop header
LB: loop body
LE: loop exit
PB: predicated region body
PF: predicated region fallthrough
CT: control target
= control target key end

     0   :  { %s1173_s21 = smov 0   ;;  %s1175_s22 = smov 0   ;;  %s1610_s0 = inlined_call_operand.vmem [shape: f32[2,16,16,128], index: 0, kind: input, shape index: {}]   ;;  %s1611_s1 = inlined_call_operand.vmem [shape: bf16[128,128], index: 1, kind: input, shape index: {}]   ;;  %s1612_s2 = inlined_call_operand.vmem [shape: f32[1,128], index: 2, kind: input, shape index: {}]   ;;  %s1613_s3 = inlined_call_operand.vmem [shape: f32[1,128], index: 3, kind: input, shape index: {}]   ;;  %s1614_s4 = inlined_call_operand.vmem [shape: f32[2,16,16,128], index: 4, kind: output, shape index: {0}]   ;;  %s1615_s5 = inlined_call_operand.vmem [shape: f32[1,128], index: 5, kind: output, shape index: {1}]   ;;  %s1616_s6 = inlined_call_operand.vmem [shape: f32[1,128], index: 6, kind: output, shape index: {2}]  }
   0x1   :  { %s1177_s23 = smov 0  }
   0x2 LB: > { %s29_s24 = sadd.s32 1, %s1131_s22  ;;  %p971_p0 = scmp.ge.s32.totalorder %s1135_s23, 1  ;;  %s1135_s23 = sphi %s1177_s23, %s17_s23   ;;  %s1131_s22 = sphi %s1175_s22, %s1618_s22   ;;  %s1127_s21 = sphi %s1173_s21, %s1617_s21  }
   0x3   : > { %p31_p1 = scmp.ge.s32.totalorder %s29_s24, 2  ;;  %p229_p2 = scmp.lt.s32.totalorder %s1135_s23, 3 }
   0x5   : > { %s1620_s24 = smov (%p31_p1, %s29_s24), 0  ;;  %p230_p3 = pnand %p971_p0, %p229_p2 }
   0x6   : > { %v1105_v0 = vld [vmem:[%s1611_s1] sm:$0xff] (!%p230_p3)   ;;  %p270_p4 = scmp.lt.s32.totalorder (!%p230_p3), %s1127_s21, 1  ;;  %v1106_v1 = vld [vmem:[%s1611_s1 + $0x8] sm:$0xff] (!%p230_p3)   ;;  %v1107_v2 = vld [vmem:[%s1611_s1 + $0x10] sm:$0xff] (!%p230_p3)   ;;  %p707_p5 = scmp.eq.s32.totalorder (!%p230_p3), %s1127_s21, 0 }
   0x7   : > { %233 = sbr.rel (%p230_p3) target bundleno = 358 (0x166), region = 36  ;;  %1016 = vmatprep.subr.bf16.mxu0 (!%p230_p3), %v1105_v0  ;;  %1064 = vmatprep.subr.bf16.mxu1 (!%p230_p3), %v1105_v0  ;;  %v1108_v3 = vld [vmem:[%s1611_s1 + $0x18] sm:$0xff] (!%p230_p3)   ;;  %v1222_v6 = vld [vmem:[%s1612_s2] ss:$0 sm:$0xff] (!%p230_p3)  ;;  %v1110_v39 = vld [vmem:[%s1611_s1 + $0x28] sm:$0xff] (!%p230_p3)  }
   0x8   : > { %1017 = vmatpush3.bf16.msra.mxu0 (!%p230_p3), %v1105_v0  ;;  %1072 = vmatpush3.bf16.msra.mxu1 (!%p230_p3), %v1105_v0  ;;  %v1229_v9 = vld [vmem:[%s1613_s3] ss:$0 sm:$0xff] (!%p230_p3)  ;;  %v1111_v59 = vld [vmem:[%s1611_s1 + $0x30] sm:$0xff] (!%p230_p3)  }
   0x9   : > { %1018 = vmatprep.subr.bf16.mxu0 (!%p230_p3), %v1106_v1  ;;  %1065 = vmatprep.subr.bf16.mxu1 (!%p230_p3), %v1106_v1  ;;  %v1109_v21 = vld [vmem:[%s1611_s1 + $0x20] sm:$0xff] (!%p230_p3)  }
   0xc   : > { %1019 = vmatpush3.bf16.msra.mxu0 (!%p230_p3), %v1106_v1  ;;  %1073 = vmatpush3.bf16.msra.mxu1 (!%p230_p3), %v1106_v1 }
   0xd   : > { %1020 = vmatprep.subr.bf16.mxu0 (!%p230_p3), %v1107_v2  ;;  %1066 = vmatprep.subr.bf16.mxu1 (!%p230_p3), %v1107_v2 }
   0xe   : > { %s271_s29 = scalar_select %p270_p4, %s1127_s21, 1 }
  0x10   : > { %s989_s8 = sshll.u32 %s271_s29, 8  ;;  %1021 = vmatpush3.bf16.msra.mxu0 %v1107_v2  ;;  %1074 = vmatpush3.bf16.msra.mxu1 %v1107_v2 }
  0x11   : > { %s1207_s11 = scalar_lea.vmem %s1610_s0, %s989_s8  ;;  %s1212_s14 = scalar_lea.vmem %s1614_s4, %s989_s8  ;;  %1022 = vmatprep.subr.bf16.mxu0 %v1108_v3  ;;  %1067 = vmatprep.subr.bf16.mxu1 %v1108_v3 }
  0x12   : > { %v292_v4 = vld [vmem:[%s1207_s11] sm:$0xff]  ;;  %v293_v5 = vld [vmem:[%s1207_s11 + $0x8] sm:$0xff]  ;;  %v294_v14 = vld [vmem:[%s1207_s11 + $0x10] sm:$0xff] }
  0x13   : > { %v331_v7 = vmul.f32 %v1222_v6, %v292_v4  ;;  %v332_v8 = vmul.f32 %v1222_v6, %v293_v5  ;;  %v308_v10 = vld [vmem:[%s1207_s11 + $0x80] sm:$0xff]  ;;  %v309_v11 = vld [vmem:[%s1207_s11 + $0x88] sm:$0xff]  ;;  %v295_v15 = vld [vmem:[%s1207_s11 + $0x18] sm:$0xff]  ;;  %v333_v19 = vmul.f32 %v1222_v6, %v294_v14 }
  0x14   : > { %v347_v12 = vmul.f32 %v1222_v6, %v308_v10  ;;  %v348_v13 = vmul.f32 %v1222_v6, %v309_v11  ;;  %v310_v16 = vld [vmem:[%s1207_s11 + $0x90] sm:$0xff]  ;;  %v311_v20 = vld [vmem:[%s1207_s11 + $0x98] sm:$0xff]  ;;  %v334_v24 = vmul.f32 %v1222_v6, %v295_v15  ;;  %v296_v33 = vld [vmem:[%s1207_s11 + $0x20] sm:$0xff]  ;;  %1023 = vmatpush3.bf16.msra.mxu0 %v1108_v3  ;;  %1075 = vmatpush3.bf16.msra.mxu1 %v1108_v3 }
  0x15   : > { %v370_v17 = vadd.f32 %v1229_v9, %v331_v7  ;;  %v371_v18 = vadd.f32 %v1229_v9, %v332_v8  ;;  %v372_v27 = vadd.f32 %v1229_v9, %v333_v19  ;;  %v349_v28 = vmul.f32 %v1222_v6, %v310_v16  ;;  %v297_v38 = vld [vmem:[%s1207_s11 + $0x28] sm:$0xff]  ;;  %1024 = vmatprep.subr.bf16.mxu0 %v1109_v21  ;;  %v312_v44 = vld [vmem:[%s1207_s11 + $0xa0] sm:$0xff]  ;;  %v298_v49 = vld [vmem:[%s1207_s11 + $0x30] sm:$0xff] }
  0x16   : > { %v386_v22 = vadd.f32 %v1229_v9, %v347_v12  ;;  %v387_v23 = vadd.f32 %v1229_v9, %v348_v13  ;;  %v373_v31 = vadd.f32 %v1229_v9, %v334_v24  ;;  %v350_v32 = vmul.f32 %v1222_v6, %v311_v20  ;;  %1068 = vmatprep.subr.bf16.mxu1 %v1109_v21  ;;  %v313_v45 = vld [vmem:[%s1207_s11 + $0xa8] sm:$0xff]  ;;  %v299_v53 = vld [vmem:[%s1207_s11 + $0x38] sm:$0xff]  ;;  %v314_v58 = vld [vmem:[%s1207_s11 + $0xb0] sm:$0xff] }
  0x17   : > { %v402_v25 = vmax.f32 %v370_v17, 0.0  ;;  %v403_v26 = vmax.f32 %v371_v18, 0.0  ;;  %v404_v36 = vmax.f32 %v372_v27, 0.0  ;;  %v388_v37 = vadd.f32 %v1229_v9, %v349_v28  ;;  %v315_v4 = vld [vmem:[%s1207_s11 + $0xb8] sm:$0xff]  ;;  %v300_v11 = vld [vmem:[%s1207_s11 + $0x40] sm:$0xff]  ;;  %v317_v27 = vld [vmem:[%s1207_s11 + $0xc8] sm:$0xff] }
  0x18   : > { %v418_v29 = vmax.f32 %v386_v22, 0.0  ;;  %v419_v30 = vmax.f32 %v387_v23, 0.0  ;;  %v405_v42 = vmax.f32 %v373_v31, 0.0  ;;  %v389_v43 = vadd.f32 %v1229_v9, %v350_v32  ;;  %1025 = vmatpush3.bf16.msra.mxu0 %v1109_v21  ;;  %1076 = vmatpush3.bf16.msra.mxu1 %v1109_v21  ;;  %v1112_v16 = vld [vmem:[%s1611_s1 + $0x38] sm:$0xff]   ;;  %v301_v21 = vld [vmem:[%s1207_s11 + $0x48] sm:$0xff]  ;;  %v302_v32 = vld [vmem:[%s1207_s11 + $0x50] sm:$0xff] }
  0x19   : > { %v434_v34 = vmin.f32 %v402_v25, 6.0  ;;  %v435_v35 = vmin.f32 %v403_v26, 6.0  ;;  %v420_v47 = vmax.f32 %v388_v37, 0.0  ;;  %v335_v48 = vmul.f32 %v1222_v6, %v296_v33  ;;  %1026 = vmatprep.subr.bf16.mxu0 %v1110_v39  ;;  %1069 = vmatprep.subr.bf16.mxu1 %v1110_v39  ;;  %v316_v26 = vld [vmem:[%s1207_s11 + $0xc0] sm:$0xff]  ;;  %v303_v37 = vld [vmem:[%s1207_s11 + $0x58] sm:$0xff] }
  0x1a   : > { %v450_v40 = vmin.f32 %v418_v29, 6.0  ;;  %v451_v41 = vmin.f32 %v419_v30, 6.0  ;;  %v421_v51 = vmax.f32 %v389_v43, 0.0  ;;  %v336_v52 = vmul.f32 %v1222_v6, %v297_v38 }
  0x1b   : > { %v466_v46 = vpack.c.bf16 %v435_v35, %v434_v34  ;;  %v1265_v54 = vmin.f32 %v404_v36, 6.0  ;;  %v374_v55 = vadd.f32 %v1229_v9, %v335_v48  ;;  %v351_v56 = vmul.f32 %v1222_v6, %v312_v44 }
  0x1c   : > { %v474_v50 = vpack.c.bf16 %v451_v41, %v450_v40  ;;  %v352_v57 = vmul.f32 %v1222_v6, %v313_v45  ;;  %v1274_v60 = vmin.f32 %v405_v42, 6.0  ;;  %v1276_v61 = vmin.f32 %v420_v47, 6.0  ;;  %1027 = vmatpush3.bf16.msra.mxu0 %v1110_v39  ;;  %1077 = vmatpush3.bf16.msra.mxu1 %v1110_v39  ;;  %v318_v42 = vld [vmem:[%s1207_s11 + $0xd0] sm:$0xff] }
  0x1d   : > { %v375_v62 = vadd.f32 %v1229_v9, %v336_v52  ;;  %v337_v63 = vmul.f32 %v1222_v6, %v298_v49  ;;  %1032 = vmatprep.mubr.bf16.mxu0 %v466_v46  ;;  %v406_v0 = vmax.f32 %v374_v55, 0.0  ;;  %v390_v1 = vadd.f32 %v1229_v9, %v351_v56  ;;  %1028 = vmatprep.subr.bf16.mxu0 %v1111_v59  ;;  %v304_v56 = vld [vmem:[%s1207_s11 + $0x60] sm:$0xff] }
  0x1e   : > { %1048 = vmatprep.mubr.bf16.mxu1 %v474_v50  ;;  %v391_v2 = vadd.f32 %v1229_v9, %v352_v57  ;;  %v338_v3 = vmul.f32 %v1222_v6, %v299_v53  ;;  %v1284_v5 = vmin.f32 %v421_v51, 6.0  ;;  %v353_v10 = vmul.f32 %v1222_v6, %v314_v58  ;;  %1070 = vmatprep.subr.bf16.mxu1 %v1111_v59  ;;  %v319_v51 = vld [vmem:[%s1207_s11 + $0xd8] sm:$0xff] }
  0x1f   : > { %v407_v7 = vmax.f32 %v375_v62, 0.0  ;;  %v376_v8 = vadd.f32 %v1229_v9, %v337_v63  ;;  %v1289_v12 = vmin.f32 %v406_v0, 6.0  ;;  %v422_v13 = vmax.f32 %v390_v1, 0.0  ;;  %v305_v0 = vld [vmem:[%s1207_s11 + $0x68] sm:$0xff] }
  0x20   : > { %v423_v14 = vmax.f32 %v391_v2, 0.0  ;;  %v377_v15 = vadd.f32 %v1229_v9, %v338_v3  ;;  %v354_v19 = vmul.f32 %v1222_v6, %v315_v4  ;;  %v392_v20 = vadd.f32 %v1229_v9, %v353_v10  ;;  %1029 = vmatpush3.bf16.msra.mxu0 %v1111_v59  ;;  %1078 = vmatpush3.bf16.msra.mxu1 %v1111_v59 }
  0x21   : > { %v439_v17 = vmin.f32 %v407_v7, 6.0  ;;  %v408_v18 = vmax.f32 %v376_v8, 0.0  ;;  %v454_v22 = vmin.f32 %v422_v13, 6.0  ;;  %v339_v25 = vmul.f32 %v1222_v6, %v300_v11  ;;  %1030 = vmatprep.subr.bf16.mxu0 %v1112_v16  ;;  %1071 = vmatprep.subr.bf16.mxu1 %v1112_v16  ;;  %v321_v7 = vld [vmem:[%s1207_s11 + $0xe8] sm:$0xff] }
  0x22   : > { %v455_v23 = vmin.f32 %v423_v14, 6.0  ;;  %v409_v24 = vmax.f32 %v377_v15, 0.0  ;;  %v467_v28 = vpack.c.bf16 %v1274_v60, %v1265_v54  ;;  %v475_v29 = vpack.c.bf16 %v1284_v5, %v1276_v61  ;;  %v320_v5 = vld [vmem:[%s1207_s11 + $0xe0] sm:$0xff] }
  0x23   : > { %v393_v30 = vadd.f32 %v1229_v9, %v354_v19  ;;  %v424_v31 = vmax.f32 %v392_v20, 0.0  ;;  %v468_v33 = vpack.c.bf16 %v439_v17, %v1289_v12  ;;  %v1308_v34 = vmin.f32 %v408_v18, 6.0  ;;  %v306_v12 = vld [vmem:[%s1207_s11 + $0x70] sm:$0xff]  ;;  %v307_v17 = vld [vmem:[%s1207_s11 + $0x78] sm:$0xff] }
  0x24   : > { %v340_v35 = vmul.f32 %v1222_v6, %v301_v21  ;;  %v378_v36 = vadd.f32 %v1229_v9, %v339_v25  ;;  %v476_v38 = vpack.c.bf16 %v455_v23, %v454_v22  ;;  %v355_v40 = vmul.f32 %v1222_v6, %v316_v26  ;;  %1031 = vmatpush3.bf16.msra.mxu0 %v1112_v16  ;;  %v322_v22 = vld [vmem:[%s1207_s11 + $0xf0] sm:$0xff] }
  0x25   : > { %v425_v39 = vmax.f32 %v393_v30, 0.0  ;;  %v356_v41 = vmul.f32 %v1222_v6, %v317_v27  ;;  %v1316_v43 = vmin.f32 %v409_v24, 6.0  ;;  %v341_v46 = vmul.f32 %v1222_v6, %v302_v32  ;;  %1079 = vmatpush3.bf16.msra.mxu1 %v1112_v16 }
  0x26   : > { %v379_v44 = vadd.f32 %v1229_v9, %v340_v35  ;;  %v410_v45 = vmax.f32 %v378_v36, 0.0  ;;  %v456_v47 = vmin.f32 %v424_v31, 6.0  ;;  %v394_v48 = vadd.f32 %v1229_v9, %v355_v40  ;;  %v323_v31 = vld [vmem:[%s1207_s11 + $0xf8] sm:$0xff] }
  0x27   : > { %v395_v49 = vadd.f32 %v1229_v9, %v356_v41  ;;  %v342_v50 = vmul.f32 %v1222_v6, %v303_v37  ;;  %v457_v52 = vmin.f32 %v425_v39, 6.0  ;;  %v380_v54 = vadd.f32 %v1229_v9, %v341_v46  ;;  %1033 = vmatmul.mubr.bf16.vlgmr.msra.gmra.mrb[0].mxu0 %v467_v28 }
  0x28   : > { %v411_v53 = vmax.f32 %v379_v44, 0.0  ;;  %v357_v55 = vmul.f32 %v1222_v6, %v318_v42  ;;  %v426_v57 = vmax.f32 %v394_v48, 0.0  ;;  %v442_v60 = vmin.f32 %v410_v45, 6.0  ;;  %1049 = vmatmul.mubr.bf16.vlgmr.msra.gmra.mrb[0].mxu1 %v475_v29  ;;  %1036 = vmatprep.mubr.bf16.mxu0 %v468_v33 }
  0x29   : > { %v427_v58 = vmax.f32 %v395_v49, 0.0  ;;  %v381_v59 = vadd.f32 %v1229_v9, %v342_v50  ;;  %v358_v62 = vmul.f32 %v1222_v6, %v319_v51  ;;  %v412_v3 = vmax.f32 %v380_v54, 0.0  ;;  %1052 = vmatprep.mubr.bf16.mxu1 %v476_v38 }
  0x2a   : > { %v443_v61 = vmin.f32 %v411_v53, 6.0  ;;  %v396_v63 = vadd.f32 %v1229_v9, %v357_v55  ;;  %v458_v1 = vmin.f32 %v426_v57, 6.0  ;;  %v343_v4 = vmul.f32 %v1222_v6, %v304_v56 }
  0x2b   : > { %v459_v2 = vmin.f32 %v427_v58, 6.0  ;;  %v469_v8 = vpack.c.bf16 %v1316_v43, %v1308_v34  ;;  %v477_v10 = vpack.c.bf16 %v457_v52, %v456_v47  ;;  %v397_v11 = vadd.f32 %v1229_v9, %v358_v62 }
  0x2c   : > { %v413_v13 = vmax.f32 %v381_v59, 0.0  ;;  %v428_v14 = vmax.f32 %v396_v63, 0.0  ;;  %v344_v15 = vmul.f32 %v1222_v6, %v305_v0  ;;  %v382_v16 = vadd.f32 %v1229_v9, %v343_v4 }
  0x2d   : > { %v470_v18 = vpack.c.bf16 %v443_v61, %v442_v60  ;;  %v429_v19 = vmax.f32 %v397_v11, 0.0  ;;  %v359_v20 = vmul.f32 %v1222_v6, %v320_v5  ;;  %v360_v21 = vmul.f32 %v1222_v6, %v321_v7 }
  0x2e   : > { %v478_v23 = vpack.c.bf16 %v459_v2, %v458_v1  ;;  %v444_v24 = vmin.f32 %v412_v3, 6.0  ;;  %v383_v25 = vadd.f32 %v1229_v9, %v344_v15  ;;  %v345_v26 = vmul.f32 %v1222_v6, %v306_v12 }
  0x2f   : > { %v414_v27 = vmax.f32 %v382_v16, 0.0  ;;  %v398_v28 = vadd.f32 %v1229_v9, %v359_v20  ;;  %v399_v29 = vadd.f32 %v1229_v9, %v360_v21  ;;  %v346_v30 = vmul.f32 %v1222_v6, %v307_v17  ;;  %1037 = vmatmul.mubr.bf16.gmra.mrb[4].mxu0 %v469_v8 }
  0x30   : > { %v445_v32 = vmin.f32 %v413_v13, 6.0  ;;  %v460_v33 = vmin.f32 %v428_v14, 6.0  ;;  %v415_v34 = vmax.f32 %v383_v25, 0.0  ;;  %v361_v35 = vmul.f32 %v1222_v6, %v322_v22  ;;  %1053 = vmatmul.mubr.bf16.gmra.mrb[4].mxu1 %v477_v10  ;;  %1040 = vmatprep.mubr.bf16.mxu0 %v470_v18 }
  0x31   : > { %v461_v36 = vmin.f32 %v429_v19, 6.0  ;;  %v430_v37 = vmax.f32 %v398_v28, 0.0  ;;  %v431_v38 = vmax.f32 %v399_v29, 0.0  ;;  %v384_v39 = vadd.f32 %v1229_v9, %v345_v26  ;;  %1056 = vmatprep.mubr.bf16.mxu1 %v478_v23 }
  0x32   : > { %v385_v40 = vadd.f32 %v1229_v9, %v346_v30  ;;  %v362_v41 = vmul.f32 %v1222_v6, %v323_v31  ;;  %v400_v42 = vadd.f32 %v1229_v9, %v361_v35  ;;  %v446_v43 = vmin.f32 %v414_v27, 6.0 }
  0x33   : > { %v447_v44 = vmin.f32 %v415_v34, 6.0  ;;  %v462_v45 = vmin.f32 %v430_v37, 6.0  ;;  %v463_v46 = vmin.f32 %v431_v38, 6.0  ;;  %v471_v48 = vpack.c.bf16 %v445_v32, %v444_v24 }
  0x34   : > { %v401_v47 = vadd.f32 %v1229_v9, %v362_v41  ;;  %v479_v49 = vpack.c.bf16 %v461_v36, %v460_v33  ;;  %v416_v50 = vmax.f32 %v384_v39, 0.0  ;;  %v417_v51 = vmax.f32 %v385_v40, 0.0 }
  0x35   : > { %v432_v52 = vmax.f32 %v400_v42, 0.0  ;;  %v472_v54 = vpack.c.bf16 %v447_v44, %v446_v43  ;;  %v480_v55 = vpack.c.bf16 %v463_v46, %v462_v45  ;;  %v1137_v30 = vmov (%p707_p5), 0.0  }
  0x36   : > { %v433_v53 = vmax.f32 %v401_v47, 0.0  ;;  %v448_v6 = vmin.f32 %v416_v50, 6.0  ;;  %v449_v56 = vmin.f32 %v417_v51, 6.0  ;;  %713 = vst [vmem:[%s1615_s5] sm:$0x1] (%p707_p5), %v1137_v30  ;;  %714 = vst [vmem:[%s1616_s6] sm:$0x1] (%p707_p5), %v1137_v30 }
  0x37   : > { %1041 = vmatmul.mubr.bf16.gmra.mrb[8].mxu0 %v471_v48  ;;  %v464_v57 = vmin.f32 %v432_v52, 6.0 }
  0x38   : > { %1057 = vmatmul.mubr.bf16.gmra.mrb[8].mxu1 %v479_v49  ;;  %v465_v58 = vmin.f32 %v433_v53, 6.0  ;;  %1044 = vmatprep.mubr.bf16.mxu0 %v472_v54  ;;  %v473_v59 = vpack.c.bf16 %v449_v56, %v448_v6 }
  0x39   : > { %1060 = vmatprep.mubr.bf16.mxu1 %v480_v55 }
  0x3a   : > { %v481_v60 = vpack.c.bf16 %v465_v58, %v464_v57 }
  0x3f   : > { %1045 = vmatmul.mubr.bf16.gmra.mrb[12].mxu0 %v473_v59 }
  0x40   : > { %1061 = vmatmul.mubr.bf16.gmra.mrb[12].mxu1 %v481_v60 }
  0xfa   : > { %v1357_v9 = vpop.f32.mrb[0].mxu0 }
  0xfb   : > { %v1359_v61 = vpop.f32.mrb[0].mxu1  ;;  %v1361_v62 = vpop.f32.mrb[1].mxu0 }
  0xfc   : > { %v1363_v63 = vpop.f32.mrb[1].mxu1  ;;  %v1365_v0 = vpop.f32.mrb[2].mxu0 }
  0xfd   : > { %v1367_v1 = vpop.f32.mrb[2].mxu1  ;;  %v1369_v2 = vpop.f32.mrb[3].mxu0 }
  0xfe   : > { %v1371_v3 = vpop.f32.mrb[3].mxu1 }
 0x102   : > { %v1373_v4 = vpop.f32.mrb[4].mxu0 }
 0x103   : > { %v1375_v5 = vpop.f32.mrb[4].mxu1  ;;  %v1377_v7 = vpop.f32.mrb[5].mxu0 }
 0x104   : > { %v1379_v8 = vpop.f32.mrb[5].mxu1  ;;  %v1381_v10 = vpop.f32.mrb[6].mxu0 }
 0x105   : > { %v1383_v11 = vpop.f32.mrb[6].mxu1  ;;  %v1385_v12 = vpop.f32.mrb[7].mxu0 }
 0x106   : > { %v1387_v13 = vpop.f32.mrb[7].mxu1 }
 0x10a   : > { %v1389_v14 = vpop.f32.mrb[8].mxu0 }
 0x10b   : > { %v1391_v15 = vpop.f32.mrb[8].mxu1  ;;  %v1393_v16 = vpop.f32.mrb[9].mxu0 }
 0x10c   : > { %v1395_v17 = vpop.f32.mrb[9].mxu1  ;;  %v1397_v18 = vpop.f32.mrb[10].mxu0 }
 0x10d   : > { %v1399_v19 = vpop.f32.mrb[10].mxu1  ;;  %v1401_v20 = vpop.f32.mrb[11].mxu0 }
 0x10e   : > { %v1403_v21 = vpop.f32.mrb[11].mxu1 }
 0x110   : > { %712 = sbr.rel (!%p707_p5) target bundleno = 279 (0x117), region = 40 }
 0x112   : > { %v1405_v22 = vpop.f32.mrb[12].mxu0 }
 0x113   : > { %v1407_v23 = vpop.f32.mrb[12].mxu1  ;;  %v1409_v24 = vpop.f32.mrb[13].mxu0 }
 0x114   : > { %v1411_v25 = vpop.f32.mrb[13].mxu1  ;;  %v1413_v26 = vpop.f32.mrb[14].mxu0 }
 0x115   : > { %v1415_v27 = vpop.f32.mrb[14].mxu1  ;;  %v1417_v28 = vpop.f32.mrb[15].mxu0 }
 0x116   : > { %v1419_v29 = vpop.f32.mrb[15].mxu1 }
 0x117 PF: > { %v716_v31 = vadd.f32 %v1369_v2, %v1361_v62  ;;  %827 = vst [vmem:[%s1212_s14] sm:$0xff] %v1361_v62  ;;  %828 = vst [vmem:[%s1212_s14 + $0x8] sm:$0xff] %v1369_v2  ;;  %v756_v34 = vmul.f32 %v1361_v62, %v1361_v62  ;;  %v757_v35 = vmul.f32 %v1369_v2, %v1369_v2 }
 0x118   : > { %829 = vst [vmem:[%s1212_s14 + $0x10] sm:$0xff] %v1357_v9  ;;  %830 = vst [vmem:[%s1212_s14 + $0x18] sm:$0xff] %v1365_v0  ;;  %v758_v37 = vmul.f32 %v1357_v9, %v1357_v9  ;;  %v759_v39 = vmul.f32 %v1365_v0, %v1365_v0  ;;  %v760_v42 = vmul.f32 %v1377_v7, %v1377_v7 }
 0x119   : > { %831 = vst [vmem:[%s1212_s14 + $0x20] sm:$0xff] %v1377_v7  ;;  %832 = vst [vmem:[%s1212_s14 + $0x28] sm:$0xff] %v1385_v12  ;;  %v717_v32 = vadd.f32 %v1357_v9, %v716_v31  ;;  %v788_v40 = vadd.f32 %v757_v35, %v756_v34  ;;  %v761_v45 = vmul.f32 %v1385_v12, %v1385_v12 }
 0x11a   : > { %833 = vst [vmem:[%s1212_s14 + $0x30] sm:$0xff] %v1373_v4  ;;  %834 = vst [vmem:[%s1212_s14 + $0x38] sm:$0xff] %v1381_v10  ;;  %v762_v48 = vmul.f32 %v1373_v4, %v1373_v4  ;;  %v763_v51 = vmul.f32 %v1381_v10, %v1381_v10  ;;  %v764_v54 = vmul.f32 %v1393_v16, %v1393_v16 }
 0x11b   : > { %835 = vst [vmem:[%s1212_s14 + $0x40] sm:$0xff] %v1393_v16  ;;  %836 = vst [vmem:[%s1212_s14 + $0x48] sm:$0xff] %v1401_v20  ;;  %v718_v33 = vadd.f32 %v1365_v0, %v717_v32  ;;  %v789_v43 = vadd.f32 %v788_v40, %v758_v37  ;;  %v765_v56 = vmul.f32 %v1401_v20, %v1401_v20 }
 0x11c   : > { %837 = vst [vmem:[%s1212_s14 + $0x50] sm:$0xff] %v1389_v14  ;;  %838 = vst [vmem:[%s1212_s14 + $0x58] sm:$0xff] %v1397_v18  ;;  %v766_v59 = vmul.f32 %v1389_v14, %v1389_v14  ;;  %v767_v62 = vmul.f32 %v1397_v18, %v1397_v18  ;;  %v771_v31 = vmul.f32 %v1413_v26, %v1413_v26 }
 0x11d   : > { %839 = vst [vmem:[%s1212_s14 + $0x60] sm:$0xff] %v1409_v24  ;;  %840 = vst [vmem:[%s1212_s14 + $0x68] sm:$0xff] %v1417_v28  ;;  %v719_v36 = vadd.f32 %v718_v33, %v1377_v7  ;;  %v790_v46 = vadd.f32 %v789_v43, %v759_v39  ;;  %v772_v33 = vmul.f32 %v1363_v63, %v1363_v63 }
 0x11e   : > { %841 = vst [vmem:[%s1212_s14 + $0x70] sm:$0xff] %v1405_v22  ;;  %842 = vst [vmem:[%s1212_s14 + $0x78] sm:$0xff] %v1413_v26  ;;  %v773_v35 = vmul.f32 %v1371_v3, %v1371_v3  ;;  %v774_v37 = vmul.f32 %v1359_v61, %v1359_v61  ;;  %v775_v39 = vmul.f32 %v1367_v1, %v1367_v1 }
 0x11f   : > { %843 = vst [vmem:[%s1212_s14 + $0x80] sm:$0xff] %v1363_v63  ;;  %844 = vst [vmem:[%s1212_s14 + $0x88] sm:$0xff] %v1371_v3  ;;  %v720_v38 = vadd.f32 %v719_v36, %v1385_v12  ;;  %v791_v49 = vadd.f32 %v790_v46, %v760_v42  ;;  %v769_v12 = vmul.f32 %v1417_v28, %v1417_v28 }
 0x120   : > { %845 = vst [vmem:[%s1212_s14 + $0x90] sm:$0xff] %v1359_v61  ;;  %846 = vst [vmem:[%s1212_s14 + $0x98] sm:$0xff] %v1367_v1  ;;  %v777_v43 = vmul.f32 %v1387_v13, %v1387_v13 }
 0x121   : > { %847 = vst [vmem:[%s1212_s14 + $0xa0] sm:$0xff] %v1379_v8  ;;  %848 = vst [vmem:[%s1212_s14 + $0xa8] sm:$0xff] %v1387_v13  ;;  %v721_v41 = vadd.f32 %v1373_v4, %v720_v38  ;;  %v792_v52 = vadd.f32 %v791_v49, %v761_v45  ;;  %v768_v4 = vmul.f32 %v1409_v24, %v1409_v24 }
 0x122   : > { %849 = vst [vmem:[%s1212_s14 + $0xb0] sm:$0xff] %v1375_v5  ;;  %850 = vst [vmem:[%s1212_s14 + $0xb8] sm:$0xff] %v1383_v11  ;;  %v778_v45 = vmul.f32 %v1375_v5, %v1375_v5  ;;  %v780_v49 = vmul.f32 %v1395_v17, %v1395_v17 }
 0x123   : > { %851 = vst [vmem:[%s1212_s14 + $0xc0] sm:$0xff] %v1395_v17  ;;  %852 = vst [vmem:[%s1212_s14 + $0xc8] sm:$0xff] %v1403_v21  ;;  %v722_v44 = vadd.f32 %v1381_v10, %v721_v41  ;;  %v793_v55 = vadd.f32 %v792_v52, %v762_v48  ;;  %v776_v41 = vmul.f32 %v1379_v8, %v1379_v8 }
 0x124   : > { %853 = vst [vmem:[%s1212_s14 + $0xd0] sm:$0xff] %v1391_v15  ;;  %854 = vst [vmem:[%s1212_s14 + $0xd8] sm:$0xff] %v1399_v19 }
 0x125   : > { %855 = vst [vmem:[%s1212_s14 + $0xe0] sm:$0xff] %v1411_v25  ;;  %856 = vst [vmem:[%s1212_s14 + $0xe8] sm:$0xff] %v1419_v29  ;;  %v723_v47 = vadd.f32 %v722_v44, %v1393_v16  ;;  %v794_v57 = vadd.f32 %v793_v55, %v763_v51  ;;  %v781_v51 = vmul.f32 %v1403_v21, %v1403_v21 }
 0x126   : > { %857 = vst [vmem:[%s1212_s14 + $0xf0] sm:$0xff] %v1407_v23  ;;  %858 = vst [vmem:[%s1212_s14 + $0xf8] sm:$0xff] %v1415_v27  ;;  %v783_v55 = vmul.f32 %v1399_v19, %v1399_v19 }
 0x127   : > { %v724_v50 = vadd.f32 %v723_v47, %v1401_v20  ;;  %v795_v60 = vadd.f32 %v794_v57, %v764_v54  ;;  %v770_v20 = vmul.f32 %v1405_v22, %v1405_v22  ;;  %v779_v47 = vmul.f32 %v1383_v11, %v1383_v11 }
 0x129   : > { %v725_v53 = vadd.f32 %v1389_v14, %v724_v50  ;;  %v796_v0 = vadd.f32 %v795_v60, %v765_v56  ;;  %v784_v56 = vmul.f32 %v1411_v25, %v1411_v25  ;;  %v786_v60 = vmul.f32 %v1407_v23, %v1407_v23 }
 0x12b   : > { %v726_v6 = vadd.f32 %v1397_v18, %v725_v53  ;;  %v797_v7 = vadd.f32 %v796_v0, %v766_v59  ;;  %v782_v53 = vmul.f32 %v1391_v15, %v1391_v15 }
 0x12d   : > { %v727_v58 = vadd.f32 %v726_v6, %v1409_v24  ;;  %v798_v16 = vadd.f32 %v797_v7, %v767_v62 }
 0x12f   : > { %v728_v9 = vadd.f32 %v727_v58, %v1417_v28  ;;  %v799_v30 = vadd.f32 %v798_v16, %v768_v4  ;;  %v785_v58 = vmul.f32 %v1419_v29, %v1419_v29 }
 0x131   : > { %v729_v2 = vadd.f32 %v1405_v22, %v728_v9  ;;  %v800_v32 = vadd.f32 %v799_v30, %v769_v12 }
 0x133   : > { %v730_v10 = vadd.f32 %v1413_v26, %v729_v2  ;;  %v801_v34 = vadd.f32 %v800_v32, %v770_v20 }
 0x135   : > { %v731_v14 = vadd.f32 %v730_v10, %v1363_v63  ;;  %v802_v36 = vadd.f32 %v801_v34, %v771_v31 }
 0x137   : > { %v732_v18 = vadd.f32 %v731_v14, %v1371_v3  ;;  %v803_v38 = vadd.f32 %v802_v36, %v772_v33 }
 0x139   : > { %v733_v24 = vadd.f32 %v1359_v61, %v732_v18  ;;  %v804_v40 = vadd.f32 %v803_v38, %v773_v35  ;;  %v755_v18 = vld [vmem:[%s1616_s6] sm:$0x1] }
 0x13b   : > { %v734_v28 = vadd.f32 %v1367_v1, %v733_v24  ;;  %v805_v42 = vadd.f32 %v804_v40, %v774_v37 }
 0x13d   : > { %v735_v22 = vadd.f32 %v734_v28, %v1379_v8  ;;  %v806_v44 = vadd.f32 %v805_v42, %v775_v39 }
 0x13f   : > { %v736_v26 = vadd.f32 %v735_v22, %v1387_v13  ;;  %v807_v46 = vadd.f32 %v806_v44, %v776_v41 }
 0x141   : > { %v737_v63 = vadd.f32 %v1375_v5, %v736_v26  ;;  %v808_v48 = vadd.f32 %v807_v46, %v777_v43 }
 0x143   : > { %v738_v3 = vadd.f32 %v1383_v11, %v737_v63  ;;  %v809_v50 = vadd.f32 %v808_v48, %v778_v45 }
 0x145   : > { %v739_v61 = vadd.f32 %v738_v3, %v1395_v17  ;;  %v810_v52 = vadd.f32 %v809_v50, %v779_v47 }
 0x147   : > { %v740_v1 = vadd.f32 %v739_v61, %v1403_v21  ;;  %v811_v54 = vadd.f32 %v810_v52, %v780_v49 }
 0x149   : > { %v741_v8 = vadd.f32 %v1391_v15, %v740_v1  ;;  %v812_v6 = vadd.f32 %v811_v54, %v781_v51 }
 0x14b   : > { %v742_v13 = vadd.f32 %v1399_v19, %v741_v8  ;;  %v813_v57 = vadd.f32 %v812_v6, %v782_v53  ;;  %v787_v19 = vmul.f32 %v1415_v27, %v1415_v27 }
 0x14d   : > { %v743_v5 = vadd.f32 %v742_v13, %v1411_v25  ;;  %v814_v59 = vadd.f32 %v813_v57, %v783_v55 }
 0x14f   : > { %v744_v11 = vadd.f32 %v743_v5, %v1419_v29  ;;  %v815_v9 = vadd.f32 %v814_v59, %v784_v56  ;;  %v715_v29 = vld [vmem:[%s1615_s5] sm:$0x1] }
 0x151   : > { %v745_v17 = vadd.f32 %v1407_v23, %v744_v11  ;;  %v816_v0 = vadd.f32 %v815_v9, %v785_v58 }
 0x153   : > { %v746_v21 = vadd.f32 %v1415_v27, %v745_v17  ;;  %v817_v4 = vadd.f32 %v816_v0, %v786_v60 }
 0x155   : > { %v747_v15 = vrot.slane %v746_v21, 4  ;;  %v818_v7 = vadd.f32 %v817_v4, %v787_v19 }
 0x157   : > { %v748_v62 = vadd.f32 %v747_v15, %v746_v21  ;;  %v819_v12 = vrot.slane %v818_v7, 4 }
 0x159   : > { %v749_v2 = vrot.slane %v748_v62, 2  ;;  %v820_v14 = vadd.f32 %v819_v12, %v818_v7 }
 0x15b   : > { %v750_v25 = vadd.f32 %v749_v2, %v748_v62  ;;  %v821_v23 = vrot.slane %v820_v14, 2 }
 0x15d   : > { %v751_v10 = vrot.slane %v750_v25, 1  ;;  %v822_v27 = vadd.f32 %v821_v23, %v820_v14 }
 0x15f   : > { %v752_v16 = vadd.f32 %v751_v10, %v750_v25  ;;  %v823_v30 = vrot.slane %v822_v27, 1 }
 0x161   : > { %v753_v20 = vadd.f32 %v752_v16, %v715_v29  ;;  %v824_v31 = vadd.f32 %v823_v30, %v822_v27 }
 0x163   : > { %754 = vst [vmem:[%s1615_s5] sm:$0x1] %v753_v20  ;;  %v825_v32 = vadd.f32 %v824_v31, %v755_v18 }
 0x165   : > { %826 = vst [vmem:[%s1616_s6] sm:$0x1] %v825_v32 }
 0x166 PF: > { %s17_s23 = sadd.s32 1, %s1135_s23   ;;  %s1617_s21 = smov %s1131_s22 }
 0x167   : > { %p14_p6 = scmp.ge.s32.totalorder %s17_s23, 4   ;;  %s1618_s22 = smov %s1620_s24 }
 0x169   :  { %16 = sbr.rel (!%p14_p6) target bundleno = 2 (0x2), region = 86 }

// kernel: mbconv2_forward.4
= control target key start
LH: loop header
LB: loop body
LE: loop exit
PB: predicated region body
PF: predicated region fallthrough
CT: control target
= control target key end

     0   :  { %s965_s15 = smov 0   ;;  %s967_s16 = smov 0   ;;  %s1307_s0 = inlined_call_operand.vmem [shape: f32[2,16,16,128], index: 0, kind: input, shape index: {}]   ;;  %s1308_s1 = inlined_call_operand.vmem [shape: bf16[128,128], index: 1, kind: input, shape index: {}]   ;;  %s1309_s2 = inlined_call_operand.vmem [shape: f32[2,16,16,128], index: 2, kind: output, shape index: {0}]   ;;  %s1310_s3 = inlined_call_operand.vmem [shape: f32[1,128], index: 3, kind: output, shape index: {1}]   ;;  %s1311_s4 = inlined_call_operand.vmem [shape: f32[1,128], index: 4, kind: output, shape index: {2}]  }
   0x1   :  { %s969_s17 = smov 0  }
   0x2 LB: > { %s27_s18 = sadd.s32 1, %s933_s16  ;;  %p775_p0 = scmp.ge.s32.totalorder %s937_s17, 1  ;;  %s937_s17 = sphi %s969_s17, %s15_s17   ;;  %s933_s16 = sphi %s967_s16, %s1313_s16   ;;  %s929_s15 = sphi %s965_s15, %s1312_s15  }
   0x3   : > { %p29_p1 = scmp.ge.s32.totalorder %s27_s18, 2  ;;  %p179_p2 = scmp.lt.s32.totalorder %s937_s17, 3 }
   0x5   : > { %s1315_s18 = smov (%p29_p1, %s27_s18), 0  ;;  %p180_p3 = pnand %p775_p0, %p179_p2 }
   0x6   : > { %v907_v0 = vld [vmem:[%s1308_s1] sm:$0xff] (!%p180_p3)   ;;  %p216_p4 = scmp.lt.s32.totalorder (!%p180_p3), %s929_s15, 1  ;;  %v908_v1 = vld [vmem:[%s1308_s1 + $0x8] sm:$0xff] (!%p180_p3)   ;;  %v909_v2 = vld [vmem:[%s1308_s1 + $0x10] sm:$0xff] (!%p180_p3)   ;;  %p511_p5 = scmp.eq.s32.totalorder (!%p180_p3), %s929_s15, 0 }
   0x7   : > { %183 = sbr.rel (%p180_p3) target bundleno = 357 (0x165), region = 28  ;;  %818 = vmatprep.subr.bf16.mxu0 (!%p180_p3), %v907_v0  ;;  %866 = vmatprep.subr.bf16.mxu1 (!%p180_p3), %v907_v0  ;;  %v910_v3 = vld [vmem:[%s1308_s1 + $0x18] sm:$0xff] (!%p180_p3)   ;;  %v911_v10 = vld [vmem:[%s1308_s1 + $0x20] sm:$0xff] (!%p180_p3)   ;;  %v912_v11 = vld [vmem:[%s1308_s1 + $0x28] sm:$0xff] (!%p180_p3)  }
   0x8   : > { %819 = vmatpush3.bf16.msra.mxu0 (!%p180_p3), %v907_v0  ;;  %874 = vmatpush3.bf16.msra.mxu1 (!%p180_p3), %v907_v0  ;;  %v913_v12 = vld [vmem:[%s1308_s1 + $0x30] sm:$0xff] (!%p180_p3)   ;;  %v914_v13 = vld [vmem:[%s1308_s1 + $0x38] sm:$0xff] (!%p180_p3)  }
   0x9   : > { %820 = vmatprep.subr.bf16.mxu0 (!%p180_p3), %v908_v1  ;;  %867 = vmatprep.subr.bf16.mxu1 (!%p180_p3), %v908_v1 }
   0xc   : > { %821 = vmatpush3.bf16.msra.mxu0 (!%p180_p3), %v908_v1  ;;  %875 = vmatpush3.bf16.msra.mxu1 (!%p180_p3), %v908_v1 }
   0xd   : > { %822 = vmatprep.subr.bf16.mxu0 (!%p180_p3), %v909_v2  ;;  %868 = vmatprep.subr.bf16.mxu1 (!%p180_p3), %v909_v2 }
   0xe   : > { %s217_s23 = scalar_select %p216_p4, %s929_s15, 1 }
  0x10   : > { %s791_s26 = sshll.u32 %s217_s23, 8  ;;  %823 = vmatpush3.bf16.msra.mxu0 %v909_v2  ;;  %876 = vmatpush3.bf16.msra.mxu1 %v909_v2 }
  0x11   : > { %s999_s29 = scalar_lea.vmem %s1307_s0, %s791_s26  ;;  %s1004_s6 = scalar_lea.vmem %s1309_s2, %s791_s26  ;;  %824 = vmatprep.subr.bf16.mxu0 %v910_v3  ;;  %869 = vmatprep.subr.bf16.mxu1 %v910_v3 }
  0x12   : > { %v238_v4 = vld [vmem:[%s999_s29] sm:$0xff]  ;;  %v239_v5 = vld [vmem:[%s999_s29 + $0x8] sm:$0xff]  ;;  %v240_v14 = vld [vmem:[%s999_s29 + $0x10] sm:$0xff] }
  0x13   : > { %v254_v6 = vld [vmem:[%s999_s29 + $0x80] sm:$0xff]  ;;  %v270_v7 = vpack.c.bf16 %v239_v5, %v238_v4  ;;  %v255_v8 = vld [vmem:[%s999_s29 + $0x88] sm:$0xff]  ;;  %v241_v15 = vld [vmem:[%s999_s29 + $0x18] sm:$0xff] }
  0x14   : > { %v278_v9 = vpack.c.bf16 %v255_v8, %v254_v6  ;;  %825 = vmatpush3.bf16.msra.mxu0 %v910_v3  ;;  %877 = vmatpush3.bf16.msra.mxu1 %v910_v3  ;;  %v256_v16 = vld [vmem:[%s999_s29 + $0x90] sm:$0xff]  ;;  %v257_v17 = vld [vmem:[%s999_s29 + $0x98] sm:$0xff]  ;;  %v242_v18 = vld [vmem:[%s999_s29 + $0x20] sm:$0xff]  ;;  %v271_v22 = vpack.c.bf16 %v241_v15, %v240_v14 }
  0x15   : > { %834 = vmatprep.mubr.bf16.mxu0 %v270_v7  ;;  %826 = vmatprep.subr.bf16.mxu0 %v911_v10  ;;  %v243_v19 = vld [vmem:[%s999_s29 + $0x28] sm:$0xff]  ;;  %v258_v20 = vld [vmem:[%s999_s29 + $0xa0] sm:$0xff]  ;;  %v279_v23 = vpack.c.bf16 %v257_v17, %v256_v16  ;;  %v244_v26 = vld [vmem:[%s999_s29 + $0x30] sm:$0xff] }
  0x16   : > { %850 = vmatprep.mubr.bf16.mxu1 %v278_v9  ;;  %870 = vmatprep.subr.bf16.mxu1 %v911_v10  ;;  %v259_v21 = vld [vmem:[%s999_s29 + $0xa8] sm:$0xff]  ;;  %v272_v24 = vpack.c.bf16 %v243_v19, %v242_v18  ;;  %v245_v27 = vld [vmem:[%s999_s29 + $0x38] sm:$0xff]  ;;  %v260_v28 = vld [vmem:[%s999_s29 + $0xb0] sm:$0xff] }
  0x17   : > { %v280_v25 = vpack.c.bf16 %v259_v21, %v258_v20  ;;  %v261_v29 = vld [vmem:[%s999_s29 + $0xb8] sm:$0xff]  ;;  %v246_v30 = vld [vmem:[%s999_s29 + $0x40] sm:$0xff]  ;;  %v247_v31 = vld [vmem:[%s999_s29 + $0x48] sm:$0xff]  ;;  %v273_v34 = vpack.c.bf16 %v245_v27, %v244_v26 }
  0x18   : > { %827 = vmatpush3.bf16.msra.mxu0 %v911_v10  ;;  %878 = vmatpush3.bf16.msra.mxu1 %v911_v10  ;;  %v262_v32 = vld [vmem:[%s999_s29 + $0xc0] sm:$0xff]  ;;  %v263_v33 = vld [vmem:[%s999_s29 + $0xc8] sm:$0xff]  ;;  %v281_v35 = vpack.c.bf16 %v261_v29, %v260_v28  ;;  %v274_v36 = vpack.c.bf16 %v247_v31, %v246_v30  ;;  %v248_v38 = vld [vmem:[%s999_s29 + $0x50] sm:$0xff] }
  0x19   : > { %828 = vmatprep.subr.bf16.mxu0 %v912_v11  ;;  %871 = vmatprep.subr.bf16.mxu1 %v912_v11  ;;  %v282_v37 = vpack.c.bf16 %v263_v33, %v262_v32  ;;  %v249_v39 = vld [vmem:[%s999_s29 + $0x58] sm:$0xff]  ;;  %v264_v40 = vld [vmem:[%s999_s29 + $0xd0] sm:$0xff]  ;;  %v250_v42 = vld [vmem:[%s999_s29 + $0x60] sm:$0xff] }
  0x1a   : > { %v265_v41 = vld [vmem:[%s999_s29 + $0xd8] sm:$0xff]  ;;  %v251_v43 = vld [vmem:[%s999_s29 + $0x68] sm:$0xff]  ;;  %v266_v44 = vld [vmem:[%s999_s29 + $0xe0] sm:$0xff]  ;;  %v275_v46 = vpack.c.bf16 %v249_v39, %v248_v38 }
  0x1b   : > { %v267_v45 = vld [vmem:[%s999_s29 + $0xe8] sm:$0xff]  ;;  %v283_v47 = vpack.c.bf16 %v265_v41, %v264_v40  ;;  %v276_v48 = vpack.c.bf16 %v251_v43, %v250_v42  ;;  %v252_v50 = vld [vmem:[%s999_s29 + $0x70] sm:$0xff]  ;;  %v253_v51 = vld [vmem:[%s999_s29 + $0x78] sm:$0xff] }
  0x1c   : > { %829 = vmatpush3.bf16.msra.mxu0 %v912_v11  ;;  %879 = vmatpush3.bf16.msra.mxu1 %v912_v11  ;;  %v284_v49 = vpack.c.bf16 %v267_v45, %v266_v44  ;;  %v268_v52 = vld [vmem:[%s999_s29 + $0xf0] sm:$0xff]  ;;  %v269_v53 = vld [vmem:[%s999_s29 + $0xf8] sm:$0xff]  ;;  %v277_v54 = vpack.c.bf16 %v253_v51, %v252_v50 }
  0x1d   : > { %830 = vmatprep.subr.bf16.mxu0 %v913_v12  ;;  %872 = vmatprep.subr.bf16.mxu1 %v913_v12  ;;  %v285_v55 = vpack.c.bf16 %v269_v53, %v268_v52 }
  0x20   : > { %831 = vmatpush3.bf16.msra.mxu0 %v913_v12  ;;  %880 = vmatpush3.bf16.msra.mxu1 %v913_v12 }
  0x21   : > { %832 = vmatprep.subr.bf16.mxu0 %v914_v13  ;;  %873 = vmatprep.subr.bf16.mxu1 %v914_v13 }
  0x24   : > { %833 = vmatpush3.bf16.msra.mxu0 %v914_v13  ;;  %881 = vmatpush3.bf16.msra.mxu1 %v914_v13 }
  0x27   : > { %835 = vmatmul.mubr.bf16.vlgmr.msra.gmra.mrb[0].mxu0 %v271_v22  ;;  %851 = vmatmul.mubr.bf16.vlgmr.msra.gmra.mrb[0].mxu1 %v279_v23 }
  0x28   : > { %838 = vmatprep.mubr.bf16.mxu0 %v272_v24  ;;  %854 = vmatprep.mubr.bf16.mxu1 %v280_v25  ;;  %v939_v24 = vmov (%p511_p5), 0.0  }
  0x29   : > { %517 = vst [vmem:[%s1310_s3] sm:$0x1] (%p511_p5), %v939_v24  ;;  %518 = vst [vmem:[%s1311_s4] sm:$0x1] (%p511_p5), %v939_v24 }
  0x2f   : > { %839 = vmatmul.mubr.bf16.gmra.mrb[4].mxu0 %v273_v34  ;;  %855 = vmatmul.mubr.bf16.gmra.mrb[4].mxu1 %v281_v35 }
  0x30   : > { %842 = vmatprep.mubr.bf16.mxu0 %v274_v36  ;;  %858 = vmatprep.mubr.bf16.mxu1 %v282_v37 }
  0x37   : > { %843 = vmatmul.mubr.bf16.gmra.mrb[8].mxu0 %v275_v46  ;;  %859 = vmatmul.mubr.bf16.gmra.mrb[8].mxu1 %v283_v47 }
  0x38   : > { %846 = vmatprep.mubr.bf16.mxu0 %v276_v48  ;;  %862 = vmatprep.mubr.bf16.mxu1 %v284_v49 }
  0x3f   : > { %847 = vmatmul.mubr.bf16.gmra.mrb[12].mxu0 %v277_v54  ;;  %863 = vmatmul.mubr.bf16.gmra.mrb[12].mxu1 %v285_v55 }
  0xfa   : > { %v1054_v56 = vpop.f32.mrb[0].mxu0  ;;  %v1056_v57 = vpop.f32.mrb[0].mxu1 }
  0xfb   : > { %v1058_v58 = vpop.f32.mrb[1].mxu0  ;;  %v1060_v59 = vpop.f32.mrb[1].mxu1 }
  0xfc   : > { %v1062_v60 = vpop.f32.mrb[2].mxu0  ;;  %v1064_v61 = vpop.f32.mrb[2].mxu1 }
  0xfd   : > { %v1066_v62 = vpop.f32.mrb[3].mxu0  ;;  %v1068_v63 = vpop.f32.mrb[3].mxu1 }
 0x102   : > { %v1070_v0 = vpop.f32.mrb[4].mxu0  ;;  %v1072_v1 = vpop.f32.mrb[4].mxu1 }
 0x103   : > { %v1074_v2 = vpop.f32.mrb[5].mxu0  ;;  %v1076_v3 = vpop.f32.mrb[5].mxu1 }
 0x104   : > { %v1078_v4 = vpop.f32.mrb[6].mxu0  ;;  %v1080_v5 = vpop.f32.mrb[6].mxu1 }
 0x105   : > { %v1082_v6 = vpop.f32.mrb[7].mxu0  ;;  %v1084_v7 = vpop.f32.mrb[7].mxu1 }
 0x10a   : > { %v1086_v8 = vpop.f32.mrb[8].mxu0  ;;  %v1088_v9 = vpop.f32.mrb[8].mxu1 }
 0x10b   : > { %v1090_v10 = vpop.f32.mrb[9].mxu0  ;;  %v1092_v11 = vpop.f32.mrb[9].mxu1 }
 0x10c   : > { %v1094_v12 = vpop.f32.mrb[10].mxu0  ;;  %v1096_v13 = vpop.f32.mrb[10].mxu1 }
 0x10d   : > { %v1098_v14 = vpop.f32.mrb[11].mxu0  ;;  %v1100_v15 = vpop.f32.mrb[11].mxu1 }
 0x10f   : > { %516 = sbr.rel (!%p511_p5) target bundleno = 278 (0x116), region = 32 }
 0x112   : > { %v1102_v16 = vpop.f32.mrb[12].mxu0  ;;  %v1104_v17 = vpop.f32.mrb[12].mxu1 }
 0x113   : > { %v1106_v18 = vpop.f32.mrb[13].mxu0  ;;  %v1108_v19 = vpop.f32.mrb[13].mxu1 }
 0x114   : > { %v1110_v20 = vpop.f32.mrb[14].mxu0  ;;  %v1112_v21 = vpop.f32.mrb[14].mxu1 }
 0x115   : > { %v1114_v22 = vpop.f32.mrb[15].mxu0  ;;  %v1116_v23 = vpop.f32.mrb[15].mxu1 }
 0x116 PF: > { %v520_v25 = vadd.f32 %v1066_v62, %v1058_v58  ;;  %631 = vst [vmem:[%s1004_s6] sm:$0xff] %v1058_v58  ;;  %632 = vst [vmem:[%s1004_s6 + $0x8] sm:$0xff] %v1066_v62  ;;  %v560_v28 = vmul.f32 %v1058_v58, %v1058_v58  ;;  %v561_v29 = vmul.f32 %v1066_v62, %v1066_v62 }
 0x117   : > { %633 = vst [vmem:[%s1004_s6 + $0x10] sm:$0xff] %v1054_v56  ;;  %634 = vst [vmem:[%s1004_s6 + $0x18] sm:$0xff] %v1062_v60  ;;  %v562_v31 = vmul.f32 %v1054_v56, %v1054_v56  ;;  %v563_v33 = vmul.f32 %v1062_v60, %v1062_v60  ;;  %v564_v36 = vmul.f32 %v1074_v2, %v1074_v2 }
 0x118   : > { %635 = vst [vmem:[%s1004_s6 + $0x20] sm:$0xff] %v1074_v2  ;;  %636 = vst [vmem:[%s1004_s6 + $0x28] sm:$0xff] %v1082_v6  ;;  %v521_v26 = vadd.f32 %v1054_v56, %v520_v25  ;;  %v592_v34 = vadd.f32 %v561_v29, %v560_v28  ;;  %v565_v39 = vmul.f32 %v1082_v6, %v1082_v6 }
 0x119   : > { %637 = vst [vmem:[%s1004_s6 + $0x30] sm:$0xff] %v1070_v0  ;;  %638 = vst [vmem:[%s1004_s6 + $0x38] sm:$0xff] %v1078_v4  ;;  %v566_v42 = vmul.f32 %v1070_v0, %v1070_v0  ;;  %v567_v45 = vmul.f32 %v1078_v4, %v1078_v4  ;;  %v568_v48 = vmul.f32 %v1090_v10, %v1090_v10 }
 0x11a   : > { %639 = vst [vmem:[%s1004_s6 + $0x40] sm:$0xff] %v1090_v10  ;;  %640 = vst [vmem:[%s1004_s6 + $0x48] sm:$0xff] %v1098_v14  ;;  %v522_v27 = vadd.f32 %v1062_v60, %v521_v26  ;;  %v593_v37 = vadd.f32 %v592_v34, %v562_v31  ;;  %v569_v51 = vmul.f32 %v1098_v14, %v1098_v14 }
 0x11b   : > { %641 = vst [vmem:[%s1004_s6 + $0x50] sm:$0xff] %v1086_v8  ;;  %642 = vst [vmem:[%s1004_s6 + $0x58] sm:$0xff] %v1094_v12  ;;  %v570_v54 = vmul.f32 %v1086_v8, %v1086_v8  ;;  %v571_v58 = vmul.f32 %v1094_v12, %v1094_v12  ;;  %v575_v25 = vmul.f32 %v1110_v20, %v1110_v20 }
 0x11c   : > { %643 = vst [vmem:[%s1004_s6 + $0x60] sm:$0xff] %v1106_v18  ;;  %644 = vst [vmem:[%s1004_s6 + $0x68] sm:$0xff] %v1114_v22  ;;  %v523_v30 = vadd.f32 %v522_v27, %v1074_v2  ;;  %v594_v40 = vadd.f32 %v593_v37, %v563_v33  ;;  %v576_v27 = vmul.f32 %v1060_v59, %v1060_v59 }
 0x11d   : > { %645 = vst [vmem:[%s1004_s6 + $0x70] sm:$0xff] %v1102_v16  ;;  %646 = vst [vmem:[%s1004_s6 + $0x78] sm:$0xff] %v1110_v20  ;;  %v577_v29 = vmul.f32 %v1068_v63, %v1068_v63  ;;  %v578_v31 = vmul.f32 %v1056_v57, %v1056_v57  ;;  %v579_v33 = vmul.f32 %v1064_v61, %v1064_v61 }
 0x11e   : > { %647 = vst [vmem:[%s1004_s6 + $0x80] sm:$0xff] %v1060_v59  ;;  %648 = vst [vmem:[%s1004_s6 + $0x88] sm:$0xff] %v1068_v63  ;;  %v524_v32 = vadd.f32 %v523_v30, %v1082_v6  ;;  %v595_v43 = vadd.f32 %v594_v40, %v564_v36  ;;  %v573_v6 = vmul.f32 %v1114_v22, %v1114_v22 }
 0x11f   : > { %649 = vst [vmem:[%s1004_s6 + $0x90] sm:$0xff] %v1056_v57  ;;  %650 = vst [vmem:[%s1004_s6 + $0x98] sm:$0xff] %v1064_v61  ;;  %v581_v37 = vmul.f32 %v1084_v7, %v1084_v7 }
 0x120   : > { %651 = vst [vmem:[%s1004_s6 + $0xa0] sm:$0xff] %v1076_v3  ;;  %652 = vst [vmem:[%s1004_s6 + $0xa8] sm:$0xff] %v1084_v7  ;;  %v525_v35 = vadd.f32 %v1070_v0, %v524_v32  ;;  %v596_v46 = vadd.f32 %v595_v43, %v565_v39  ;;  %v572_v0 = vmul.f32 %v1106_v18, %v1106_v18 }
 0x121   : > { %653 = vst [vmem:[%s1004_s6 + $0xb0] sm:$0xff] %v1072_v1  ;;  %654 = vst [vmem:[%s1004_s6 + $0xb8] sm:$0xff] %v1080_v5  ;;  %v582_v39 = vmul.f32 %v1072_v1, %v1072_v1  ;;  %v584_v43 = vmul.f32 %v1092_v11, %v1092_v11 }
 0x122   : > { %655 = vst [vmem:[%s1004_s6 + $0xc0] sm:$0xff] %v1092_v11  ;;  %656 = vst [vmem:[%s1004_s6 + $0xc8] sm:$0xff] %v1100_v15  ;;  %v526_v38 = vadd.f32 %v1078_v4, %v525_v35  ;;  %v597_v49 = vadd.f32 %v596_v46, %v566_v42  ;;  %v580_v35 = vmul.f32 %v1076_v3, %v1076_v3 }
 0x123   : > { %657 = vst [vmem:[%s1004_s6 + $0xd0] sm:$0xff] %v1088_v9  ;;  %658 = vst [vmem:[%s1004_s6 + $0xd8] sm:$0xff] %v1096_v13 }
 0x124   : > { %659 = vst [vmem:[%s1004_s6 + $0xe0] sm:$0xff] %v1108_v19  ;;  %660 = vst [vmem:[%s1004_s6 + $0xe8] sm:$0xff] %v1116_v23  ;;  %v527_v41 = vadd.f32 %v526_v38, %v1090_v10  ;;  %v598_v52 = vadd.f32 %v597_v49, %v567_v45  ;;  %v585_v45 = vmul.f32 %v1100_v15, %v1100_v15 }
 0x125   : > { %661 = vst [vmem:[%s1004_s6 + $0xf0] sm:$0xff] %v1104_v17  ;;  %662 = vst [vmem:[%s1004_s6 + $0xf8] sm:$0xff] %v1112_v21  ;;  %v587_v49 = vmul.f32 %v1096_v13, %v1096_v13 }
 0x126   : > { %v528_v44 = vadd.f32 %v527_v41, %v1098_v14  ;;  %v599_v55 = vadd.f32 %v598_v52, %v568_v48  ;;  %v574_v14 = vmul.f32 %v1102_v16, %v1102_v16  ;;  %v583_v41 = vmul.f32 %v1080_v5, %v1080_v5 }
 0x128   : > { %v529_v47 = vadd.f32 %v1086_v8, %v528_v44  ;;  %v600_v60 = vadd.f32 %v599_v55, %v569_v51  ;;  %v588_v51 = vmul.f32 %v1108_v19, %v1108_v19  ;;  %v590_v55 = vmul.f32 %v1104_v17, %v1104_v17 }
 0x12a   : > { %v530_v50 = vadd.f32 %v1094_v12, %v529_v47  ;;  %v601_v2 = vadd.f32 %v600_v60, %v570_v54  ;;  %v586_v47 = vmul.f32 %v1088_v9, %v1088_v9 }
 0x12c   : > { %v531_v53 = vadd.f32 %v530_v50, %v1106_v18  ;;  %v602_v10 = vadd.f32 %v601_v2, %v571_v58 }
 0x12e   : > { %v532_v56 = vadd.f32 %v531_v53, %v1114_v22  ;;  %v603_v24 = vadd.f32 %v602_v10, %v572_v0  ;;  %v589_v53 = vmul.f32 %v1116_v23, %v1116_v23 }
 0x130   : > { %v533_v62 = vadd.f32 %v1102_v16, %v532_v56  ;;  %v604_v26 = vadd.f32 %v603_v24, %v573_v6 }
 0x132   : > { %v534_v4 = vadd.f32 %v1110_v20, %v533_v62  ;;  %v605_v28 = vadd.f32 %v604_v26, %v574_v14 }
 0x134   : > { %v535_v8 = vadd.f32 %v534_v4, %v1060_v59  ;;  %v606_v30 = vadd.f32 %v605_v28, %v575_v25 }
 0x136   : > { %v536_v12 = vadd.f32 %v535_v8, %v1068_v63  ;;  %v607_v32 = vadd.f32 %v606_v30, %v576_v27 }
 0x138   : > { %v537_v18 = vadd.f32 %v1056_v57, %v536_v12  ;;  %v608_v34 = vadd.f32 %v607_v32, %v577_v29  ;;  %v559_v12 = vld [vmem:[%s1311_s4] sm:$0x1] }
 0x13a   : > { %v538_v22 = vadd.f32 %v1064_v61, %v537_v18  ;;  %v609_v36 = vadd.f32 %v608_v34, %v578_v31 }
 0x13c   : > { %v539_v16 = vadd.f32 %v538_v22, %v1076_v3  ;;  %v610_v38 = vadd.f32 %v609_v36, %v579_v33 }
 0x13e   : > { %v540_v20 = vadd.f32 %v539_v16, %v1084_v7  ;;  %v611_v40 = vadd.f32 %v610_v38, %v580_v35 }
 0x140   : > { %v541_v59 = vadd.f32 %v1072_v1, %v540_v20  ;;  %v612_v42 = vadd.f32 %v611_v40, %v581_v37 }
 0x142   : > { %v542_v63 = vadd.f32 %v1080_v5, %v541_v59  ;;  %v613_v44 = vadd.f32 %v612_v42, %v582_v39 }
 0x144   : > { %v543_v57 = vadd.f32 %v542_v63, %v1092_v11  ;;  %v614_v46 = vadd.f32 %v613_v44, %v583_v41 }
 0x146   : > { %v544_v61 = vadd.f32 %v543_v57, %v1100_v15  ;;  %v615_v48 = vadd.f32 %v614_v46, %v584_v43 }
 0x148   : > { %v545_v3 = vadd.f32 %v1088_v9, %v544_v61  ;;  %v616_v50 = vadd.f32 %v615_v48, %v585_v45 }
 0x14a   : > { %v546_v7 = vadd.f32 %v1096_v13, %v545_v3  ;;  %v617_v52 = vadd.f32 %v616_v50, %v586_v47  ;;  %v591_v13 = vmul.f32 %v1112_v21, %v1112_v21 }
 0x14c   : > { %v547_v1 = vadd.f32 %v546_v7, %v1108_v19  ;;  %v618_v54 = vadd.f32 %v617_v52, %v587_v49 }
 0x14e   : > { %v548_v5 = vadd.f32 %v547_v1, %v1116_v23  ;;  %v619_v56 = vadd.f32 %v618_v54, %v588_v51  ;;  %v519_v23 = vld [vmem:[%s1310_s3] sm:$0x1] }
 0x150   : > { %v549_v11 = vadd.f32 %v1104_v17, %v548_v5  ;;  %v620_v60 = vadd.f32 %v619_v56, %v589_v53 }
 0x152   : > { %v550_v15 = vadd.f32 %v1112_v21, %v549_v11  ;;  %v621_v0 = vadd.f32 %v620_v60, %v590_v55 }
 0x154   : > { %v551_v9 = vrot.slane %v550_v15, 4  ;;  %v622_v2 = vadd.f32 %v621_v0, %v591_v13 }
 0x156   : > { %v552_v58 = vadd.f32 %v551_v9, %v550_v15  ;;  %v623_v6 = vrot.slane %v622_v2, 4 }
 0x158   : > { %v553_v62 = vrot.slane %v552_v58, 2  ;;  %v624_v8 = vadd.f32 %v623_v6, %v622_v2 }
 0x15a   : > { %v554_v19 = vadd.f32 %v553_v62, %v552_v58  ;;  %v625_v17 = vrot.slane %v624_v8, 2 }
 0x15c   : > { %v555_v4 = vrot.slane %v554_v19, 1  ;;  %v626_v21 = vadd.f32 %v625_v17, %v624_v8 }
 0x15e   : > { %v556_v10 = vadd.f32 %v555_v4, %v554_v19  ;;  %v627_v24 = vrot.slane %v626_v21, 1 }
 0x160   : > { %v557_v14 = vadd.f32 %v556_v10, %v519_v23  ;;  %v628_v25 = vadd.f32 %v627_v24, %v626_v21 }
 0x162   : > { %558 = vst [vmem:[%s1310_s3] sm:$0x1] %v557_v14  ;;  %v629_v26 = vadd.f32 %v628_v25, %v559_v12 }
 0x164   : > { %630 = vst [vmem:[%s1311_s4] sm:$0x1] %v629_v26 }
 0x165 PF: > { %s15_s17 = sadd.s32 1, %s937_s17   ;;  %s1312_s15 = smov %s933_s16 }
 0x166   : > { %p12_p6 = scmp.ge.s32.totalorder %s15_s17, 4   ;;  %s1313_s16 = smov %s1315_s18 }
 0x168   :  { %14 = sbr.rel (!%p12_p6) target bundleno = 2 (0x2), region = 78 }

// kernel: mbconv2_forward.5
= control target key start
LH: loop header
LB: loop body
LE: loop exit
PB: predicated region body
PF: predicated region fallthrough
CT: control target
= control target key end

     0   :  { %s1939_s21 = smov 0   ;;  %s1941_s22 = smov 0   ;;  %s2840_s0 = inlined_call_operand.vmem [shape: f32[2,16,16,128], index: 0, kind: input, shape index: {}]   ;;  %s2841_s1 = inlined_call_operand.vmem [shape: f32[9,128], index: 1, kind: input, shape index: {}]   ;;  %s2842_s2 = inlined_call_operand.vmem [shape: f32[1,128], index: 2, kind: input, shape index: {}]   ;;  %s2843_s3 = inlined_call_operand.vmem [shape: f32[1,128], index: 3, kind: input, shape index: {}]   ;;  %s2844_s4 = inlined_call_operand.vmem [shape: f32[2,16,16,128], index: 4, kind: output, shape index: {0}]   ;;  %s2845_s5 = inlined_call_operand.vmem [shape: f32[1,128], index: 5, kind: output, shape index: {1}]   ;;  %s2846_s6 = inlined_call_operand.vmem [shape: f32[1,128], index: 6, kind: output, shape index: {2}]  }
   0x1   :  { %s1943_s23 = smov 0  }
   0x2 LB: > { %s26_s24 = sadd.s32 1, %s1896_s22  ;;  %p1833_p0 = scmp.ge.s32.totalorder %s1900_s23, 1  ;;  %s1900_s23 = sphi %s1943_s23, %s17_s23   ;;  %s1896_s22 = sphi %s1941_s22, %s2875_s22   ;;  %s1892_s21 = sphi %s1939_s21, %s2874_s21  }
   0x3   : > { %p27_p1 = scmp.ge.s32.totalorder %s26_s24, 2  ;;  %p261_p2 = scmp.lt.s32.totalorder %s1900_s23, 3 }
   0x5   : > { %s2877_s24 = smov (%p27_p1, %s26_s24), 0  ;;  %p262_p3 = pnand %p1833_p0, %p261_p2 }
   0x7   : > { %265 = sbr.rel (%p262_p3) target bundleno = 288 (0x120), region = 36 }
   0xe   : > { %v640_v0 = vlaneseq  ;;  %p313_p4 = scmp.lt.s32.totalorder %s1892_s21, 1  ;;  %v1902_v1 = vmov 0.0   ;;  %v606_v3 = vld [vmem:[%s2841_s1] sm:$0xff]  ;;  %p1841_p5 = scmp.ne.s32.totalorder %s1892_s21, 0 }
   0xf   : > { %519 = vst [vmem:[#allocation2] sm:$0xff] %v1902_v1  ;;  %520 = vst [vmem:[#allocation2 + $0x8] sm:$0xff] %v1902_v1  ;;  %v1969_v7 = vld [vmem:[%s2842_s2] ss:$0 sm:$0xff] }
  0x10   : > { %521 = vst [vmem:[#allocation2 + $0x10] sm:$0x3] %v1902_v1  ;;  %522 = vst [vmem:[#allocation2 + $0x18] sm:$0xff] %v1902_v1  ;;  %v641_v2 = vshrl.u32 %v640_v0, 7  ;;  %s314_s25 = scalar_select %p313_p4, %s1892_s21, 1 }
  0x11   : > { %523 = vst [vmem:[#allocation2 + $0x20] sm:$0xff] %v1902_v1  ;;  %524 = vst [vmem:[#allocation2 + $0x28] sm:$0x3] %v1902_v1  ;;  %v1984_v8 = vld [vmem:[%s2843_s3] ss:$0 sm:$0xff] }
  0x12   : > { %525 = vst [vmem:[#allocation2 + $0x30] sm:$0xff] %v1902_v1  ;;  %526 = vst [vmem:[#allocation2 + $0x38] sm:$0xff] %v1902_v1  ;;  %v642_v4 = vsub.s32 0, %v641_v2  ;;  %v742_v5 = vsub.s32 1, %v641_v2  ;;  %v842_v6 = vsub.s32 2, %v641_v2  ;;  %s1846_s28 = sshll.u32 %s314_s25, 8 }
  0x13   : > { %527 = vst [vmem:[#allocation2 + $0x40] sm:$0x3] %v1902_v1  ;;  %528 = vst [vmem:[#allocation2 + $0x48] sm:$0xff] %v1902_v1  ;;  %s1974_s9 = scalar_lea.vmem %s2840_s0, %s1846_s28  ;;  %s1979_s12 = scalar_lea.vmem %s2844_s4, %s1846_s28  ;;  %v1042_v12 = vsub.s32 4, %v641_v2  ;;  %v942_v22 = vsub.s32 3, %v641_v2  ;;  %v1142_v23 = vsub.s32 5, %v641_v2 }
  0x14   : > { %529 = vst [vmem:[#allocation2 + $0x50] sm:$0xff] %v1902_v1  ;;  %530 = vst [vmem:[#allocation2 + $0x58] sm:$0x3] %v1902_v1  ;;  %v1986_v9 = vrot.slane %v606_v3, %v642_v4  ;;  %v1988_v10 = vrot.slane %v606_v3, %v742_v5  ;;  %v345_v11 = vld [vmem:[%s1974_s9] sm:$0xff]  ;;  %v346_v13 = vld [vmem:[%s1974_s9 + $0x8] sm:$0xff]  ;;  %v1993_v15 = vrot.slane %v606_v3, %v842_v6  ;;  %v1243_v29 = vsub.s32 6, %v641_v2 }
  0x15   : > { %531 = vst [vmem:[#allocation2 + $0x60] sm:$0xff] %v1902_v1  ;;  %532 = vst [vmem:[#allocation2 + $0x68] sm:$0xff] %v1902_v1  ;;  %v347_v14 = vld [vmem:[%s1974_s9 + $0x10] sm:$0xff]  ;;  %v384_v16 = vmul.f32 %v1969_v7, %v345_v11  ;;  %v385_v17 = vmul.f32 %v1969_v7, %v346_v13  ;;  %v348_v30 = vld [vmem:[%s1974_s9 + $0x18] sm:$0xff]  ;;  %v2003_v31 = vrot.slane %v606_v3, %v1042_v12  ;;  %v1343_v34 = vsub.s32 7, %v641_v2 }
  0x16   : > { %533 = vst [vmem:[#allocation2 + $0x70] sm:$0x3] %v1902_v1  ;;  %534 = vst [vmem:[#allocation2 + $0x78] sm:$0xff] %v1902_v1  ;;  %v644_v18 = vmul.f32 0.0, %v1986_v9  ;;  %v708_v19 = vld [vmem:[#allocation2 + $0x1] sm:$0xff]  ;;  %v386_v24 = vmul.f32 %v1969_v7, %v347_v14  ;;  %v387_v42 = vmul.f32 %v1969_v7, %v348_v30  ;;  %v2012_v46 = vrot.slane %v606_v3, %v942_v22  ;;  %v351_v52 = vld [vmem:[%s1974_s9 + $0x30] sm:$0xff] }
  0x17   : > { %535 = vst [vmem:[#allocation2 + $0x80] sm:$0xff] %v1902_v1  ;;  %536 = vst [vmem:[#allocation2 + $0x88] sm:$0x3] %v1902_v1  ;;  %v709_v20 = vld [vmem:[#allocation2 + $0x9] sm:$0xff]  ;;  %v744_v25 = vmul.f32 %v1988_v10, %v708_v19  ;;  %v423_v28 = vadd.f32 %v1984_v8, %v384_v16  ;;  %v424_v32 = vadd.f32 %v1984_v8, %v385_v17  ;;  %v349_v43 = vld [vmem:[%s1974_s9 + $0x20] sm:$0xff] }
  0x18   : > { %537 = vst [vmem:[#allocation2 + $0x90] sm:$0xff] %v1902_v1  ;;  %538 = vst [vmem:[#allocation2 + $0x98] sm:$0xff] %v1902_v1  ;;  %v808_v21 = vld [vmem:[#allocation2 + $0x2] sm:$0xff]  ;;  %v745_v26 = vmul.f32 %v1988_v10, %v709_v20  ;;  %v809_v27 = vld [vmem:[#allocation2 + $0xa] sm:$0xff]  ;;  %v425_v33 = vadd.f32 %v1984_v8, %v386_v24  ;;  %v2014_v47 = vrot.slane %v606_v3, %v1142_v23 }
  0x19   : > { %539 = vst [vmem:[#allocation2 + $0xa0] sm:$0x3] %v1902_v1  ;;  %540 = vst [vmem:[#allocation2 + $0xa8] sm:$0xff] %v1902_v1  ;;  %v776_v35 = vadd.f32 %v744_v25, %v644_v18  ;;  %v844_v36 = vmul.f32 %v1993_v15, %v808_v21  ;;  %v845_v37 = vmul.f32 %v1993_v15, %v809_v27  ;;  %v455_v38 = vmax.f32 %v423_v28, 0.0  ;;  %v350_v44 = vld [vmem:[%s1974_s9 + $0x28] sm:$0xff]  ;;  %v352_v57 = vld [vmem:[%s1974_s9 + $0x38] sm:$0xff] }
  0x1a   : > { %541 = vst [vmem:[#allocation2 + $0xb0] sm:$0xff] %v1902_v1  ;;  %542 = vst [vmem:[#allocation2 + $0xb8] sm:$0x3] %v1902_v1  ;;  %v777_v39 = vadd.f32 %v745_v26, %v644_v18  ;;  %v456_v40 = vmax.f32 %v424_v32, 0.0  ;;  %v457_v41 = vmax.f32 %v425_v33, 0.0  ;;  %v2016_v50 = vrot.slane %v606_v3, %v1243_v29  ;;  %v353_v58 = vld [vmem:[%s1974_s9 + $0x40] sm:$0xff] }
  0x1b   : > { %543 = vst [vmem:[#allocation2 + $0xc0] sm:$0xff] %v1902_v1  ;;  %544 = vst [vmem:[#allocation2 + $0xc8] sm:$0xff] %v1902_v1  ;;  %v487_v45 = vmin.f32 %v455_v38, 6.0  ;;  %v426_v51 = vadd.f32 %v1984_v8, %v387_v42  ;;  %v876_v53 = vadd.f32 %v844_v36, %v776_v35  ;;  %v2020_v54 = vrot.slane %v606_v3, %v1343_v34  ;;  %v354_v59 = vld [vmem:[%s1974_s9 + $0x48] sm:$0xff]  ;;  %v355_v12 = vld [vmem:[%s1974_s9 + $0x50] sm:$0xff] }
  0x1c   : > { %545 = vst [vmem:[#allocation2 + $0xd0] sm:$0x3] %v1902_v1  ;;  %546 = vst [vmem:[#allocation2 + $0xd8] sm:$0xff] %v1902_v1  ;;  %v488_v48 = vmin.f32 %v456_v40, 6.0  ;;  %v489_v49 = vmin.f32 %v457_v41, 6.0  ;;  %v388_v55 = vmul.f32 %v1969_v7, %v349_v43  ;;  %v389_v56 = vmul.f32 %v1969_v7, %v350_v44 }
  0x1d   : > { %547 = vst [vmem:[#allocation2 + $0xe0] sm:$0xff] %v1902_v1  ;;  %548 = vst [vmem:[#allocation2 + $0xe8] sm:$0x3] %v1902_v1  ;;  %v877_v60 = vadd.f32 %v845_v37, %v777_v39  ;;  %v746_v61 = vmul.f32 %v1988_v10, %v487_v45  ;;  %v1044_v62 = vmul.f32 %v2003_v31, %v487_v45 }
  0x1e   : > { %549 = vst [vmem:[#allocation2 + $0xf0] sm:$0xff] %v1902_v1  ;;  %550 = vst [vmem:[#allocation2 + $0xf8] sm:$0xff] %v1902_v1  ;;  %v747_v63 = vmul.f32 %v1988_v10, %v488_v48  ;;  %v1045_v0 = vmul.f32 %v2003_v31, %v488_v48  ;;  %v427_v2 = vadd.f32 %v1984_v8, %v388_v55 }
  0x1f   : > { %551 = vst [vmem:[#allocation2 + $0x100] sm:$0x3] %v1902_v1  ;;  %552 = vst [vmem:[#allocation2 + $0x108] sm:$0xff] %v1902_v1  ;;  %v428_v3 = vadd.f32 %v1984_v8, %v389_v56  ;;  %v390_v4 = vmul.f32 %v1969_v7, %v351_v52  ;;  %v391_v5 = vmul.f32 %v1969_v7, %v352_v57 }
  0x20   : > { %553 = vst [vmem:[#allocation2 + $0x110] sm:$0xff] %v1902_v1  ;;  %554 = vst [vmem:[#allocation2 + $0x118] sm:$0x3] %v1902_v1  ;;  %v392_v6 = vmul.f32 %v1969_v7, %v353_v58  ;;  %v393_v11 = vmul.f32 %v1969_v7, %v354_v59  ;;  %v748_v13 = vmul.f32 %v1988_v10, %v489_v49  ;;  %v459_v16 = vmax.f32 %v427_v2, 0.0 }
  0x21   : > { %555 = vst [vmem:[#allocation2 + $0x120] sm:$0xff] %v1902_v1  ;;  %556 = vst [vmem:[#allocation2 + $0x128] sm:$0xff] %v1902_v1  ;;  %v460_v17 = vmax.f32 %v428_v3, 0.0  ;;  %v1046_v18 = vmul.f32 %v2003_v31, %v489_v49  ;;  %v2041_v19 = vmul.f32 %v2020_v54, %v489_v49  ;;  %v2044_v20 = vadd.f32 %v1984_v8, %v390_v4 }
  0x22   : > { %557 = vst [vmem:[#allocation2 + $0x130] sm:$0x3] %v1902_v1  ;;  %558 = vst [vmem:[#allocation2 + $0x138] sm:$0xff] %v1902_v1  ;;  %v2047_v21 = vadd.f32 %v1984_v8, %v391_v5  ;;  %v491_v22 = vmin.f32 %v459_v16, 6.0  ;;  %v2050_v23 = vadd.f32 %v1984_v8, %v392_v6  ;;  %v2053_v24 = vadd.f32 %v1984_v8, %v393_v11 }
  0x23   : > { %559 = vst [vmem:[#allocation2 + $0x140] sm:$0xff] %v1902_v1  ;;  %560 = vst [vmem:[#allocation2 + $0x148] sm:$0x3] %v1902_v1  ;;  %v2056_v25 = vmul.f32 %v1969_v7, %v355_v12  ;;  %v2063_v30 = vmin.f32 %v460_v17, 6.0  ;;  %v461_v37 = vmax.f32 %v2044_v20, 0.0 }
  0x24   : > { %561 = vst [vmem:[#allocation2 + $0x150] sm:$0xff] %v1902_v1  ;;  %562 = vst [vmem:[#allocation2 + $0x158] sm:$0xff] %v1902_v1  ;;  %v462_v38 = vmax.f32 %v2047_v21, 0.0  ;;  %v750_v42 = vmul.f32 %v1988_v10, %v491_v22  ;;  %v2073_v43 = vmul.f32 %v2003_v31, %v491_v22  ;;  %v1347_v12 = vmul.f32 %v2020_v54, %v491_v22 }
  0x25   : > { %563 = vst [vmem:[#allocation2 + $0x160] sm:$0x3] %v1902_v1  ;;  %564 = vst [vmem:[#allocation2 + $0x168] sm:$0xff] %v1902_v1  ;;  %v751_v16 = vmul.f32 %v1988_v10, %v2063_v30 }
  0x26   : > { %565 = vst [vmem:[#allocation2 + $0x170] sm:$0xff] %v1902_v1  ;;  %566 = vst [vmem:[#allocation2 + $0x178] sm:$0x3] %v1902_v1 }
  0x27   : > { %567 = vst [vmem:[#allocation2 + $0x180] sm:$0xff] %v1902_v1  ;;  %568 = vst [vmem:[#allocation2 + $0x188] sm:$0xff] %v1902_v1 }
  0x28   : > { %569 = vst [vmem:[#allocation2 + $0x190] sm:$0x3] %v1902_v1  ;;  %570 = vst [vmem:[#allocation2 + $0x198] sm:$0xff] %v1902_v1 }
  0x29   : > { %571 = vst [vmem:[#allocation2 + $0x1a0] sm:$0xff] %v1902_v1  ;;  %572 = vst [vmem:[#allocation2 + $0x1a8] sm:$0x3] %v1902_v1  ;;  %v458_v1 = vmax.f32 %v426_v51, 0.0 }
  0x2a   : > { %574 = vst [vmem:[#allocation2 + $0x19] sm:$0xff] %v487_v45  ;;  %575 = vst [vmem:[#allocation2 + $0x21] sm:$0xff] %v488_v48 }
  0x2b   : > { %576 = vst [vmem:[#allocation2 + $0x31] sm:$0xff] %v489_v49  ;;  %v490_v14 = vmin.f32 %v458_v1, 6.0  ;;  %578 = vst [vmem:[#allocation2 + $0x49] sm:$0xff] %v491_v22 }
  0x2c   : > { %579 = vst [vmem:[#allocation2 + $0x51] sm:$0xff] %v2063_v30 }
  0x2d   : > { %577 = vst [vmem:[#allocation2 + $0x39] sm:$0xff] %v490_v14  ;;  %v749_v27 = vmul.f32 %v1988_v10, %v490_v14  ;;  %v1047_v28 = vmul.f32 %v2003_v31, %v490_v14  ;;  %v2061_v29 = vmul.f32 %v2020_v54, %v490_v14  ;;  %v2088_v14 = vld [vmem:[%s2841_s1 + $0x8] ss:$0 sm:$0xff] }
  0x31   : > { %v610_v26 = vld [vmem:[#allocation2 + $0x18] sm:$0xff]  ;;  %v611_v34 = vld [vmem:[#allocation2 + $0x20] sm:$0xff] }
  0x32   : > { %v646_v32 = vmul.f32 %v1986_v9, %v610_v26  ;;  %v944_v33 = vmul.f32 %v2012_v46, %v610_v26  ;;  %v810_v35 = vld [vmem:[#allocation2 + $0x1a] sm:$0xff]  ;;  %v811_v36 = vld [vmem:[#allocation2 + $0x22] sm:$0xff]  ;;  %v647_v39 = vmul.f32 %v1986_v9, %v611_v34  ;;  %v945_v40 = vmul.f32 %v2012_v46, %v611_v34  ;;  %v612_v41 = vld [vmem:[#allocation2 + $0x30] sm:$0xff] }
  0x33   : > { %v846_v48 = vmul.f32 %v1993_v15, %v810_v35  ;;  %v847_v49 = vmul.f32 %v1993_v15, %v811_v36  ;;  %v1144_v55 = vmul.f32 %v2014_v47, %v810_v35  ;;  %v648_v56 = vmul.f32 %v1986_v9, %v612_v41  ;;  %v614_v34 = vld [vmem:[#allocation2 + $0x48] sm:$0xff] }
  0x34   : > { %v778_v44 = vadd.f32 %v746_v61, %v646_v32  ;;  %v976_v45 = vadd.f32 %v944_v33, %v876_v53  ;;  %v779_v51 = vadd.f32 %v747_v63, %v647_v39  ;;  %v977_v52 = vadd.f32 %v945_v40, %v877_v60  ;;  %v613_v4 = vld [vmem:[#allocation2 + $0x38] sm:$0xff]  ;;  %v615_v40 = vld [vmem:[#allocation2 + $0x50] sm:$0xff] }
  0x35   : > { %v1145_v59 = vmul.f32 %v2014_v47, %v811_v36  ;;  %v946_v1 = vmul.f32 %v2012_v46, %v612_v41  ;;  %v780_v61 = vadd.f32 %v748_v13, %v648_v56  ;;  %v1245_v53 = vmul.f32 %v2016_v50, %v612_v41  ;;  %v812_v5 = vld [vmem:[#allocation2 + $0x32] sm:$0xff]  ;;  %v813_v11 = vld [vmem:[#allocation2 + $0x3a] sm:$0xff] }
  0x36   : > { %v1076_v57 = vadd.f32 %v1044_v62, %v976_v45  ;;  %v878_v58 = vadd.f32 %v846_v48, %v778_v44  ;;  %v879_v2 = vadd.f32 %v847_v49, %v779_v51  ;;  %v1077_v3 = vadd.f32 %v1045_v0, %v977_v52  ;;  %v814_v52 = vld [vmem:[#allocation2 + $0x4a] sm:$0xff] }
  0x37   : > { %v649_v60 = vmul.f32 %v1986_v9, %v613_v4  ;;  %v848_v0 = vmul.f32 %v1993_v15, %v812_v5  ;;  %v947_v13 = vmul.f32 %v2012_v46, %v613_v4  ;;  %v1146_v33 = vmul.f32 %v2014_v47, %v812_v5 }
  0x38   : > { %v1176_v6 = vadd.f32 %v1144_v55, %v1076_v57  ;;  %v978_v63 = vadd.f32 %v946_v1, %v878_v58  ;;  %v1177_v62 = vadd.f32 %v1145_v59, %v1077_v3  ;;  %v849_v22 = vmul.f32 %v1993_v15, %v813_v11 }
  0x39   : > { %v781_v32 = vadd.f32 %v749_v27, %v649_v60  ;;  %v880_v35 = vadd.f32 %v848_v0, %v780_v61  ;;  %v979_v36 = vadd.f32 %v947_v13, %v879_v2  ;;  %v1246_v39 = vmul.f32 %v2016_v50, %v613_v4 }
  0x3a   : > { %v1078_v17 = vadd.f32 %v1046_v18, %v978_v63  ;;  %v1277_v26 = vadd.f32 %v1245_v53, %v1176_v6  ;;  %v1147_v44 = vmul.f32 %v2014_v47, %v813_v11  ;;  %v1445_v48 = vmul.f32 %v2088_v14, %v812_v5 }
  0x3b   : > { %v1079_v18 = vadd.f32 %v1047_v28, %v979_v36  ;;  %v1278_v49 = vadd.f32 %v1246_v39, %v1177_v62  ;;  %v650_v27 = vmul.f32 %v1986_v9, %v614_v34  ;;  %v948_v51 = vmul.f32 %v2012_v46, %v614_v34  ;;  %v815_v28 = vld [vmem:[#allocation2 + $0x52] sm:$0xff] }
  0x3c   : > { %v1377_v41 = vadd.f32 %v2041_v19, %v1277_v26  ;;  %v1178_v45 = vadd.f32 %v1146_v33, %v1078_v17  ;;  %v881_v55 = vadd.f32 %v849_v22, %v781_v32  ;;  %v1247_v57 = vmul.f32 %v2016_v50, %v614_v34 }
  0x3d   : > { %v651_v58 = vmul.f32 %v1986_v9, %v615_v40  ;;  %v1378_v19 = vadd.f32 %v2061_v29, %v1278_v49  ;;  %v1446_v59 = vmul.f32 %v2088_v14, %v813_v11  ;;  %v782_v1 = vadd.f32 %v750_v42, %v650_v27  ;;  %v359_v27 = vld [vmem:[%s1974_s9 + $0x70] sm:$0xff] }
  0x3e   : > { %v2102_v56 = vadd.f32 %v1445_v48, %v1377_v41  ;;  %v980_v2 = vadd.f32 %v948_v51, %v880_v35  ;;  %v1279_v3 = vadd.f32 %v1247_v57, %v1178_v45  ;;  %v850_v61 = vmul.f32 %v1993_v15, %v814_v52  ;;  %v357_v41 = vld [vmem:[%s1974_s9 + $0x60] sm:$0xff] }
  0x3f   : > { %v949_v53 = vmul.f32 %v2012_v46, %v615_v40  ;;  %v463_v4 = vmax.f32 %v2050_v23, 0.0  ;;  %v1179_v5 = vadd.f32 %v1147_v44, %v1079_v18  ;;  %v2111_v6 = vadd.f32 %v1446_v59, %v1378_v19  ;;  %v358_v44 = vld [vmem:[%s1974_s9 + $0x68] sm:$0xff]  ;;  %v361_v19 = vld [vmem:[%s1974_s9 + $0x80] sm:$0xff] }
  0x40   : > { %v1080_v63 = vadd.f32 %v2073_v43, %v980_v2  ;;  %v1049_v29 = vmul.f32 %v2003_v31, %v2063_v30  ;;  %v1379_v60 = vadd.f32 %v1347_v12, %v1279_v3  ;;  %v783_v11 = vadd.f32 %v751_v16, %v651_v58  ;;  %v360_v58 = vld [vmem:[%s1974_s9 + $0x78] sm:$0xff] }
  0x41   : > { %v851_v42 = vmul.f32 %v1993_v15, %v815_v28  ;;  %v981_v62 = vadd.f32 %v949_v53, %v881_v55  ;;  %v2117_v0 = vadd.f32 %v850_v61, %v782_v1  ;;  %v1248_v13 = vmul.f32 %v2016_v50, %v615_v40  ;;  %v356_v40 = vld [vmem:[%s1974_s9 + $0x58] sm:$0xff] }
  0x42   : > { %v1348_v23 = vmul.f32 %v2020_v54, %v2063_v30  ;;  %v1447_v17 = vmul.f32 %v2088_v14, %v814_v52  ;;  %v1148_v26 = vmul.f32 %v2014_v47, %v814_v52  ;;  %v1149_v12 = vmul.f32 %v2014_v47, %v815_v28 }
  0x43   : > { %v1081_v43 = vadd.f32 %v1049_v29, %v981_v62  ;;  %v493_v16 = vmin.f32 %v461_v37, 6.0  ;;  %v1280_v32 = vadd.f32 %v1248_v13, %v1179_v5  ;;  %v494_v34 = vmin.f32 %v462_v38, 6.0 }
  0x44   : > { %v2127_v33 = vadd.f32 %v1447_v17, %v1379_v60  ;;  %v495_v22 = vmin.f32 %v463_v4, 6.0  ;;  %v883_v30 = vadd.f32 %v851_v42, %v783_v11  ;;  %v1180_v35 = vadd.f32 %v1148_v26, %v1080_v63 }
  0x45   : > { %v2131_v36 = vadd.f32 %v1149_v12, %v1081_v43  ;;  %v1448_v39 = vmul.f32 %v2088_v14, %v815_v28  ;;  %580 = vst [vmem:[#allocation2 + $0x61] sm:$0xff] %v493_v16  ;;  %v1380_v20 = vadd.f32 %v1348_v23, %v1280_v32  ;;  %v752_v37 = vmul.f32 %v1988_v10, %v493_v16 }
  0x46   : > { %v1050_v21 = vmul.f32 %v2003_v31, %v493_v16  ;;  %v1349_v38 = vmul.f32 %v2020_v54, %v493_v16  ;;  %581 = vst [vmem:[#allocation2 + $0x69] sm:$0xff] %v494_v34  ;;  %582 = vst [vmem:[#allocation2 + $0x79] sm:$0xff] %v495_v22  ;;  %v753_v45 = vmul.f32 %v1988_v10, %v494_v34  ;;  %v464_v49 = vmax.f32 %v2053_v24, 0.0 }
  0x47   : > { %v1051_v48 = vmul.f32 %v2003_v31, %v494_v34  ;;  %v2143_v18 = vmul.f32 %v2020_v54, %v494_v34  ;;  %v2147_v51 = vadd.f32 %v1448_v39, %v1380_v20  ;;  %v433_v52 = vadd.f32 %v1984_v8, %v2056_v25 }
  0x48   : > { %v395_v55 = vmul.f32 %v1969_v7, %v356_v40  ;;  %v396_v57 = vmul.f32 %v1969_v7, %v357_v41  ;;  %v754_v59 = vmul.f32 %v1988_v10, %v495_v22  ;;  %v2157_v1 = vmul.f32 %v2003_v31, %v495_v22 }
  0x49   : > { %v496_v2 = vmin.f32 %v464_v49, 6.0  ;;  %v397_v24 = vmul.f32 %v1969_v7, %v358_v44  ;;  %v465_v28 = vmax.f32 %v433_v52, 0.0  ;;  %v398_v61 = vmul.f32 %v1969_v7, %v359_v27 }
  0x4a   : > { %v2161_v3 = vadd.f32 %v1984_v8, %v395_v55  ;;  %v2164_v25 = vadd.f32 %v1984_v8, %v396_v57  ;;  %v2168_v53 = vmul.f32 %v2020_v54, %v495_v22  ;;  %v2174_v5 = vmul.f32 %v1969_v7, %v360_v58 }
  0x4b   : > { %583 = vst [vmem:[#allocation2 + $0x81] sm:$0xff] %v496_v2  ;;  %v2171_v4 = vmul.f32 %v1988_v10, %v496_v2  ;;  %v2177_v63 = vmul.f32 %v1969_v7, %v361_v19  ;;  %v2180_v60 = vmul.f32 %v2003_v31, %v496_v2  ;;  %v2183_v11 = vmul.f32 %v2020_v54, %v496_v2 }
  0x4c   : > { %v616_v29 = vld [vmem:[#allocation2 + $0x60] sm:$0xff]  ;;  %v2185_v42 = vmin.f32 %v465_v28, 6.0  ;;  %v2188_v62 = vadd.f32 %v1984_v8, %v397_v24  ;;  %v466_v12 = vmax.f32 %v2161_v3, 0.0  ;;  %v467_v34 = vmax.f32 %v2164_v25, 0.0  ;;  %v362_v3 = vld [vmem:[%s1974_s9 + $0x88] sm:$0xff] }
  0x4d   : > { %v652_v13 = vmul.f32 %v1986_v9, %v616_v29  ;;  %v950_v23 = vmul.f32 %v2012_v46, %v616_v29  ;;  %v1249_v17 = vmul.f32 %v2016_v50, %v616_v29  ;;  %v617_v43 = vld [vmem:[#allocation2 + $0x68] sm:$0xff]  ;;  %v2199_v22 = vadd.f32 %v1984_v8, %v398_v61  ;;  %v618_v57 = vld [vmem:[#allocation2 + $0x78] sm:$0xff] }
  0x4e   : > { %v816_v26 = vld [vmem:[#allocation2 + $0x62] sm:$0xff]  ;;  %v653_v16 = vmul.f32 %v1986_v9, %v617_v43  ;;  %v951_v32 = vmul.f32 %v2012_v46, %v617_v43  ;;  %584 = vst [vmem:[#allocation2 + $0x91] sm:$0xff] %v2185_v42  ;;  %v817_v20 = vld [vmem:[#allocation2 + $0x6a] sm:$0xff]  ;;  %v1250_v55 = vmul.f32 %v2016_v50, %v617_v43  ;;  %v654_v29 = vmul.f32 %v1986_v9, %v618_v57 }
  0x4f   : > { %v784_v39 = vadd.f32 %v752_v37, %v652_v13  ;;  %v982_v40 = vadd.f32 %v950_v23, %v2117_v0  ;;  %v1281_v41 = vadd.f32 %v1249_v17, %v1180_v35  ;;  %v852_v44 = vmul.f32 %v1993_v15, %v816_v26 }
  0x50   : > { %v785_v49 = vadd.f32 %v753_v45, %v653_v16  ;;  %v983_v27 = vadd.f32 %v951_v32, %v883_v30  ;;  %v1150_v52 = vmul.f32 %v2014_v47, %v816_v26  ;;  %v1449_v24 = vmul.f32 %v2088_v14, %v816_v26 }
  0x51   : > { %v1082_v58 = vadd.f32 %v1050_v21, %v982_v40  ;;  %v1381_v19 = vadd.f32 %v1349_v38, %v1281_v41  ;;  %v884_v2 = vadd.f32 %v852_v44, %v784_v39  ;;  %v853_v37 = vmul.f32 %v1993_v15, %v817_v20 }
  0x52   : > { %v1083_v28 = vadd.f32 %v1051_v48, %v983_v27  ;;  %v1151_v0 = vmul.f32 %v2014_v47, %v817_v20  ;;  %v1282_v35 = vadd.f32 %v1250_v55, %v2131_v36  ;;  %v619_v61 = vld [vmem:[#allocation2 + $0x80] sm:$0xff]  ;;  %v952_v13 = vmul.f32 %v2012_v46, %v618_v57 }
  0x53   : > { %v1182_v45 = vadd.f32 %v1150_v52, %v1082_v58  ;;  %v2209_v30 = vadd.f32 %v1449_v24, %v1381_v19  ;;  %v818_v21 = vld [vmem:[#allocation2 + $0x7a] sm:$0xff]  ;;  %v885_v38 = vadd.f32 %v853_v37, %v785_v49  ;;  %v1450_v17 = vmul.f32 %v2088_v14, %v817_v20  ;;  %v819_v43 = vld [vmem:[#allocation2 + $0x82] sm:$0xff] }
  0x54   : > { %v1382_v23 = vadd.f32 %v2143_v18, %v1282_v35  ;;  %v1251_v48 = vmul.f32 %v2016_v50, %v618_v57  ;;  %v1183_v26 = vadd.f32 %v1151_v0, %v1083_v28  ;;  %v786_v16 = vadd.f32 %v754_v59, %v654_v29 }
  0x55   : > { %v984_v36 = vadd.f32 %v952_v13, %v884_v2  ;;  %v655_v32 = vmul.f32 %v1986_v9, %v619_v61  ;;  %v854_v41 = vmul.f32 %v1993_v15, %v818_v21  ;;  %v953_v44 = vmul.f32 %v2012_v46, %v619_v61  ;;  %v620_v27 = vld [vmem:[#allocation2 + $0x90] sm:$0xff] }
  0x56   : > { %v2217_v39 = vadd.f32 %v1450_v17, %v1382_v23  ;;  %v1283_v40 = vadd.f32 %v1251_v48, %v1182_v45  ;;  %v855_v18 = vmul.f32 %v1993_v15, %v819_v43  ;;  %v1152_v20 = vmul.f32 %v2014_v47, %v818_v21 }
  0x57   : > { %v1084_v49 = vadd.f32 %v2157_v1, %v984_v36  ;;  %v468_v52 = vmax.f32 %v2188_v62, 0.0  ;;  %v886_v55 = vadd.f32 %v854_v41, %v786_v16  ;;  %v985_v57 = vadd.f32 %v953_v44, %v885_v38 }
  0x58   : > { %2856 = vst [vmem:[#allocation3_spill] sm:$0xff] %v2217_v39  ;;  %v1383_v59 = vadd.f32 %v2168_v53, %v1283_v40  ;;  %v1252_v58 = vmul.f32 %v2016_v50, %v619_v61  ;;  %v787_v19 = vadd.f32 %v2171_v4, %v655_v32  ;;  %v1153_v2 = vmul.f32 %v2014_v47, %v819_v43  ;;  %v364_v32 = vld [vmem:[%s1974_s9 + $0x98] sm:$0xff] }
  0x59   : > { %v1184_v24 = vadd.f32 %v1152_v20, %v1084_v49  ;;  %v1451_v1 = vmul.f32 %v2088_v14, %v818_v21  ;;  %v1085_v37 = vadd.f32 %v2180_v60, %v985_v57  ;;  %v1452_v0 = vmul.f32 %v2088_v14, %v819_v43 }
  0x5a   : > { %v1284_v28 = vadd.f32 %v1252_v58, %v1183_v26  ;;  %v954_v62 = vmul.f32 %v2012_v46, %v620_v27  ;;  %v1054_v53 = vmul.f32 %v2003_v31, %v2185_v42  ;;  %v1253_v61 = vmul.f32 %v2016_v50, %v620_v27 }
  0x5b   : > { %v2233_v35 = vadd.f32 %v1451_v1, %v1383_v59  ;;  %v1353_v4 = vmul.f32 %v2020_v54, %v2185_v42  ;;  %v656_v29 = vmul.f32 %v1986_v9, %v620_v27  ;;  %v756_v60 = vmul.f32 %v1988_v10, %v2185_v42  ;;  %v365_v1 = vld [vmem:[%s1974_s9 + $0xa0] sm:$0xff] }
  0x5c   : > { %v1384_v45 = vadd.f32 %v2183_v11, %v1284_v28  ;;  %v986_v13 = vadd.f32 %v954_v62, %v886_v55  ;;  %v1285_v21 = vadd.f32 %v1253_v61, %v1184_v24  ;;  %v498_v38 = vmin.f32 %v466_v12, 6.0  ;;  %v363_v12 = vld [vmem:[%s1974_s9 + $0x90] sm:$0xff] }
  0x5d   : > { %2857 = vst [vmem:[#allocation4_spill] sm:$0xff] %v2233_v35  ;;  %v499_v23 = vmin.f32 %v467_v34, 6.0  ;;  %v500_v17 = vmin.f32 %v468_v52, 6.0  ;;  %v469_v43 = vmax.f32 %v2199_v22, 0.0  ;;  %v438_v42 = vadd.f32 %v1984_v8, %v2174_v5 }
  0x5e   : > { %v2248_v48 = vadd.f32 %v1452_v0, %v1384_v45  ;;  %v1086_v11 = vadd.f32 %v1054_v53, %v986_v13  ;;  %v887_v26 = vadd.f32 %v855_v18, %v787_v19  ;;  %v1185_v16 = vadd.f32 %v1153_v2, %v1085_v37  ;;  %585 = vst [vmem:[#allocation2 + $0x99] sm:$0xff] %v498_v38 }
  0x5f   : > { %v1385_v36 = vadd.f32 %v1353_v4, %v1285_v21  ;;  %586 = vst [vmem:[#allocation2 + $0xa9] sm:$0xff] %v499_v23  ;;  %587 = vst [vmem:[#allocation2 + $0xb1] sm:$0xff] %v500_v17  ;;  %v788_v25 = vadd.f32 %v756_v60, %v656_v29  ;;  %v757_v34 = vmul.f32 %v1988_v10, %v498_v38  ;;  %v501_v44 = vmin.f32 %v469_v43, 6.0 }
  0x60   : > { %2858 = vst [vmem:[#allocation5_spill] sm:$0xff] %v2248_v48  ;;  %v1055_v40 = vmul.f32 %v2003_v31, %v498_v38  ;;  %v1354_v41 = vmul.f32 %v2020_v54, %v498_v38  ;;  %v758_v22 = vmul.f32 %v1988_v10, %v499_v23  ;;  %v2261_v5 = vmul.f32 %v2003_v31, %v499_v23 }
  0x61   : > { %v470_v49 = vmax.f32 %v438_v42, 0.0  ;;  %v439_v18 = vadd.f32 %v1984_v8, %v2177_v63  ;;  %v401_v20 = vmul.f32 %v1969_v7, %v362_v3  ;;  %v402_v27 = vmul.f32 %v1969_v7, %v363_v12  ;;  %588 = vst [vmem:[#allocation2 + $0xc1] sm:$0xff] %v501_v44 }
  0x62   : > { %v403_v52 = vmul.f32 %v1969_v7, %v364_v32  ;;  %v1355_v59 = vmul.f32 %v2020_v54, %v499_v23  ;;  %v759_v55 = vmul.f32 %v1988_v10, %v500_v17  ;;  %v2271_v57 = vmul.f32 %v2003_v31, %v500_v17 }
  0x63   : > { %v502_v58 = vmin.f32 %v470_v49, 6.0  ;;  %v2274_v19 = vmul.f32 %v2020_v54, %v500_v17  ;;  %v2277_v63 = vmul.f32 %v1988_v10, %v501_v44  ;;  %v2280_v2 = vmul.f32 %v2003_v31, %v501_v44 }
  0x64   : > { %v471_v24 = vmax.f32 %v439_v18, 0.0  ;;  %v2284_v37 = vmul.f32 %v2020_v54, %v501_v44  ;;  %v2287_v28 = vadd.f32 %v1984_v8, %v401_v20  ;;  %v2290_v0 = vadd.f32 %v1984_v8, %v402_v27 }
  0x65   : > { %589 = vst [vmem:[#allocation2 + $0xc9] sm:$0xff] %v502_v58  ;;  %v2293_v62 = vadd.f32 %v1984_v8, %v403_v52  ;;  %v621_v53 = vld [vmem:[#allocation2 + $0x98] sm:$0xff]  ;;  %v2296_v45 = vmul.f32 %v1988_v10, %v502_v58  ;;  %v2299_v29 = vmul.f32 %v2003_v31, %v502_v58  ;;  %v2302_v60 = vmul.f32 %v2020_v54, %v502_v58 }
  0x66   : > { %v820_v61 = vld [vmem:[#allocation2 + $0x92] sm:$0xff]  ;;  %v821_v4 = vld [vmem:[#allocation2 + $0x9a] sm:$0xff]  ;;  %v2304_v13 = vmin.f32 %v471_v24, 6.0  ;;  %v657_v21 = vmul.f32 %v1986_v9, %v621_v53  ;;  %v955_v23 = vmul.f32 %v2012_v46, %v621_v53  ;;  %v622_v17 = vld [vmem:[#allocation2 + $0xa8] sm:$0xff]  ;;  %v2310_v43 = vmul.f32 %v1969_v7, %v365_v1 }
  0x67   : > { %v856_v38 = vmul.f32 %v1993_v15, %v820_v61  ;;  %v857_v42 = vmul.f32 %v1993_v15, %v821_v4  ;;  %v1154_v3 = vmul.f32 %v2014_v47, %v820_v61  ;;  %v1254_v12 = vmul.f32 %v2016_v50, %v621_v53  ;;  %v623_v27 = vld [vmem:[#allocation2 + $0xb0] sm:$0xff] }
  0x68   : > { %v1453_v32 = vmul.f32 %v2088_v14, %v820_v61  ;;  %590 = vst [vmem:[#allocation2 + $0xd9] sm:$0xff] %v2304_v13  ;;  %v789_v44 = vadd.f32 %v757_v34, %v657_v21  ;;  %v987_v18 = vadd.f32 %v955_v23, %v887_v26  ;;  %v1155_v20 = vmul.f32 %v2014_v47, %v821_v4  ;;  %v822_v48 = vld [vmem:[#allocation2 + $0xaa] sm:$0xff] }
  0x69   : > { %v888_v49 = vadd.f32 %v856_v38, %v788_v25  ;;  %v1186_v52 = vadd.f32 %v1154_v3, %v1086_v11  ;;  %v1286_v58 = vadd.f32 %v1254_v12, %v1185_v16  ;;  %v658_v1 = vmul.f32 %v1986_v9, %v622_v17 }
  0x6a   : > { %v2318_v24 = vadd.f32 %v1453_v32, %v1385_v36  ;;  %v1087_v35 = vadd.f32 %v1055_v40, %v987_v18  ;;  %v1454_v53 = vmul.f32 %v2088_v14, %v821_v4  ;;  %v956_v61 = vmul.f32 %v2012_v46, %v622_v17  ;;  %v823_v4 = vld [vmem:[#allocation2 + $0xb2] sm:$0xff]  ;;  %v624_v32 = vld [vmem:[#allocation2 + $0xc0] sm:$0xff] }
  0x6b   : > { %v1255_v39 = vmul.f32 %v2016_v50, %v622_v17  ;;  %v889_v34 = vadd.f32 %v857_v42, %v789_v44  ;;  %v1386_v25 = vadd.f32 %v1354_v41, %v1286_v58  ;;  %v790_v26 = vadd.f32 %v758_v22, %v658_v1 }
  0x6c   : > { %v659_v21 = vmul.f32 %v1986_v9, %v623_v27  ;;  %v988_v38 = vadd.f32 %v956_v61, %v888_v49  ;;  %v858_v16 = vmul.f32 %v1993_v15, %v822_v48  ;;  %v472_v36 = vmax.f32 %v2287_v28, 0.0 }
  0x6d   : > { %v1287_v11 = vadd.f32 %v1255_v39, %v1186_v52  ;;  %v1187_v23 = vadd.f32 %v1155_v20, %v1087_v35  ;;  %v2327_v3 = vadd.f32 %v1454_v53, %v1386_v25  ;;  %v957_v12 = vmul.f32 %v2012_v46, %v623_v27  ;;  %v824_v53 = vld [vmem:[#allocation2 + $0xc2] sm:$0xff] }
  0x6e   : > { %v791_v40 = vadd.f32 %v759_v55, %v659_v21  ;;  %v1088_v17 = vadd.f32 %v2261_v5, %v988_v38  ;;  %v890_v22 = vadd.f32 %v858_v16, %v790_v26  ;;  %v1156_v42 = vmul.f32 %v2014_v47, %v822_v48  ;;  %v625_v5 = vld [vmem:[#allocation2 + $0xc8] sm:$0xff] }
  0x6f   : > { %v1387_v41 = vadd.f32 %v1355_v59, %v1287_v11  ;;  %v989_v44 = vadd.f32 %v957_v12, %v889_v34  ;;  %v1256_v39 = vmul.f32 %v2016_v50, %v623_v27  ;;  %v1455_v49 = vmul.f32 %v2088_v14, %v822_v48  ;;  %v366_v25 = vld [vmem:[%s1974_s9 + $0xa8] sm:$0xff] }
  0x70   : > { %v473_v35 = vmax.f32 %v2290_v0, 0.0  ;;  %v859_v55 = vmul.f32 %v1993_v15, %v823_v4  ;;  %v1188_v18 = vadd.f32 %v1156_v42, %v1088_v17  ;;  %v660_v20 = vmul.f32 %v1986_v9, %v624_v32 }
  0x71   : > { %v958_v52 = vmul.f32 %v2012_v46, %v624_v32  ;;  %v1089_v59 = vadd.f32 %v2271_v57, %v989_v44  ;;  %v1288_v58 = vadd.f32 %v1256_v39, %v1187_v23  ;;  %v2339_v1 = vadd.f32 %v1455_v49, %v1387_v41  ;;  %v825_v23 = vld [vmem:[#allocation2 + $0xca] sm:$0xff] }
  0x72   : > { %v1257_v27 = vmul.f32 %v2016_v50, %v624_v32  ;;  %v891_v48 = vadd.f32 %v859_v55, %v791_v40  ;;  %v1157_v61 = vmul.f32 %v2014_v47, %v823_v4  ;;  %v792_v0 = vadd.f32 %v2277_v63, %v660_v20  ;;  %v626_v32 = vld [vmem:[#allocation2 + $0xd8] sm:$0xff] }
  0x73   : > { %v990_v34 = vadd.f32 %v958_v52, %v890_v22  ;;  %v1388_v26 = vadd.f32 %v2274_v19, %v1288_v58  ;;  %v1456_v21 = vmul.f32 %v2088_v14, %v823_v4  ;;  %v661_v57 = vmul.f32 %v1986_v9, %v625_v5 }
  0x74   : > { %v1289_v38 = vadd.f32 %v1257_v27, %v1188_v18  ;;  %v1189_v11 = vadd.f32 %v1157_v61, %v1089_v59  ;;  %v860_v12 = vmul.f32 %v1993_v15, %v824_v53  ;;  %v959_v40 = vmul.f32 %v2012_v46, %v625_v5 }
  0x75   : > { %v1090_v16 = vadd.f32 %v2280_v2, %v990_v34  ;;  %v2351_v17 = vadd.f32 %v1456_v21, %v1388_v26  ;;  %v1158_v19 = vmul.f32 %v2014_v47, %v824_v53  ;;  %v405_v4 = vmul.f32 %v1969_v7, %v366_v25 }
  0x76   : > { %v1389_v63 = vadd.f32 %v2284_v37, %v1289_v38  ;;  %v892_v41 = vadd.f32 %v860_v12, %v792_v0  ;;  %v991_v22 = vadd.f32 %v959_v40, %v891_v48  ;;  %v1258_v42 = vmul.f32 %v2016_v50, %v625_v5  ;;  %v368_v38 = vld [vmem:[%s1974_s9 + $0xb8] sm:$0xff] }
  0x77   : > { %v1457_v2 = vmul.f32 %v2088_v14, %v824_v53  ;;  %v793_v44 = vadd.f32 %v2296_v45, %v661_v57  ;;  %v861_v39 = vmul.f32 %v1993_v15, %v825_v23  ;;  %v1190_v49 = vadd.f32 %v1158_v19, %v1090_v16  ;;  %v369_v57 = vld [vmem:[%s1974_s9 + $0xc0] sm:$0xff] }
  0x78   : > { %v662_v55 = vmul.f32 %v1986_v9, %v626_v32  ;;  %v1091_v18 = vadd.f32 %v2299_v29, %v991_v22  ;;  %v1290_v37 = vadd.f32 %v1258_v42, %v1189_v11  ;;  %v960_v52 = vmul.f32 %v2012_v46, %v626_v32 }
  0x79   : > { %v2362_v20 = vadd.f32 %v1457_v2, %v1389_v63  ;;  %v762_v59 = vmul.f32 %v1988_v10, %v2304_v13  ;;  %v1060_v5 = vmul.f32 %v2003_v31, %v2304_v13  ;;  %v1259_v45 = vmul.f32 %v2016_v50, %v626_v32 }
  0x7a   : > { %v1359_v58 = vmul.f32 %v2020_v54, %v2304_v13  ;;  %v1390_v29 = vadd.f32 %v2302_v60, %v1290_v37  ;;  %v1458_v27 = vmul.f32 %v2088_v14, %v825_v23  ;;  %v992_v53 = vadd.f32 %v960_v52, %v892_v41  ;;  %v367_v60 = vld [vmem:[%s1974_s9 + $0xb0] sm:$0xff] }
  0x7b   : > { %v504_v48 = vmin.f32 %v472_v36, 6.0  ;;  %v1291_v61 = vadd.f32 %v1259_v45, %v1190_v49  ;;  %v505_v0 = vmin.f32 %v473_v35, 6.0  ;;  %v474_v34 = vmax.f32 %v2293_v62, 0.0 }
  0x7c   : > { %v443_v25 = vadd.f32 %v1984_v8, %v2310_v43  ;;  %v1159_v26 = vmul.f32 %v2014_v47, %v825_v23  ;;  %v2380_v21 = vadd.f32 %v1458_v27, %v1390_v29  ;;  %v1092_v13 = vadd.f32 %v1060_v5, %v992_v53  ;;  %v370_v43 = vld [vmem:[%s1974_s9 + $0xc8] sm:$0xff] }
  0x7d   : > { %591 = vst [vmem:[#allocation2 + $0xe1] sm:$0xff] %v504_v48  ;;  %v893_v11 = vadd.f32 %v861_v39, %v793_v44  ;;  %v794_v28 = vadd.f32 %v762_v59, %v662_v55  ;;  %v1391_v36 = vadd.f32 %v1359_v58, %v1291_v61  ;;  %592 = vst [vmem:[#allocation2 + $0xf1] sm:$0xff] %v505_v0  ;;  %v506_v16 = vmin.f32 %v474_v34, 6.0 }
  0x7e   : > { %2859 = vst [vmem:[#allocation6_spill] sm:$0xff] %v2380_v21  ;;  %v1191_v35 = vadd.f32 %v1159_v26, %v1091_v18  ;;  %v475_v62 = vmax.f32 %v443_v25, 0.0  ;;  %v444_v12 = vadd.f32 %v1984_v8, %v405_v4  ;;  %v763_v40 = vmul.f32 %v1988_v10, %v504_v48 }
  0x7f   : > { %v406_v23 = vmul.f32 %v1969_v7, %v367_v60  ;;  %v407_v32 = vmul.f32 %v1969_v7, %v368_v38  ;;  %v408_v63 = vmul.f32 %v1969_v7, %v369_v57  ;;  %v1061_v19 = vmul.f32 %v2003_v31, %v504_v48  ;;  %593 = vst [vmem:[#allocation2 + $0xf9] sm:$0xff] %v506_v16 }
  0x80   : > { %v1360_v41 = vmul.f32 %v2020_v54, %v504_v48  ;;  %v764_v22 = vmul.f32 %v1988_v10, %v505_v0  ;;  %v507_v42 = vmin.f32 %v475_v62, 6.0  ;;  %v1062_v2 = vmul.f32 %v2003_v31, %v505_v0 }
  0x81   : > { %v1361_v4 = vmul.f32 %v2020_v54, %v505_v0  ;;  %v476_v44 = vmax.f32 %v444_v12, 0.0  ;;  %v409_v39 = vmul.f32 %v1969_v7, %v370_v43  ;;  %v765_v49 = vmul.f32 %v1988_v10, %v506_v16 }
  0x82   : > { %v1063_v55 = vmul.f32 %v2003_v31, %v506_v16  ;;  %v2400_v18 = vmul.f32 %v2020_v54, %v506_v16  ;;  %594 = vst [vmem:[#allocation2 + $0x109] sm:$0xff] %v507_v42  ;;  %v2403_v37 = vadd.f32 %v1984_v8, %v406_v23  ;;  %v2406_v45 = vmul.f32 %v1988_v10, %v507_v42 }
  0x83   : > { %v2408_v58 = vmin.f32 %v476_v44, 6.0  ;;  %v2411_v7 = vadd.f32 %v1984_v8, %v407_v32  ;;  %v2414_v29 = vadd.f32 %v1984_v8, %v408_v63  ;;  %v1064_v0 = vmul.f32 %v2003_v31, %v507_v42 }
  0x84   : > { %v627_v52 = vld [vmem:[#allocation2 + $0xe0] sm:$0xff]  ;;  %v628_v61 = vld [vmem:[#allocation2 + $0xf0] sm:$0xff] }
  0x85   : > { %v826_v59 = vld [vmem:[#allocation2 + $0xda] sm:$0xff]  ;;  %v827_v5 = vld [vmem:[#allocation2 + $0xe2] sm:$0xff]  ;;  %v663_v27 = vmul.f32 %v1986_v9, %v627_v52  ;;  %v961_v48 = vmul.f32 %v2012_v46, %v627_v52  ;;  %v1260_v26 = vmul.f32 %v2016_v50, %v627_v52  ;;  %595 = vst [vmem:[#allocation2 + $0x111] sm:$0xff] %v2408_v58  ;;  %v664_v23 = vmul.f32 %v1986_v9, %v628_v61 }
  0x86   : > { %v862_v53 = vmul.f32 %v1993_v15, %v826_v59  ;;  %v863_v34 = vmul.f32 %v1993_v15, %v827_v5  ;;  %v1160_v25 = vmul.f32 %v2014_v47, %v826_v59  ;;  %v1459_v60 = vmul.f32 %v2088_v14, %v826_v59  ;;  %v629_v32 = vld [vmem:[#allocation2 + $0xf8] sm:$0xff] }
  0x87   : > { %v795_v8 = vadd.f32 %v763_v40, %v663_v27  ;;  %v993_v57 = vadd.f32 %v961_v48, %v893_v11  ;;  %v1161_v16 = vmul.f32 %v2014_v47, %v827_v5  ;;  %v1292_v12 = vadd.f32 %v1260_v26, %v1191_v35  ;;  %v828_v63 = vld [vmem:[#allocation2 + $0xf2] sm:$0xff] }
  0x88   : > { %v894_v38 = vadd.f32 %v862_v53, %v794_v28  ;;  %v1192_v62 = vadd.f32 %v1160_v25, %v1092_v13  ;;  %v2426_v43 = vadd.f32 %v1459_v60, %v1391_v36  ;;  %v1460_v52 = vmul.f32 %v2088_v14, %v827_v5  ;;  %v829_v5 = vld [vmem:[#allocation2 + $0xfa] sm:$0xff] }
  0x89   : > { %v1093_v44 = vadd.f32 %v1061_v19, %v993_v57  ;;  %v962_v59 = vmul.f32 %v2012_v46, %v628_v61  ;;  %v1261_v21 = vmul.f32 %v2016_v50, %v628_v61  ;;  %v895_v40 = vadd.f32 %v863_v34, %v795_v8  ;;  %v630_v60 = vld [vmem:[#allocation2 + $0x108] sm:$0xff] }
  0x8a   : > { %v1392_v28 = vadd.f32 %v1360_v41, %v1292_v12  ;;  %v796_v11 = vadd.f32 %v764_v22, %v664_v23  ;;  %v665_v27 = vmul.f32 %v1986_v9, %v629_v32  ;;  %v864_v36 = vmul.f32 %v1993_v15, %v828_v63 }
  0x8b   : > { %v994_v13 = vadd.f32 %v962_v59, %v894_v38  ;;  %v1293_v35 = vadd.f32 %v1261_v21, %v1192_v62  ;;  %v1363_v53 = vmul.f32 %v2020_v54, %v507_v42  ;;  %v1193_v48 = vadd.f32 %v1161_v16, %v1093_v44  ;;  %v2444_v42 = vld [vmem:[%s2843_s3] ss:$0 sm:$0xff] }
  0x8c   : > { %v2435_v25 = vadd.f32 %v1460_v52, %v1392_v28  ;;  %v797_v19 = vadd.f32 %v765_v49, %v665_v27  ;;  %v963_v26 = vmul.f32 %v2012_v46, %v629_v32  ;;  %v896_v41 = vadd.f32 %v864_v36, %v796_v11  ;;  %v830_v36 = vld [vmem:[#allocation2 + $0x10a] sm:$0xff] }
  0x8d   : > { %v1094_v61 = vadd.f32 %v1062_v2, %v994_v13  ;;  %v1393_v34 = vadd.f32 %v1361_v4, %v1293_v35  ;;  %v1162_v22 = vmul.f32 %v2014_v47, %v828_v63  ;;  %v1262_v21 = vmul.f32 %v2016_v50, %v629_v32 }
  0x8e   : > { %v995_v8 = vadd.f32 %v963_v26, %v895_v40  ;;  %v1461_v38 = vmul.f32 %v2088_v14, %v828_v63  ;;  %v448_v49 = vadd.f32 %v2444_v42, %v409_v39  ;;  %v865_v57 = vmul.f32 %v1993_v15, %v829_v5  ;;  %v631_v63 = vld [vmem:[#allocation2 + $0x110] sm:$0xff] }
  0x8f   : > { %v1194_v16 = vadd.f32 %v1162_v22, %v1094_v61  ;;  %v964_v2 = vmul.f32 %v2012_v46, %v630_v60  ;;  %v477_v4 = vmax.f32 %v2403_v37, 0.0  ;;  %v1294_v12 = vadd.f32 %v1262_v21, %v1193_v48 }
  0x90   : > { %v1095_v62 = vadd.f32 %v1063_v55, %v995_v8  ;;  %v2450_v23 = vadd.f32 %v1461_v38, %v1393_v34  ;;  %v1263_v32 = vmul.f32 %v2016_v50, %v630_v60  ;;  %v897_v44 = vadd.f32 %v865_v57, %v797_v19  ;;  %v371_v55 = vld [vmem:[%s1974_s9 + $0xd0] sm:$0xff] }
  0x91   : > { %v1163_v52 = vmul.f32 %v2014_v47, %v829_v5  ;;  %v996_v59 = vadd.f32 %v964_v2, %v896_v41  ;;  %v478_v39 = vmax.f32 %v2411_v7, 0.0  ;;  %v1394_v40 = vadd.f32 %v2400_v18, %v1294_v12  ;;  %v831_v8 = vld [vmem:[#allocation2 + $0x112] sm:$0xff] }
  0x92   : > { %2860 = vst [vmem:[#allocation7_spill] sm:$0xff] %v2450_v23  ;;  %v1462_v28 = vmul.f32 %v2088_v14, %v829_v5  ;;  %v666_v11 = vmul.f32 %v1986_v9, %v630_v60  ;;  %v1295_v37 = vadd.f32 %v1263_v32, %v1194_v16  ;;  %v667_v13 = vmul.f32 %v1986_v9, %v631_v63 }
  0x93   : > { %v1096_v27 = vadd.f32 %v1064_v0, %v996_v59  ;;  %v767_v35 = vmul.f32 %v1988_v10, %v2408_v58  ;;  %v965_v48 = vmul.f32 %v2012_v46, %v631_v63  ;;  %v1195_v19 = vadd.f32 %v1163_v52, %v1095_v62  ;;  %v2470_v0 = vld [vmem:[%s2842_s2] ss:$0 sm:$0xff] }
  0x94   : > { %v2463_v26 = vadd.f32 %v1462_v28, %v1394_v40  ;;  %v1395_v7 = vadd.f32 %v1363_v53, %v1295_v37  ;;  %v1065_v18 = vmul.f32 %v2003_v31, %v2408_v58  ;;  %v410_v60 = vmul.f32 %v2470_v0, %v371_v55  ;;  %v373_v37 = vld [vmem:[%s1974_s9 + $0xe0] sm:$0xff]  ;;  %v374_v55 = vld [vmem:[%s1974_s9 + $0xe8] sm:$0xff] }
  0x95   : > { %v997_v5 = vadd.f32 %v965_v48, %v897_v44  ;;  %v798_v61 = vadd.f32 %v2406_v45, %v666_v11  ;;  %v1264_v34 = vmul.f32 %v2016_v50, %v631_v63  ;;  %v1364_v41 = vmul.f32 %v2020_v54, %v2408_v58 }
  0x96   : > { %2861 = vst [vmem:[#allocation8_spill] sm:$0xff] %v2463_v26  ;;  %v1463_v53 = vmul.f32 %v2088_v14, %v830_v36  ;;  %v799_v22 = vadd.f32 %v767_v35, %v667_v13  ;;  %v509_v38 = vmin.f32 %v477_v4, 6.0  ;;  %v510_v57 = vmin.f32 %v478_v39, 6.0  ;;  %v375_v13 = vld [vmem:[%s1974_s9 + $0xf0] sm:$0xff] }
  0x97   : > { %v1097_v21 = vadd.f32 %v1065_v18, %v997_v5  ;;  %v1296_v16 = vadd.f32 %v1264_v34, %v1195_v19  ;;  %v479_v62 = vmax.f32 %v2414_v29, 0.0  ;;  %v480_v12 = vmax.f32 %v448_v49, 0.0  ;;  %v372_v49 = vld [vmem:[%s1974_s9 + $0xd8] sm:$0xff] }
  0x98   : > { %v2478_v2 = vadd.f32 %v1463_v53, %v1395_v7  ;;  %v866_v45 = vmul.f32 %v1993_v15, %v830_v36  ;;  %596 = vst [vmem:[#allocation2 + $0x121] sm:$0xff] %v509_v38  ;;  %597 = vst [vmem:[#allocation2 + $0x129] sm:$0xff] %v510_v57  ;;  %v867_v58 = vmul.f32 %v1993_v15, %v831_v8 }
  0x99   : > { %v1164_v32 = vmul.f32 %v2014_v47, %v830_v36  ;;  %v1396_v4 = vadd.f32 %v1364_v41, %v1296_v16  ;;  %v1464_v63 = vmul.f32 %v2088_v14, %v831_v8  ;;  %v1165_v44 = vmul.f32 %v2014_v47, %v831_v8 }
  0x9a   : > { %2862 = vst [vmem:[#allocation9_spill] sm:$0xff] %v2478_v2  ;;  %v511_v52 = vmin.f32 %v479_v62, 6.0  ;;  %v512_v59 = vmin.f32 %v480_v12, 6.0  ;;  %v449_v29 = vadd.f32 %v2444_v42, %v410_v60  ;;  %v898_v39 = vadd.f32 %v866_v45, %v798_v61 }
  0x9b   : > { %v899_v40 = vadd.f32 %v867_v58, %v799_v22  ;;  %v1196_v28 = vadd.f32 %v1164_v32, %v1096_v27  ;;  %v2488_v11 = vadd.f32 %v1464_v63, %v1396_v4  ;;  %v1197_v35 = vadd.f32 %v1165_v44, %v1097_v21 }
  0x9c   : > { %v768_v36 = vmul.f32 %v1988_v10, %v509_v38  ;;  %v1066_v14 = vmul.f32 %v2003_v31, %v509_v38  ;;  %v1365_v48 = vmul.f32 %v2020_v54, %v509_v38  ;;  %598 = vst [vmem:[#allocation2 + $0x139] sm:$0xff] %v511_v52  ;;  %599 = vst [vmem:[#allocation2 + $0x141] sm:$0xff] %v512_v59  ;;  %v481_v18 = vmax.f32 %v449_v29, 0.0 }
  0x9d   : > { %2863 = vst [vmem:[#allocation10_spill] sm:$0xff] %v2488_v11  ;;  %v769_v19 = vmul.f32 %v1988_v10, %v510_v57  ;;  %v1067_v7 = vmul.f32 %v2003_v31, %v510_v57  ;;  %v1366_v27 = vmul.f32 %v2020_v54, %v510_v57  ;;  %v411_v5 = vmul.f32 %v2470_v0, %v372_v49 }
  0x9e   : > { %v412_v60 = vmul.f32 %v2470_v0, %v373_v37  ;;  %v413_v61 = vmul.f32 %v2470_v0, %v374_v55  ;;  %v2503_v34 = vmul.f32 %v2470_v0, %v375_v13  ;;  %v770_v8 = vmul.f32 %v1988_v10, %v511_v52 }
  0x9f   : > { %v632_v41 = vld [vmem:[#allocation2 + $0x120] sm:$0xff]  ;;  %v633_v53 = vld [vmem:[#allocation2 + $0x128] sm:$0xff]  ;;  %v1068_v21 = vmul.f32 %v2003_v31, %v511_v52  ;;  %v1367_v38 = vmul.f32 %v2020_v54, %v511_v52  ;;  %v2508_v57 = vmin.f32 %v481_v18, 6.0  ;;  %v771_v45 = vmul.f32 %v1988_v10, %v512_v59 }
  0xa0   : > { %v832_v22 = vld [vmem:[#allocation2 + $0x122] sm:$0xff]  ;;  %v668_v16 = vmul.f32 %v1986_v9, %v632_v41  ;;  %v966_v62 = vmul.f32 %v2012_v46, %v632_v41  ;;  %v1265_v12 = vmul.f32 %v2016_v50, %v632_v41  ;;  %v669_v58 = vmul.f32 %v1986_v9, %v633_v53  ;;  %v833_v26 = vld [vmem:[#allocation2 + $0x12a] sm:$0xff] }
  0xa1   : > { %v967_v32 = vmul.f32 %v2012_v46, %v633_v53  ;;  %v2517_v4 = vmul.f32 %v2003_v31, %v512_v59  ;;  %v1368_v63 = vmul.f32 %v2020_v54, %v512_v59  ;;  %600 = vst [vmem:[#allocation2 + $0x151] sm:$0xff] %v2508_v57  ;;  %v868_v49 = vmul.f32 %v1993_v15, %v832_v22  ;;  %v2528_v59 = vld [vmem:[%s2841_s1 + $0x8] ss:$0 sm:$0xff] }
  0xa2   : > { %v800_v44 = vadd.f32 %v768_v36, %v668_v16  ;;  %v998_v52 = vadd.f32 %v966_v62, %v898_v39  ;;  %v1297_v29 = vadd.f32 %v1265_v12, %v1196_v28  ;;  %v1166_v55 = vmul.f32 %v2014_v47, %v832_v22 }
  0xa3   : > { %v999_v37 = vadd.f32 %v967_v32, %v899_v40  ;;  %v1266_v13 = vmul.f32 %v2016_v50, %v633_v53  ;;  %v634_v18 = vld [vmem:[#allocation2 + $0x138] sm:$0xff]  ;;  %v450_v41 = vadd.f32 %v2444_v42, %v411_v5  ;;  %v1465_v39 = vmul.f32 %v2528_v59, %v832_v22 }
  0xa4   : > { %v1098_v11 = vadd.f32 %v1066_v14, %v998_v52  ;;  %v1397_v2 = vadd.f32 %v1365_v48, %v1297_v29  ;;  %v900_v23 = vadd.f32 %v868_v49, %v800_v44  ;;  %v801_v28 = vadd.f32 %v769_v19, %v669_v58  ;;  %v635_v19 = vld [vmem:[#allocation2 + $0x140] sm:$0xff] }
  0xa5   : > { %v1099_v40 = vadd.f32 %v1067_v7, %v999_v37  ;;  %v1298_v36 = vadd.f32 %v1266_v13, %v1197_v35  ;;  %v670_v16 = vmul.f32 %v1986_v9, %v634_v18  ;;  %v968_v14 = vmul.f32 %v2012_v46, %v634_v18  ;;  %v834_v58 = vld [vmem:[#allocation2 + $0x13a] sm:$0xff]  ;;  %v835_v37 = vld [vmem:[#allocation2 + $0x142] sm:$0xff] }
  0xa6   : > { %v1198_v53 = vadd.f32 %v1166_v55, %v1098_v11  ;;  %v2532_v62 = vadd.f32 %v1465_v39, %v1397_v2  ;;  %v1267_v48 = vmul.f32 %v2016_v50, %v634_v18  ;;  %v869_v5 = vmul.f32 %v1993_v15, %v833_v26  ;;  %v376_v55 = vld [vmem:[%s1974_s9 + $0xf8] sm:$0xff] }
  0xa7   : > { %v1167_v12 = vmul.f32 %v2014_v47, %v833_v26  ;;  %v1398_v32 = vadd.f32 %v1366_v27, %v1298_v36  ;;  %v1466_v22 = vmul.f32 %v2528_v59, %v833_v26  ;;  %v1000_v7 = vadd.f32 %v968_v14, %v900_v23 }
  0xa8   : > { %v1299_v35 = vadd.f32 %v1267_v48, %v1198_v53  ;;  %v451_v11 = vadd.f32 %v2444_v42, %v412_v60  ;;  %v452_v2 = vadd.f32 %v2444_v42, %v413_v61  ;;  %v901_v44 = vadd.f32 %v869_v5, %v801_v28  ;;  %v636_v28 = vld [vmem:[#allocation2 + $0x150] sm:$0xff] }
  0xa9   : > { %v1199_v52 = vadd.f32 %v1167_v12, %v1099_v40  ;;  %v2541_v29 = vadd.f32 %v1466_v22, %v1398_v32  ;;  %v802_v49 = vadd.f32 %v770_v8, %v670_v16  ;;  %v1100_v13 = vadd.f32 %v1068_v21, %v1000_v7 }
  0xaa   : > { %v1399_v18 = vadd.f32 %v1367_v38, %v1299_v35  ;;  %v671_v27 = vmul.f32 %v1986_v9, %v635_v19  ;;  %v482_v26 = vmax.f32 %v450_v41, 0.0  ;;  %v870_v23 = vmul.f32 %v1993_v15, %v834_v58 }
  0xab   : > { %v969_v39 = vmul.f32 %v2012_v46, %v635_v19  ;;  %v1268_v60 = vmul.f32 %v2016_v50, %v635_v19  ;;  %v1467_v61 = vmul.f32 %v2528_v59, %v834_v58  ;;  %v871_v40 = vmul.f32 %v1993_v15, %v835_v37 }
  0xac   : > { %v1168_v8 = vmul.f32 %v2014_v47, %v834_v58  ;;  %v453_v21 = vadd.f32 %v2444_v42, %v2503_v34  ;;  %v415_v38 = vmul.f32 %v2470_v0, %v376_v55  ;;  %v902_v36 = vadd.f32 %v870_v23, %v802_v49 }
  0xad   : > { %v1001_v41 = vadd.f32 %v969_v39, %v901_v44  ;;  %v1300_v16 = vadd.f32 %v1268_v60, %v1199_v52  ;;  %v2554_v53 = vadd.f32 %v1467_v61, %v1399_v18  ;;  %v803_v14 = vadd.f32 %v771_v45, %v671_v27 }
  0xae   : > { %v1200_v48 = vadd.f32 %v1168_v8, %v1100_v13  ;;  %v1468_v5 = vmul.f32 %v2528_v59, %v835_v37  ;;  %v672_v12 = vmul.f32 %v1986_v9, %v636_v28  ;;  %v772_v22 = vmul.f32 %v1988_v10, %v2508_v57 }
  0xaf   : > { %v1400_v32 = vadd.f32 %v1368_v63, %v1300_v16  ;;  %v970_v19 = vmul.f32 %v2012_v46, %v636_v28  ;;  %v514_v34 = vmin.f32 %v482_v26, 6.0  ;;  %v1269_v0 = vmul.f32 %v2016_v50, %v636_v28  ;;  %v1877_v26 = vld [vmem:[#allocation2] sm:$0xff] }
  0xb0   : > { %v483_v7 = vmax.f32 %v451_v11, 0.0  ;;  %v484_v35 = vmax.f32 %v452_v2, 0.0  ;;  %v485_v58 = vmax.f32 %v453_v21, 0.0  ;;  %v1101_v44 = vadd.f32 %v2517_v4, %v1001_v41 }
  0xb1   : > { %v2563_v45 = vadd.f32 %v1468_v5, %v1400_v32  ;;  %v1002_v52 = vadd.f32 %v970_v19, %v902_v36  ;;  %v1070_v49 = vmul.f32 %v2003_v31, %v2508_v57  ;;  %601 = vst [vmem:[#allocation2 + $0x159] sm:$0xff] %v514_v34  ;;  %v1301_v63 = vadd.f32 %v1269_v0, %v1200_v48 }
  0xb2   : > { %v1369_v55 = vmul.f32 %v2020_v54, %v2508_v57  ;;  %v515_v13 = vmin.f32 %v483_v7, 6.0  ;;  %v516_v18 = vmin.f32 %v484_v35, 6.0  ;;  %v1169_v27 = vmul.f32 %v2014_v47, %v835_v37 }
  0xb3   : > { %v517_v11 = vmin.f32 %v485_v58, 6.0  ;;  %v454_v2 = vadd.f32 %v2444_v42, %v415_v38  ;;  %v2572_v4 = vmul.f32 %v1877_v26, %v2016_v50  ;;  %v903_v23 = vadd.f32 %v871_v40, %v803_v14 }
  0xb4   : > { %602 = vst [vmem:[#allocation2 + $0x169] sm:$0xff] %v515_v13  ;;  %603 = vst [vmem:[#allocation2 + $0x171] sm:$0xff] %v516_v18  ;;  %v1201_v39 = vadd.f32 %v1169_v27, %v1101_v44  ;;  %v804_v60 = vadd.f32 %v772_v22, %v672_v12  ;;  %v1102_v61 = vadd.f32 %v1070_v49, %v1002_v52 }
  0xb5   : > { %v773_v28 = vmul.f32 %v1988_v10, %v514_v34  ;;  %604 = vst [vmem:[#allocation2 + $0x181] sm:$0xff] %v517_v11  ;;  %v1401_v57 = vadd.f32 %v1369_v55, %v1301_v63  ;;  %v1071_v8 = vmul.f32 %v2003_v31, %v514_v34  ;;  %v1370_v37 = vmul.f32 %v2020_v54, %v514_v34 }
  0xb6   : > { %v486_v21 = vmax.f32 %v454_v2, 0.0  ;;  %v774_v42 = vmul.f32 %v1988_v10, %v515_v13  ;;  %v1072_v38 = vmul.f32 %v2003_v31, %v515_v13  ;;  %v1371_v40 = vmul.f32 %v2020_v54, %v515_v13 }
  0xb7   : > { %v775_v36 = vmul.f32 %v1988_v10, %v516_v18  ;;  %v1073_v48 = vmul.f32 %v2003_v31, %v516_v18  ;;  %v2583_v5 = vmul.f32 %v2020_v54, %v516_v18  ;;  %v2586_v12 = vmul.f32 %v2003_v31, %v517_v11 }
  0xb8   : > { %v637_v41 = vld [vmem:[#allocation2 + $0x158] sm:$0xff]  ;;  %v2588_v32 = vmin.f32 %v486_v21, 6.0  ;;  %v2594_v10 = vmul.f32 %v2020_v54, %v517_v11 }
  0xb9   : > { %v836_v16 = vld [vmem:[#allocation2 + $0x152] sm:$0xff]  ;;  %v837_v14 = vld [vmem:[#allocation2 + $0x15a] sm:$0xff]  ;;  %v673_v22 = vmul.f32 %v1986_v9, %v637_v41  ;;  %v971_v34 = vmul.f32 %v2012_v46, %v637_v41  ;;  %v1270_v35 = vmul.f32 %v2016_v50, %v637_v41 }
  0xba   : > { %v872_v19 = vmul.f32 %v1993_v15, %v836_v16  ;;  %v873_v0 = vmul.f32 %v1993_v15, %v837_v14  ;;  %v1170_v7 = vmul.f32 %v2014_v47, %v836_v16  ;;  %v1469_v58 = vmul.f32 %v2528_v59, %v836_v16  ;;  %605 = vst [vmem:[#allocation2 + $0x189] sm:$0xff] %v2588_v32 }
  0xbb   : > { %v805_v44 = vadd.f32 %v773_v28, %v673_v22  ;;  %v1003_v49 = vadd.f32 %v971_v34, %v903_v23  ;;  %v1171_v63 = vmul.f32 %v2014_v47, %v837_v14  ;;  %v638_v55 = vld [vmem:[#allocation2 + $0x168] sm:$0xff]  ;;  %v639_v13 = vld [vmem:[#allocation2 + $0x170] sm:$0xff]  ;;  %v1302_v27 = vadd.f32 %v1270_v35, %v1201_v39 }
  0xbc   : > { %v904_v52 = vadd.f32 %v872_v19, %v804_v60  ;;  %v1202_v18 = vadd.f32 %v1170_v7, %v1102_v61  ;;  %v2602_v11 = vadd.f32 %v1469_v58, %v1401_v57  ;;  %v674_v2 = vmul.f32 %v1986_v9, %v638_v55  ;;  %v838_v26 = vld [vmem:[#allocation2 + $0x16a] sm:$0xff]  ;;  %v839_v60 = vld [vmem:[#allocation2 + $0x172] sm:$0xff] }
  0xbd   : > { %v1103_v21 = vadd.f32 %v1071_v8, %v1003_v49  ;;  %v1470_v41 = vmul.f32 %v2528_v59, %v837_v14  ;;  %v972_v16 = vmul.f32 %v2012_v46, %v638_v55  ;;  %v1271_v28 = vmul.f32 %v2016_v50, %v638_v55  ;;  %v938_v49 = vld [vmem:[#allocation2 + $0x180] sm:$0xff] }
  0xbe   : > { %2864 = vst [vmem:[#allocation11_spill] sm:$0xff] %v2602_v11  ;;  %v905_v23 = vadd.f32 %v873_v0, %v805_v44  ;;  %v1402_v22 = vadd.f32 %v1370_v37, %v1302_v27  ;;  %v806_v19 = vadd.f32 %v774_v42, %v674_v2  ;;  %v675_v34 = vmul.f32 %v1986_v9, %v639_v13 }
  0xbf   : > { %v1203_v61 = vadd.f32 %v1171_v63, %v1103_v21  ;;  %v1004_v39 = vadd.f32 %v972_v16, %v904_v52  ;;  %v1303_v57 = vadd.f32 %v1271_v28, %v1202_v18  ;;  %v874_v7 = vmul.f32 %v1993_v15, %v838_v26 }
  0xc0   : > { %v2610_v35 = vadd.f32 %v1470_v41, %v1402_v22  ;;  %v807_v8 = vadd.f32 %v775_v36, %v675_v34  ;;  %v875_v14 = vmul.f32 %v1993_v15, %v839_v60  ;;  %v973_v58 = vmul.f32 %v2012_v46, %v639_v13  ;;  %v1339_v22 = vld [vmem:[#allocation2 + $0x199] sm:$0xff] }
  0xc1   : > { %v1104_v55 = vadd.f32 %v1072_v38, %v1004_v39  ;;  %v1403_v11 = vadd.f32 %v1371_v40, %v1303_v57  ;;  %v906_v0 = vadd.f32 %v874_v7, %v806_v19  ;;  %v1172_v37 = vmul.f32 %v2014_v47, %v838_v26  ;;  %v939_v42 = vld [vmem:[#allocation2 + $0x188] sm:$0xff] }
  0xc2   : > { %v907_v9 = vadd.f32 %v875_v14, %v807_v8  ;;  %v1005_v44 = vadd.f32 %v973_v58, %v905_v23  ;;  %v1272_v52 = vmul.f32 %v2016_v50, %v639_v13  ;;  %v1471_v63 = vmul.f32 %v2528_v59, %v838_v26  ;;  %v1138_v2 = vld [vmem:[#allocation2 + $0x182] sm:$0xff]  ;;  %v1139_v23 = vld [vmem:[#allocation2 + $0x18a] sm:$0xff] }
  0xc3   : > { %v1173_v18 = vmul.f32 %v2014_v47, %v839_v60  ;;  %v1204_v36 = vadd.f32 %v1172_v37, %v1104_v55  ;;  %v974_v15 = vmul.f32 %v2012_v46, %v938_v49  ;;  %v1273_v27 = vmul.f32 %v2016_v50, %v938_v49  ;;  %v1439_v55 = vld [vmem:[#allocation2 + $0x19a] sm:$0xff] }
  0xc4   : > { %v1105_v38 = vadd.f32 %v1073_v48, %v1005_v44  ;;  %v1304_v40 = vadd.f32 %v1272_v52, %v1203_v61  ;;  %v2620_v21 = vadd.f32 %v1471_v63, %v1403_v11  ;;  %v975_v41 = vmul.f32 %v2012_v46, %v939_v42  ;;  %v1340_v61 = vld [vmem:[#allocation2 + $0x1a1] sm:$0xff] }
  0xc5   : > { %v1472_v16 = vmul.f32 %v2528_v59, %v839_v60  ;;  %v1006_v28 = vadd.f32 %v974_v15, %v906_v0  ;;  %v1305_v13 = vadd.f32 %v1273_v27, %v1204_v36  ;;  %v1075_v26 = vmul.f32 %v2003_v31, %v2588_v32 }
  0xc6   : > { %v1205_v19 = vadd.f32 %v1173_v18, %v1105_v38  ;;  %v1404_v34 = vadd.f32 %v2583_v5, %v1304_v40  ;;  %v1007_v39 = vadd.f32 %v975_v41, %v907_v9  ;;  %v1174_v48 = vmul.f32 %v2014_v47, %v1138_v2 }
  0xc7   : > { %v1106_v11 = vadd.f32 %v2586_v12, %v1006_v28  ;;  %v1405_v46 = vadd.f32 %v2594_v10, %v1305_v13  ;;  %v1274_v60 = vmul.f32 %v2016_v50, %v939_v42  ;;  %v1374_v57 = vmul.f32 %v2020_v54, %v2588_v32  ;;  %v1440_v50 = vld [vmem:[#allocation2 + $0x1a2] sm:$0xff] }
  0xc8   : > { %v2633_v7 = vadd.f32 %v1472_v16, %v1404_v34  ;;  %v1107_v31 = vadd.f32 %v1075_v26, %v1007_v39  ;;  %v1175_v8 = vmul.f32 %v2014_v47, %v1139_v23  ;;  %v1473_v5 = vmul.f32 %v2528_v59, %v1138_v2 }
  0xc9   : > { %v1375_v14 = vmul.f32 %v2020_v54, %v1339_v22  ;;  %v1206_v58 = vadd.f32 %v1174_v48, %v1106_v11  ;;  %v1306_v49 = vadd.f32 %v1274_v60, %v1205_v19  ;;  %v1376_v12 = vmul.f32 %v2020_v54, %v1340_v61 }
  0xca   : > { %v1207_v10 = vadd.f32 %v1175_v8, %v1107_v31  ;;  %v2639_v0 = vadd.f32 %v1473_v5, %v1405_v46  ;;  %v1474_v32 = vmul.f32 %v2528_v59, %v1139_v23  ;;  %v1475_v9 = vmul.f32 %v2528_v59, %v1439_v55  ;;  %1512 = sbr.rel (%p1841_p5) target bundleno = 209 (0xd1), region = 40 }
  0xcb   : > { %v1406_v37 = vadd.f32 %v1374_v57, %v1306_v49  ;;  %v1307_v42 = vadd.f32 %v2572_v4, %v1206_v58  ;;  %v1476_v63 = vmul.f32 %v2528_v59, %v1440_v50  ;;  %v1903_v15 = vmov (!%p1841_p5), 0.0  }
  0xcc   : > { %v1308_v47 = vadd.f32 %v2572_v4, %v1207_v10  ;;  %1513 = vst [vmem:[%s2845_s5] sm:$0x1] (!%p1841_p5), %v1903_v15  ;;  %1514 = vst [vmem:[%s2846_s6] sm:$0x1] (!%p1841_p5), %v1903_v15 }
  0xcd   : > { %v2645_v44 = vadd.f32 %v1474_v32, %v1406_v37  ;;  %v1407_v52 = vadd.f32 %v1375_v14, %v1307_v42 }
  0xce   : > { %v1408_v18 = vadd.f32 %v1376_v12, %v1308_v47 }
  0xcf   : > { %v2648_v54 = vadd.f32 %v1475_v9, %v1407_v52 }
  0xd0   : > { %v2650_v36 = vadd.f32 %v1476_v63, %v1408_v18 }
  0xd1 PF: > { %v1516_v59 = vadd.f32 %v2111_v6, %v2102_v56  ;;  %1627 = vst [vmem:[%s1979_s12] sm:$0xff] %v2102_v56  ;;  %1628 = vst [vmem:[%s1979_s12 + $0x8] sm:$0xff] %v2111_v6  ;;  %v2865_v4 = vld [vmem:[#allocation3_spill] sm:$0xff]  ;;  %v2866_v27 = vld [vmem:[#allocation4_spill] sm:$0xff]  ;;  %v1556_v22 = vmul.f32 %v2102_v56, %v2102_v56  ;;  %v1557_v19 = vmul.f32 %v2111_v6, %v2111_v6 }
  0xd2   : > { %1629 = vst [vmem:[%s1979_s12 + $0x10] sm:$0xff] %v2127_v33  ;;  %1630 = vst [vmem:[%s1979_s12 + $0x18] sm:$0xff] %v2147_v51  ;;  %v2867_v2 = vld [vmem:[#allocation5_spill] sm:$0xff]  ;;  %v2868_v38 = vld [vmem:[#allocation6_spill] sm:$0xff]  ;;  %v1558_v39 = vmul.f32 %v2127_v33, %v2127_v33  ;;  %v1559_v61 = vmul.f32 %v2147_v51, %v2147_v51  ;;  %v1560_v60 = vmul.f32 %v2209_v30, %v2209_v30 }
  0xd3   : > { %1631 = vst [vmem:[%s1979_s12 + $0x20] sm:$0xff] %v2209_v30  ;;  %1632 = vst [vmem:[%s1979_s12 + $0x28] sm:$0xff] %v2865_v4  ;;  %v2869_v40 = vld [vmem:[#allocation7_spill] sm:$0xff]  ;;  %v2870_v41 = vld [vmem:[#allocation8_spill] sm:$0xff]  ;;  %v1517_v26 = vadd.f32 %v1516_v59, %v2127_v33  ;;  %v1588_v11 = vadd.f32 %v1557_v19, %v1556_v22  ;;  %v1561_v6 = vmul.f32 %v2865_v4, %v2865_v4 }
  0xd4   : > { %1633 = vst [vmem:[%s1979_s12 + $0x30] sm:$0xff] %v2866_v27  ;;  %1634 = vst [vmem:[%s1979_s12 + $0x38] sm:$0xff] %v2867_v2  ;;  %v2871_v16 = vld [vmem:[#allocation9_spill] sm:$0xff]  ;;  %v2872_v28 = vld [vmem:[#allocation10_spill] sm:$0xff]  ;;  %v1562_v8 = vmul.f32 %v2866_v27, %v2866_v27  ;;  %v1563_v14 = vmul.f32 %v2867_v2, %v2867_v2  ;;  %v1564_v49 = vmul.f32 %v2318_v24, %v2318_v24 }
  0xd5   : > { %1635 = vst [vmem:[%s1979_s12 + $0x40] sm:$0xff] %v2318_v24  ;;  %1636 = vst [vmem:[%s1979_s12 + $0x48] sm:$0xff] %v2327_v3  ;;  %v2873_v13 = vld [vmem:[#allocation11_spill] sm:$0xff]  ;;  %v1518_v23 = vadd.f32 %v1517_v26, %v2147_v51  ;;  %v1589_v56 = vadd.f32 %v1588_v11, %v1558_v39  ;;  %v1565_v10 = vmul.f32 %v2327_v3, %v2327_v3 }
  0xd6   : > { %1637 = vst [vmem:[%s1979_s12 + $0x50] sm:$0xff] %v2339_v1  ;;  %1638 = vst [vmem:[%s1979_s12 + $0x58] sm:$0xff] %v2351_v17  ;;  %v1566_v32 = vmul.f32 %v2339_v1, %v2339_v1  ;;  %v1567_v9 = vmul.f32 %v2351_v17, %v2351_v17  ;;  %v1568_v63 = vmul.f32 %v2362_v20, %v2362_v20 }
  0xd7   : > { %1639 = vst [vmem:[%s1979_s12 + $0x60] sm:$0xff] %v2362_v20  ;;  %1640 = vst [vmem:[%s1979_s12 + $0x68] sm:$0xff] %v2868_v38  ;;  %v1519_v34 = vadd.f32 %v1518_v23, %v2209_v30  ;;  %v1590_v31 = vadd.f32 %v1589_v56, %v1559_v61  ;;  %v1569_v15 = vmul.f32 %v2868_v38, %v2868_v38 }
  0xd8   : > { %1641 = vst [vmem:[%s1979_s12 + $0x70] sm:$0xff] %v2426_v43  ;;  %1642 = vst [vmem:[%s1979_s12 + $0x78] sm:$0xff] %v2435_v25  ;;  %v1572_v23 = vmul.f32 %v2869_v40, %v2869_v40  ;;  %v1573_v19 = vmul.f32 %v2870_v41, %v2870_v41  ;;  %v1574_v39 = vmul.f32 %v2871_v16, %v2871_v16 }
  0xd9   : > { %1643 = vst [vmem:[%s1979_s12 + $0x80] sm:$0xff] %v2869_v40  ;;  %1644 = vst [vmem:[%s1979_s12 + $0x88] sm:$0xff] %v2870_v41  ;;  %v1520_v48 = vadd.f32 %v1519_v34, %v2865_v4  ;;  %v1591_v5 = vadd.f32 %v1590_v31, %v1560_v60  ;;  %v1570_v4 = vmul.f32 %v2426_v43, %v2426_v43 }
  0xda   : > { %1645 = vst [vmem:[%s1979_s12 + $0x90] sm:$0xff] %v2871_v16  ;;  %1646 = vst [vmem:[%s1979_s12 + $0x98] sm:$0xff] %v2872_v28  ;;  %v1575_v61 = vmul.f32 %v2872_v28, %v2872_v28  ;;  %v1577_v56 = vmul.f32 %v2541_v29, %v2541_v29 }
  0xdb   : > { %1647 = vst [vmem:[%s1979_s12 + $0xa0] sm:$0xff] %v2532_v62  ;;  %1648 = vst [vmem:[%s1979_s12 + $0xa8] sm:$0xff] %v2541_v29  ;;  %v1521_v46 = vadd.f32 %v1520_v48, %v2866_v27  ;;  %v1592_v58 = vadd.f32 %v1591_v5, %v1561_v6  ;;  %v1578_v6 = vmul.f32 %v2554_v53, %v2554_v53 }
  0xdc   : > { %1649 = vst [vmem:[%s1979_s12 + $0xb0] sm:$0xff] %v2554_v53  ;;  %1650 = vst [vmem:[%s1979_s12 + $0xb8] sm:$0xff] %v2563_v45  ;;  %v1580_v5 = vmul.f32 %v2873_v13, %v2873_v13 }
  0xdd   : > { %1651 = vst [vmem:[%s1979_s12 + $0xc0] sm:$0xff] %v2873_v13  ;;  %1652 = vst [vmem:[%s1979_s12 + $0xc8] sm:$0xff] %v2610_v35  ;;  %v1522_v57 = vadd.f32 %v1521_v46, %v2867_v2  ;;  %v1593_v55 = vadd.f32 %v1592_v58, %v1562_v8  ;;  %v1571_v2 = vmul.f32 %v2435_v25, %v2435_v25 }
  0xde   : > { %1653 = vst [vmem:[%s1979_s12 + $0xd0] sm:$0xff] %v2620_v21  ;;  %1654 = vst [vmem:[%s1979_s12 + $0xd8] sm:$0xff] %v2633_v7  ;;  %v1576_v46 = vmul.f32 %v2532_v62, %v2532_v62 }
  0xdf   : > { %1655 = vst [vmem:[%s1979_s12 + $0xe0] sm:$0xff] %v2639_v0  ;;  %1656 = vst [vmem:[%s1979_s12 + $0xe8] sm:$0xff] %v2645_v44  ;;  %v1523_v33 = vadd.f32 %v1522_v57, %v2318_v24  ;;  %v1594_v50 = vadd.f32 %v1593_v55, %v1563_v14  ;;  %v1581_v14 = vmul.f32 %v2610_v35, %v2610_v35 }
  0xe0   : > { %1657 = vst [vmem:[%s1979_s12 + $0xf0] sm:$0xff] %v2648_v54  ;;  %1658 = vst [vmem:[%s1979_s12 + $0xf8] sm:$0xff] %v2650_v36  ;;  %v1583_v55 = vmul.f32 %v2633_v7, %v2633_v7 }
  0xe1   : > { %v1524_v51 = vadd.f32 %v1523_v33, %v2327_v3  ;;  %v1595_v42 = vadd.f32 %v1594_v50, %v1564_v49  ;;  %v1579_v33 = vmul.f32 %v2563_v45, %v2563_v45 }
  0xe3   : > { %v1525_v30 = vadd.f32 %v1524_v51, %v2339_v1  ;;  %v1596_v52 = vadd.f32 %v1595_v42, %v1565_v10  ;;  %v1584_v10 = vmul.f32 %v2639_v0, %v2639_v0  ;;  %v1586_v42 = vmul.f32 %v2648_v54, %v2648_v54 }
  0xe5   : > { %v1526_v12 = vadd.f32 %v1525_v30, %v2351_v17  ;;  %v1597_v18 = vadd.f32 %v1596_v52, %v1566_v32  ;;  %v1582_v30 = vmul.f32 %v2620_v21, %v2620_v21 }
  0xe7   : > { %v1527_v37 = vadd.f32 %v1526_v12, %v2362_v20  ;;  %v1598_v59 = vadd.f32 %v1597_v18, %v1567_v9 }
  0xe9   : > { %v1528_v47 = vadd.f32 %v1527_v37, %v2868_v38  ;;  %v1599_v27 = vadd.f32 %v1598_v59, %v1568_v63  ;;  %v1585_v37 = vmul.f32 %v2645_v44, %v2645_v44 }
  0xeb   : > { %v1529_v24 = vadd.f32 %v1528_v47, %v2426_v43  ;;  %v1600_v26 = vadd.f32 %v1599_v27, %v1569_v15 }
  0xed   : > { %v1530_v3 = vadd.f32 %v1529_v24, %v2435_v25  ;;  %v1601_v22 = vadd.f32 %v1600_v26, %v1570_v4 }
  0xef   : > { %v1531_v1 = vadd.f32 %v1530_v3, %v2869_v40  ;;  %v1602_v34 = vadd.f32 %v1601_v22, %v1571_v2 }
  0xf1   : > { %v1532_v17 = vadd.f32 %v1531_v1, %v2870_v41  ;;  %v1603_v48 = vadd.f32 %v1602_v34, %v1572_v23 }
  0xf3   : > { %v1533_v20 = vadd.f32 %v1532_v17, %v2871_v16  ;;  %v1604_v11 = vadd.f32 %v1603_v48, %v1573_v19  ;;  %v1555_v17 = vld [vmem:[%s2846_s6] sm:$0x1] }
  0xf5   : > { %v1534_v38 = vadd.f32 %v1533_v20, %v2872_v28  ;;  %v1605_v60 = vadd.f32 %v1604_v11, %v1574_v39 }
  0xf7   : > { %v1535_v43 = vadd.f32 %v1534_v38, %v2532_v62  ;;  %v1606_v57 = vadd.f32 %v1605_v60, %v1575_v61 }
  0xf9   : > { %v1536_v25 = vadd.f32 %v1535_v43, %v2541_v29  ;;  %v1607_v31 = vadd.f32 %v1606_v57, %v1576_v46 }
  0xfb   : > { %v1537_v40 = vadd.f32 %v1536_v25, %v2554_v53  ;;  %v1608_v8 = vadd.f32 %v1607_v31, %v1577_v56 }
  0xfd   : > { %v1538_v41 = vadd.f32 %v1537_v40, %v2563_v45  ;;  %v1609_v51 = vadd.f32 %v1608_v8, %v1578_v6 }
  0xff   : > { %v1539_v16 = vadd.f32 %v1538_v41, %v2873_v13  ;;  %v1610_v58 = vadd.f32 %v1609_v51, %v1579_v33 }
 0x101   : > { %v1540_v28 = vadd.f32 %v1539_v16, %v2610_v35  ;;  %v1611_v49 = vadd.f32 %v1610_v58, %v1580_v5 }
 0x103   : > { %v1541_v62 = vadd.f32 %v1540_v28, %v2620_v21  ;;  %v1612_v12 = vadd.f32 %v1611_v49, %v1581_v14 }
 0x105   : > { %v1542_v29 = vadd.f32 %v1541_v62, %v2633_v7  ;;  %v1613_v50 = vadd.f32 %v1612_v12, %v1582_v30  ;;  %v1587_v7 = vmul.f32 %v2650_v36, %v2650_v36 }
 0x107   : > { %v1543_v53 = vadd.f32 %v1542_v29, %v2639_v0  ;;  %v1614_v32 = vadd.f32 %v1613_v50, %v1583_v55 }
 0x109   : > { %v1544_v45 = vadd.f32 %v1543_v53, %v2645_v44  ;;  %v1615_v47 = vadd.f32 %v1614_v32, %v1584_v10  ;;  %v1515_v44 = vld [vmem:[%s2845_s5] sm:$0x1] }
 0x10b   : > { %v1545_v13 = vadd.f32 %v1544_v45, %v2648_v54  ;;  %v1616_v52 = vadd.f32 %v1615_v47, %v1585_v37 }
 0x10d   : > { %v1546_v35 = vadd.f32 %v1545_v13, %v2650_v36  ;;  %v1617_v63 = vadd.f32 %v1616_v52, %v1586_v42 }
 0x10f   : > { %v1547_v21 = vrot.slane %v1546_v35, 4  ;;  %v1618_v18 = vadd.f32 %v1617_v63, %v1587_v7 }
 0x111   : > { %v1548_v9 = vadd.f32 %v1547_v21, %v1546_v35  ;;  %v1619_v15 = vrot.slane %v1618_v18, 4 }
 0x113   : > { %v1549_v24 = vrot.slane %v1548_v9, 2  ;;  %v1620_v1 = vadd.f32 %v1619_v15, %v1618_v18 }
 0x115   : > { %v1550_v0 = vadd.f32 %v1549_v24, %v1548_v9  ;;  %v1621_v54 = vrot.slane %v1620_v1, 2 }
 0x117   : > { %v1551_v3 = vrot.slane %v1550_v0, 1  ;;  %v1622_v36 = vadd.f32 %v1621_v54, %v1620_v1 }
 0x119   : > { %v1552_v59 = vadd.f32 %v1551_v3, %v1550_v0  ;;  %v1623_v27 = vrot.slane %v1622_v36, 1 }
 0x11b   : > { %v1553_v4 = vadd.f32 %v1552_v59, %v1515_v44  ;;  %v1624_v2 = vadd.f32 %v1623_v27, %v1622_v36 }
 0x11d   : > { %1554 = vst [vmem:[%s2845_s5] sm:$0x1] %v1553_v4  ;;  %v1625_v26 = vadd.f32 %v1624_v2, %v1555_v17 }
 0x11f   : > { %1626 = vst [vmem:[%s2846_s6] sm:$0x1] %v1625_v26 }
 0x120 PF: > { %s17_s23 = sadd.s32 1, %s1900_s23   ;;  %s2874_s21 = smov %s1896_s22 }
 0x121   : > { %p14_p6 = scmp.ge.s32.totalorder %s17_s23, 4   ;;  %s2875_s22 = smov %s2877_s24 }
 0x123   :  { %16 = sbr.rel (!%p14_p6) target bundleno = 2 (0x2), region = 105 }

</bundles_post_ra>
